<compile_context>
chip_gen: v6e
topology: v6e:2x2x1
jax: 0.10.0
libtpu: 0.0.40
codegen_flags: <defaults>
</compile_context>

<pallas_src>
import functools
import math

import jax
import jax.numpy as jnp
from jax.experimental import pallas as pl
from jax.experimental.pallas import tpu as pltpu

LN_EPS = 1e-6

# Canonical parameter ordering (per-layer tensors stacked on a leading N axis,
# final LayerNorm params last).
_WEIGHT_NAMES = (
    "ln1_a", "ln1_b", "wq1", "bq1", "wk1", "bk1", "wv1", "bv1", "wo1", "bo1",
    "ln2_a", "ln2_b", "wq2", "bq2", "wk2", "bk2", "wv2", "bv2", "wo2", "bo2",
    "ln3_a", "ln3_b", "wf1", "bf1", "wf2", "bf2",
    "lnf_a", "lnf_b",
)
_MATMUL_WEIGHTS = frozenset(
    {"wq1", "wk1", "wv1", "wo1", "wq2", "wk2", "wv2", "wo2", "wf1", "wf2"})


# ---------------------------------------------------------------------------
# Pallas kernel: one (batch element, decoder layer) per grid step.
# ---------------------------------------------------------------------------
def decoder_kernel(x_ref, mem_ref, smask_ref, tmask_ref, *rest,
                   num_heads, num_layers):
    (ln1_a, ln1_b, wq1, bq1, wk1, bk1, wv1, bv1, wo1, bo1,
     ln2_a, ln2_b, wq2, bq2, wk2, bk2, wv2, bv2, wo2, bo2,
     ln3_a, ln3_b, wf1, bf1, wf2, bf2, lnf_a, lnf_b,
     o_ref, xc_ref, ctx_ref) = rest

    l = pl.program_id(1)
    T, D = xc_ref.shape
    H = num_heads
    dk = D // H
    mm_dtype = wq1.dtype                       # matmul streaming dtype (bf16/f32)
    scale = jnp.float32(1.0 / math.sqrt(dk))

    @pl.when(l == 0)
    def _init():
        # Load the residual stream into the layer-carry scratch once per batch
        # element (the x block stays VMEM-resident across the layer axis).
        xc_ref[...] = x_ref[0].astype(jnp.float32)

    def layer_norm(v, a_ref, b_ref):
        # PyTorch-spec LayerNorm: Bessel-corrected std, eps added to std.
        mean = jnp.mean(v, axis=-1, keepdims=True)
        c = v - mean
        var = jnp.sum(c * c, axis=-1, keepdims=True) * (1.0 / (D - 1))
        inv = pl.reciprocal(jnp.sqrt(var) + LN_EPS, approx=True)   # EUP slot
        return a_ref[0] * c * inv + b_ref[0]

    def proj(v, w_ref, b_ref):
        # Full-width (rows, D) @ (D, out) MXU matmul, f32 accumulation.
        return jnp.dot(v.astype(mm_dtype), w_ref[0],
                       preferred_element_type=jnp.float32) + b_ref[0]

    def softmax(s):
        s = s - jnp.max(s, axis=-1, keepdims=True)
        e = jnp.exp(s)
        return e * pl.reciprocal(jnp.sum(e, axis=-1, keepdims=True), approx=True)

    def mha(q_in, kv_in, mask, wq, bq, wk, bk, wv, bv, wo, bo):
        # Merged-head projections: one (rows, D) @ (D, D) matmul each.
        q = proj(q_in, wq, bq)                 # (T, D)  f32
        k = proj(kv_in, wk, bk)                # (kv, D) f32
        v = proj(kv_in, wv, bv)                # (kv, D) f32
        # Per-head score / softmax / context (inherently dk-wide contractions);
        # per-head context goes into the (T, D) slab so the output projection
        # below is a single full-width matmul.
        for h in range(H):                     # static unroll over heads
            sl = slice(h * dk, (h + 1) * dk)
            qh = q[:, sl].astype(mm_dtype)
            kh = k[:, sl].astype(mm_dtype)
            vh = v[:, sl].astype(mm_dtype)
            s = jax.lax.dot_general(qh, kh, (((1,), (1,)), ((), ())),
                                    preferred_element_type=jnp.float32) * scale
            s = jnp.where(mask > 0.0, s, jnp.float32(-1e9))   # masked_fill(==0)
            p = softmax(s).astype(mm_dtype)
            ctx_ref[:, sl] = jnp.dot(p, vh, preferred_element_type=jnp.float32)
        return jnp.dot(ctx_ref[...].astype(mm_dtype), wo[0],
                       preferred_element_type=jnp.float32) + bo[0]

    x = xc_ref[...]                                           # (T, D) f32
    # sublayer 0: self-attention (pre-norm, residual)
    h1 = layer_norm(x, ln1_a, ln1_b)
    x = x + mha(h1, h1, tmask_ref[0], wq1, bq1, wk1, bk1, wv1, bv1, wo1, bo1)
    # sublayer 1: source (cross) attention over `memory`
    h2 = layer_norm(x, ln2_a, ln2_b)
    mem = mem_ref[0].astype(jnp.float32)
    x = x + mha(h2, mem, smask_ref[0], wq2, bq2, wk2, bk2, wv2, bv2, wo2, bo2)
    # sublayer 2: position-wise feed-forward
    h3 = layer_norm(x, ln3_a, ln3_b)
    ff = jnp.maximum(proj(h3, wf1, bf1), 0.0)
    x = x + jnp.dot(ff.astype(mm_dtype), wf2[0],
                    preferred_element_type=jnp.float32) + bf2[0]
    xc_ref[...] = x                                           # carry to layer l+1

    @pl.when(l == num_layers - 1)
    def _finalize():
        o_ref[0] = layer_norm(x, lnf_a, lnf_b).astype(o_ref.dtype)


# ---------------------------------------------------------------------------
# Wrapper helpers
# ---------------------------------------------------------------------------
def _prep_mask(mask, tq, tk):
    """Return ((1 or B, tq, tk) f32 mask, batched flag). 1=attend, 0=masked."""
    if mask is None:
        return jnp.ones((1, tq, tk), jnp.float32), False
    m = jnp.asarray(mask, jnp.float32)
    if m.ndim < 3:
        m = m.reshape((1,) * (3 - m.ndim) + m.shape)
    assert m.ndim == 3, "masks of rank > 3 are not supported"
    if m.shape[0] == 1:
        return jnp.broadcast_to(m, (1, tq, tk)), False
    return jnp.broadcast_to(m, (m.shape[0], tq, tk)), True


def _prep_weights(params, param_dtype):
    """Cast matmul weights to the streaming dtype; keep LN params / biases f32."""
    out = []
    for name, w in zip(_WEIGHT_NAMES, params):
        dt = param_dtype if name in _MATMUL_WEIGHTS else jnp.float32
        out.append(w.astype(dt))
    return tuple(out)


def _nbytes(shape, dtype):
    return math.prod(shape) * jnp.dtype(dtype).itemsize


def _vmem_limit_bytes(block_bytes, scratch_bytes, temp_bytes):
    need = 2 * block_bytes + scratch_bytes + temp_bytes + (4 << 20)
    try:
        phys = int(pltpu.get_tpu_info().vmem_capacity_bytes)
    except Exception:                                   # pragma: no cover
        phys = 64 << 20                                 # conservative (v7x)
    return int(min(max(need, 32 << 20), int(phys * 0.9)))


@functools.partial(jax.jit,
                   static_argnames=("num_heads", "num_layers", "param_dtype"))
def decoder_forward(x, memory, src_mask, tgt_mask, params, *,
                    num_heads, num_layers, param_dtype=jnp.bfloat16):
    """x: (B, T, D), memory: (B, S, D); masks use 1=attend / 0=masked (or None)."""
    B, T, D = x.shape
    S = memory.shape[1]
    F = params[_WEIGHT_NAMES.index("wf1")].shape[-1]
    assert D % num_heads == 0

    smask, s_batched = _prep_mask(src_mask, T, S)
    tmask, t_batched = _prep_mask(tgt_mask, T, T)
    weights = _prep_weights(params, param_dtype)

    def batch_spec(shape):
        n = len(shape) - 1
        return pl.BlockSpec((1,) + tuple(shape[1:]),
                            lambda b, l, _n=n: (b,) + (0,) * _n)

    def const_spec(shape):
        n = len(shape)
        return pl.BlockSpec(tuple(shape), lambda b, l, _n=n: (0,) * _n)

    def layer_spec(shape):
        n = len(shape) - 1
        return pl.BlockSpec((1,) + tuple(shape[1:]),
                            lambda b, l, _n=n: (l,) + (0,) * _n)

    in_specs = [
        batch_spec(x.shape),
        batch_spec(memory.shape),
        batch_spec(smask.shape) if s_batched else const_spec(smask.shape),
        batch_spec(tmask.shape) if t_batched else const_spec(tmask.shape),
    ]
    for name, w in zip(_WEIGHT_NAMES, weights):
        in_specs.append(const_spec(w.shape) if name.startswith("lnf")
                        else layer_spec(w.shape))

    # --- VMEM budget from the actual block sizes ---------------------------
    per_layer_w_bytes = sum(_nbytes((1,) + w.shape[1:], w.dtype)
                            for name, w in zip(_WEIGHT_NAMES, weights)
                            if not name.startswith("lnf"))
    const_w_bytes = sum(_nbytes(w.shape, w.dtype)
                        for name, w in zip(_WEIGHT_NAMES, weights)
                        if name.startswith("lnf"))
    act_block_bytes = (_nbytes((1, T, D), x.dtype)
                       + _nbytes((1, S, D), memory.dtype)
                       + _nbytes((1, T, S), jnp.float32)
                       + _nbytes((1, T, T), jnp.float32)
                       + _nbytes((1, T, D), jnp.float32))        # output block
    block_bytes = per_layer_w_bytes + const_w_bytes + act_block_bytes
    scratch_bytes = 2 * _nbytes((T, D), jnp.float32)
    temp_bytes = 4 * (_nbytes((T, D), jnp.float32)
                      + 2 * _nbytes((S, D), jnp.float32)
                      + _nbytes((T, max(T, S)), jnp.float32)
                      + _nbytes((T, F), jnp.float32))
    vmem_limit = _vmem_limit_bytes(block_bytes, scratch_bytes, temp_bytes)

    # --- advisory cost estimate --------------------------------------------
    mm = lambda m, k, n: 2 * m * k * n
    per_layer_flops = (4 * mm(T, D, D) + 2 * mm(T, D, T)                 # self
                       + 2 * mm(T, D, D) + 2 * mm(S, D, D) + 2 * mm(T, D, S)
                       + mm(T, D, F) + mm(T, F, D))                      # FFN
    weight_stream_bytes = sum(w.size * w.dtype.itemsize for w in weights)
    cost = pl.CostEstimate(
        flops=int(B * num_layers * per_layer_flops),
        transcendentals=int(B * num_layers * (T * T + T * S)),
        bytes_accessed=int(x.size * x.dtype.itemsize
                           + memory.size * memory.dtype.itemsize
                           + 4 * (smask.size + tmask.size)
                           + B * weight_stream_bytes + B * T * D * 4))

    kernel = functools.partial(decoder_kernel,
                               num_heads=num_heads, num_layers=num_layers)
    return pl.pallas_call(
        kernel,
        out_shape=jax.ShapeDtypeStruct((B, T, D), jnp.float32),
        grid_spec=pltpu.PrefetchScalarGridSpec(
            num_scalar_prefetch=0,
            grid=(B, num_layers),
            in_specs=in_specs,
            out_specs=pl.BlockSpec((1, T, D), lambda b, l: (b, 0, 0)),
            scratch_shapes=[pltpu.VMEM((T, D), jnp.float32),    # layer carry
                            pltpu.VMEM((T, D), jnp.float32)],   # ctx slab
        ),
        compiler_params=pltpu.CompilerParams(
            dimension_semantics=("parallel", "arbitrary"),
            vmem_limit_bytes=vmem_limit),
        cost_estimate=cost,
    )(x, memory, smask, tmask, *weights)


# ---------------------------------------------------------------------------
# Deterministic synthetic parameters (PyTorch-shaped, stored in matmul form).
# ---------------------------------------------------------------------------
def make_params(key, d_model, d_ff, num_layers):
    keys = iter(jax.random.split(key, num_layers * 16 + 4))

    def ln_pair():
        a = 1.0 + 0.1 * jax.random.normal(next(keys), (1, d_model), jnp.float32)
        b = 0.1 * jax.random.normal(next(keys), (1, d_model), jnp.float32)
        return a, b

    def dense(fan_in, fan_out):
        kw, kb = jax.random.split(next(keys))
        bound = 1.0 / math.sqrt(fan_in)
        w = jax.random.uniform(kw, (fan_in, fan_out), jnp.float32, -bound, bound)
        b = jax.random.uniform(kb, (1, fan_out), jnp.float32, -bound, bound)
        return w, b

    acc = {name: [] for name in _WEIGHT_NAMES[:-2]}
    for _ in range(num_layers):
        a, b = ln_pair(); acc["ln1_a"].append(a); acc["ln1_b"].append(b)
        for p in ("q1", "k1", "v1", "o1"):
            w, bb = dense(d_model, d_model)
            acc["w" + p].append(w); acc["b" + p].append(bb)
        a, b = ln_pair(); acc["ln2_a"].append(a); acc["ln2_b"].append(b)
        for p in ("q2", "k2", "v2", "o2"):
            w, bb = dense(d_model, d_model)
            acc["w" + p].append(w); acc["b" + p].append(bb)
        a, b = ln_pair(); acc["ln3_a"].append(a); acc["ln3_b"].append(b)
        w, bb = dense(d_model, d_ff); acc["wf1"].append(w); acc["bf1"].append(bb)
        w, bb = dense(d_ff, d_model); acc["wf2"].append(w); acc["bf2"].append(bb)

    stacked = tuple(jnp.stack(acc[name], axis=0) for name in _WEIGHT_NAMES[:-2])
    lnf_a = 1.0 + 0.1 * jax.random.normal(next(keys), (1, 1, d_model), jnp.float32)
    lnf_b = 0.1 * jax.random.normal(next(keys), (1, 1, d_model), jnp.float32)
    return stacked + (lnf_a, lnf_b)


# ---------------------------------------------------------------------------
# Pure-JAX reference (mirrors the PyTorch forward exactly).
# ---------------------------------------------------------------------------
def _layer_norm_ref(v, a, b):
    d = v.shape[-1]
    mean = jnp.mean(v, axis=-1, keepdims=True)
    c = v - mean
    std = jnp.sqrt(jnp.sum(c * c, axis=-1, keepdims=True) / (d - 1))
    return a * c / (std + LN_EPS) + b


def _softmax_ref(s):
    s = s - jnp.max(s, axis=-1, keepdims=True)
    e = jnp.exp(s)
    return e / jnp.sum(e, axis=-1, keepdims=True)


def decoder_reference(x, memory, src_mask, tgt_mask, params, *,
                      num_heads, num_layers):
    (ln1_a, ln1_b, wq1, bq1, wk1, bk1, wv1, bv1, wo1, bo1,
     ln2_a, ln2_b, wq2, bq2, wk2, bk2, wv2, bv2, wo2, bo2,
     ln3_a, ln3_b, wf1, bf1, wf2, bf2, lnf_a, lnf_b) = params
    B, T, D = x.shape
    S = memory.shape[1]
    dk = D // num_heads
    sm, _ = _prep_mask(src_mask, T, S)
    tm, _ = _prep_mask(tgt_mask, T, T)
    smask = jnp.broadcast_to(sm, (B, T, S))
    tmask = jnp.broadcast_to(tm, (B, T, T))

    def mha(q_in, kv_in, mask, wq, bq, wk, bk, wv, bv, wo, bo):
        tq, tk = q_in.shape[1], kv_in.shape[1]
        q = (q_in @ wq + bq).reshape(B, tq, num_heads, dk).transpose(0, 2, 1, 3)
        k = (kv_in @ wk + bk).reshape(B, tk, num_heads, dk).transpose(0, 2, 1, 3)
        v = (kv_in @ wv + bv).reshape(B, tk, num_heads, dk).transpose(0, 2, 1, 3)
        s = jnp.einsum("bhqd,bhkd->bhqk", q, k) / math.sqrt(dk)
        s = jnp.where(mask[:, None, :, :] > 0.0, s, -1e9)
        p = _softmax_ref(s)
        o = jnp.einsum("bhqk,bhkd->bhqd", p, v)
        o = o.transpose(0, 2, 1, 3).reshape(B, tq, D)
        return o @ wo + bo

    h = x
    for l in range(num_layers):
        n1 = _layer_norm_ref(h, ln1_a[l], ln1_b[l])
        h = h + mha(n1, n1, tmask, wq1[l], bq1[l], wk1[l], bk1[l],
                    wv1[l], bv1[l], wo1[l], bo1[l])
        n2 = _layer_norm_ref(h, ln2_a[l], ln2_b[l])
        h = h + mha(n2, memory, smask, wq2[l], bq2[l], wk2[l], bk2[l],
                    wv2[l], bv2[l], wo2[l], bo2[l])
        n3 = _layer_norm_ref(h, ln3_a[l], ln3_b[l])
        h = h + jnp.maximum(n3 @ wf1[l] + bf1[l], 0.0) @ wf2[l] + bf2[l]
    return _layer_norm_ref(h, lnf_a[0], lnf_b[0])


if __name__ == "__main__":
    key = jax.random.PRNGKey(0)
    B, T, S = 2, 8, 16            # batch, target seq len, memory (source) seq len
    D, H, FF, NL = 32, 4, 64, 2   # d_model, heads, FFN hidden, decoder layers

    kx, km, kp = jax.random.split(key, 3)
    x = jax.random.normal(kx, (B, T, D), jnp.float32)
    memory = jax.random.normal(km, (B, S, D), jnp.float32)
    tgt_mask = jnp.tril(jnp.ones((T, T), jnp.float32))                  # causal (unbatched)
    src_mask = jnp.ones((B, T, S), jnp.float32).at[:, :, -3:].set(0.0)  # batched padding mask
    params = make_params(kp, D, FF, NL)

    with jax.default_matmul_precision("highest"):
        ref = jax.block_until_ready(
            decoder_reference(x, memory, src_mask, tgt_mask, params,
                              num_heads=H, num_layers=NL))

    # f32 weight streaming: tight check (tolerance covers the approx-EUP recips).
    out32 = jax.block_until_ready(
        decoder_forward(x, memory, src_mask, tgt_mask, params,
                        num_heads=H, num_layers=NL, param_dtype=jnp.float32))
    assert out32.shape == (B, T, D)
    err32 = float(jnp.max(jnp.abs(out32 - ref)))
    assert jnp.allclose(out32, ref, atol=2e-2, rtol=2e-2), err32

    # bf16 weight streaming (default performance path): looser tolerance.
    out16 = jax.block_until_ready(
        decoder_forward(x, memory, src_mask, tgt_mask, params,
                        num_heads=H, num_layers=NL, param_dtype=jnp.bfloat16))
    err16 = float(jnp.max(jnp.abs(out16 - ref)))
    assert jnp.allclose(out16, ref, atol=1e-1, rtol=1e-1), err16

    print("KERNEL_OK")
</pallas_src>

<mosaic_0001>
module attributes {stable_mosaic.version = 11 : i64} {
  func.func @decoder_kernel(%arg0: i32, %arg1: i32, %arg2: memref<1x8x32xf32, #tpu.memory_space<vmem>>, %arg3: memref<1x16x32xf32, #tpu.memory_space<vmem>>, %arg4: memref<1x8x16xf32, #tpu.memory_space<vmem>>, %arg5: memref<1x8x8xf32, #tpu.memory_space<vmem>>, %arg6: memref<1x1x32xf32, #tpu.memory_space<vmem>>, %arg7: memref<1x1x32xf32, #tpu.memory_space<vmem>>, %arg8: memref<1x32x32xf32, #tpu.memory_space<vmem>>, %arg9: memref<1x1x32xf32, #tpu.memory_space<vmem>>, %arg10: memref<1x32x32xf32, #tpu.memory_space<vmem>>, %arg11: memref<1x1x32xf32, #tpu.memory_space<vmem>>, %arg12: memref<1x32x32xf32, #tpu.memory_space<vmem>>, %arg13: memref<1x1x32xf32, #tpu.memory_space<vmem>>, %arg14: memref<1x32x32xf32, #tpu.memory_space<vmem>>, %arg15: memref<1x1x32xf32, #tpu.memory_space<vmem>>, %arg16: memref<1x1x32xf32, #tpu.memory_space<vmem>>, %arg17: memref<1x1x32xf32, #tpu.memory_space<vmem>>, %arg18: memref<1x32x32xf32, #tpu.memory_space<vmem>>, %arg19: memref<1x1x32xf32, #tpu.memory_space<vmem>>, %arg20: memref<1x32x32xf32, #tpu.memory_space<vmem>>, %arg21: memref<1x1x32xf32, #tpu.memory_space<vmem>>, %arg22: memref<1x32x32xf32, #tpu.memory_space<vmem>>, %arg23: memref<1x1x32xf32, #tpu.memory_space<vmem>>, %arg24: memref<1x32x32xf32, #tpu.memory_space<vmem>>, %arg25: memref<1x1x32xf32, #tpu.memory_space<vmem>>, %arg26: memref<1x1x32xf32, #tpu.memory_space<vmem>>, %arg27: memref<1x1x32xf32, #tpu.memory_space<vmem>>, %arg28: memref<1x32x64xf32, #tpu.memory_space<vmem>>, %arg29: memref<1x1x64xf32, #tpu.memory_space<vmem>>, %arg30: memref<1x64x32xf32, #tpu.memory_space<vmem>>, %arg31: memref<1x1x32xf32, #tpu.memory_space<vmem>>, %arg32: memref<1x1x32xf32, #tpu.memory_space<vmem>>, %arg33: memref<1x1x32xf32, #tpu.memory_space<vmem>>, %arg34: memref<1x8x32xf32, #tpu.memory_space<vmem>>, %arg35: memref<8x32xf32, #tpu.memory_space<vmem>>, %arg36: memref<8x32xf32, #tpu.memory_space<vmem>>) attributes {dimension_semantics = [#tpu.dimension_semantics<parallel>, #tpu.dimension_semantics<arbitrary>], iteration_bounds = array<i64: 2, 2>, scalar_prefetch = 0 : i64, scratch_operands = 2 : i64, tpu.core_type = #tpu.core_type<tc>, window_params = [{transform_indices = @transform_0, window_bounds = array<i64: 1, 8, 32>}, {transform_indices = @transform_1, window_bounds = array<i64: 1, 16, 32>}, {transform_indices = @transform_2, window_bounds = array<i64: 1, 8, 16>}, {pipeline_mode = #tpu.pipeline_mode<synchronous>, transform_indices = @transform_3, window_bounds = array<i64: 1, 8, 8>}, {transform_indices = @transform_4, window_bounds = array<i64: 1, 1, 32>}, {transform_indices = @transform_5, window_bounds = array<i64: 1, 1, 32>}, {transform_indices = @transform_6, window_bounds = array<i64: 1, 32, 32>}, {transform_indices = @transform_7, window_bounds = array<i64: 1, 1, 32>}, {transform_indices = @transform_8, window_bounds = array<i64: 1, 32, 32>}, {transform_indices = @transform_9, window_bounds = array<i64: 1, 1, 32>}, {transform_indices = @transform_10, window_bounds = array<i64: 1, 32, 32>}, {transform_indices = @transform_11, window_bounds = array<i64: 1, 1, 32>}, {transform_indices = @transform_12, window_bounds = array<i64: 1, 32, 32>}, {transform_indices = @transform_13, window_bounds = array<i64: 1, 1, 32>}, {transform_indices = @transform_14, window_bounds = array<i64: 1, 1, 32>}, {transform_indices = @transform_15, window_bounds = array<i64: 1, 1, 32>}, {transform_indices = @transform_16, window_bounds = array<i64: 1, 32, 32>}, {transform_indices = @transform_17, window_bounds = array<i64: 1, 1, 32>}, {transform_indices = @transform_18, window_bounds = array<i64: 1, 32, 32>}, {transform_indices = @transform_19, window_bounds = array<i64: 1, 1, 32>}, {transform_indices = @transform_20, window_bounds = array<i64: 1, 32, 32>}, {transform_indices = @transform_21, window_bounds = array<i64: 1, 1, 32>}, {transform_indices = @transform_22, window_bounds = array<i64: 1, 32, 32>}, {transform_indices = @transform_23, window_bounds = array<i64: 1, 1, 32>}, {transform_indices = @transform_24, window_bounds = array<i64: 1, 1, 32>}, {transform_indices = @transform_25, window_bounds = array<i64: 1, 1, 32>}, {transform_indices = @transform_26, window_bounds = array<i64: 1, 32, 64>}, {transform_indices = @transform_27, window_bounds = array<i64: 1, 1, 64>}, {transform_indices = @transform_28, window_bounds = array<i64: 1, 64, 32>}, {transform_indices = @transform_29, window_bounds = array<i64: 1, 1, 32>}, {pipeline_mode = #tpu.pipeline_mode<synchronous>, transform_indices = @transform_30, window_bounds = array<i64: 1, 1, 32>}, {pipeline_mode = #tpu.pipeline_mode<synchronous>, transform_indices = @transform_31, window_bounds = array<i64: 1, 1, 32>}, {transform_indices = @transform_32, window_bounds = array<i64: 1, 8, 32>}]} {
    %c0_i32 = arith.constant 0 : i32
    %0 = arith.cmpi eq, %arg1, %c0_i32 : i32
    %1 = arith.extui %0 : i1 to i32
    %c0_i32_0 = arith.constant 0 : i32
    %2 = arith.cmpi ne, %1, %c0_i32_0 : i32
    scf.if %2 {
      %c0_190 = arith.constant 0 : index
      %c0_191 = arith.constant 0 : index
      %c0_192 = arith.constant 0 : index
      %342 = vector.load %arg2[%c0_190, %c0_191, %c0_192] : memref<1x8x32xf32, #tpu.memory_space<vmem>>, vector<1x8x32xf32>
      %343 = vector.shape_cast %342 : vector<1x8x32xf32> to vector<8x32xf32>
      %c0_193 = arith.constant 0 : index
      %c0_194 = arith.constant 0 : index
      %344 = vector.load %arg35[%c0_193, %c0_194] : memref<8x32xf32, #tpu.memory_space<vmem>>, vector<8x32xf32>
      tpu.vector_store %arg35[%c0_193, %c0_194], %343 {strides = array<i32>} : memref<8x32xf32, #tpu.memory_space<vmem>>, vector<8x32xf32>,
    } else {
    }
    %c0 = arith.constant 0 : index
    %c0_1 = arith.constant 0 : index
    %3 = vector.load %arg35[%c0, %c0_1] : memref<8x32xf32, #tpu.memory_space<vmem>>, vector<8x32xf32>
    %cst = arith.constant dense<0.000000e+00> : vector<8xf32>
    %4 = vector.multi_reduction <add>, %3, %cst [1] : vector<8x32xf32> to vector<8xf32>
    %5 = vector.shape_cast %4 : vector<8xf32> to vector<8x1xf32>
    %cst_2 = arith.constant 3.200000e+01 : f32
    %6 = vector.broadcast %cst_2 : f32 to vector<8x1xf32>
    %7 = arith.divf %5, %6 : vector<8x1xf32>
    %8 = vector.broadcast %7 : vector<8x1xf32> to vector<8x32xf32>
    %9 = arith.subf %3, %8 : vector<8x32xf32>
    %10 = arith.mulf %9, %9 : vector<8x32xf32>
    %cst_3 = arith.constant dense<0.000000e+00> : vector<8xf32>
    %11 = vector.multi_reduction <add>, %10, %cst_3 [1] : vector<8x32xf32> to vector<8xf32>
    %12 = vector.shape_cast %11 : vector<8xf32> to vector<8x1xf32>
    %cst_4 = arith.constant 0.0322580636 : f32
    %13 = vector.broadcast %cst_4 : f32 to vector<8x1xf32>
    %14 = arith.mulf %12, %13 : vector<8x1xf32>
    %15 = math.sqrt %14 : vector<8x1xf32>
    %cst_5 = arith.constant 9.99999997E-7 : f32
    %16 = vector.broadcast %cst_5 : f32 to vector<8x1xf32>
    %17 = arith.addf %15, %16 : vector<8x1xf32>
    %18 = tpu.reciprocal %17 {approx = true} : vector<8x1xf32> -> vector<8x1xf32>
    %c0_6 = arith.constant 0 : index
    %c0_7 = arith.constant 0 : index
    %c0_8 = arith.constant 0 : index
    %19 = vector.load %arg6[%c0_6, %c0_7, %c0_8] : memref<1x1x32xf32, #tpu.memory_space<vmem>>, vector<1x1x32xf32>
    %20 = vector.shape_cast %19 : vector<1x1x32xf32> to vector<1x32xf32>
    %21 = vector.broadcast %20 : vector<1x32xf32> to vector<8x32xf32>
    %22 = arith.mulf %21, %9 : vector<8x32xf32>
    %23 = vector.broadcast %18 : vector<8x1xf32> to vector<8x32xf32>
    %24 = arith.mulf %22, %23 : vector<8x32xf32>
    %c0_9 = arith.constant 0 : index
    %c0_10 = arith.constant 0 : index
    %c0_11 = arith.constant 0 : index
    %25 = vector.load %arg7[%c0_9, %c0_10, %c0_11] : memref<1x1x32xf32, #tpu.memory_space<vmem>>, vector<1x1x32xf32>
    %26 = vector.shape_cast %25 : vector<1x1x32xf32> to vector<1x32xf32>
    %27 = vector.broadcast %26 : vector<1x32xf32> to vector<8x32xf32>
    %28 = arith.addf %24, %27 : vector<8x32xf32>
    %c0_12 = arith.constant 0 : index
    %c0_13 = arith.constant 0 : index
    %c0_14 = arith.constant 0 : index
    %29 = vector.load %arg5[%c0_12, %c0_13, %c0_14] : memref<1x8x8xf32, #tpu.memory_space<vmem>>, vector<1x8x8xf32>
    %30 = vector.shape_cast %29 : vector<1x8x8xf32> to vector<8x8xf32>
    %c0_15 = arith.constant 0 : index
    %c0_16 = arith.constant 0 : index
    %c0_17 = arith.constant 0 : index
    %31 = vector.load %arg8[%c0_15, %c0_16, %c0_17] : memref<1x32x32xf32, #tpu.memory_space<vmem>>, vector<1x32x32xf32>
    %32 = vector.shape_cast %31 : vector<1x32x32xf32> to vector<32x32xf32>
    %cst_18 = arith.constant dense<0.000000e+00> : vector<8x32xf32>
    %33 = tpu.matmul %28, %32, %cst_18 {dimension_numbers = #tpu.dot_dimension_numbers<[1], [0], [0], [1], [0, 0, 1, 1], [], []>} : vector<8x32xf32>, vector<32x32xf32>, vector<8x32xf32> -> vector<8x32xf32>
    %c0_19 = arith.constant 0 : index
    %c0_20 = arith.constant 0 : index
    %c0_21 = arith.constant 0 : index
    %34 = vector.load %arg9[%c0_19, %c0_20, %c0_21] : memref<1x1x32xf32, #tpu.memory_space<vmem>>, vector<1x1x32xf32>
    %35 = vector.shape_cast %34 : vector<1x1x32xf32> to vector<1x32xf32>
    %36 = vector.broadcast %35 : vector<1x32xf32> to vector<8x32xf32>
    %37 = arith.addf %33, %36 : vector<8x32xf32>
    %c0_22 = arith.constant 0 : index
    %c0_23 = arith.constant 0 : index
    %c0_24 = arith.constant 0 : index
    %38 = vector.load %arg10[%c0_22, %c0_23, %c0_24] : memref<1x32x32xf32, #tpu.memory_space<vmem>>, vector<1x32x32xf32>
    %39 = vector.shape_cast %38 : vector<1x32x32xf32> to vector<32x32xf32>
    %cst_25 = arith.constant dense<0.000000e+00> : vector<8x32xf32>
    %40 = tpu.matmul %28, %39, %cst_25 {dimension_numbers = #tpu.dot_dimension_numbers<[1], [0], [0], [1], [0, 0, 1, 1], [], []>} : vector<8x32xf32>, vector<32x32xf32>, vector<8x32xf32> -> vector<8x32xf32>
    %c0_26 = arith.constant 0 : index
    %c0_27 = arith.constant 0 : index
    %c0_28 = arith.constant 0 : index
    %41 = vector.load %arg11[%c0_26, %c0_27, %c0_28] : memref<1x1x32xf32, #tpu.memory_space<vmem>>, vector<1x1x32xf32>
    %42 = vector.shape_cast %41 : vector<1x1x32xf32> to vector<1x32xf32>
    %43 = vector.broadcast %42 : vector<1x32xf32> to vector<8x32xf32>
    %44 = arith.addf %40, %43 : vector<8x32xf32>
    %c0_29 = arith.constant 0 : index
    %c0_30 = arith.constant 0 : index
    %c0_31 = arith.constant 0 : index
    %45 = vector.load %arg12[%c0_29, %c0_30, %c0_31] : memref<1x32x32xf32, #tpu.memory_space<vmem>>, vector<1x32x32xf32>
    %46 = vector.shape_cast %45 : vector<1x32x32xf32> to vector<32x32xf32>
    %cst_32 = arith.constant dense<0.000000e+00> : vector<8x32xf32>
    %47 = tpu.matmul %28, %46, %cst_32 {dimension_numbers = #tpu.dot_dimension_numbers<[1], [0], [0], [1], [0, 0, 1, 1], [], []>} : vector<8x32xf32>, vector<32x32xf32>, vector<8x32xf32> -> vector<8x32xf32>
    %c0_33 = arith.constant 0 : index
    %c0_34 = arith.constant 0 : index
    %c0_35 = arith.constant 0 : index
    %48 = vector.load %arg13[%c0_33, %c0_34, %c0_35] : memref<1x1x32xf32, #tpu.memory_space<vmem>>, vector<1x1x32xf32>
    %49 = vector.shape_cast %48 : vector<1x1x32xf32> to vector<1x32xf32>
    %50 = vector.broadcast %49 : vector<1x32xf32> to vector<8x32xf32>
    %51 = arith.addf %47, %50 : vector<8x32xf32>
    %52 = vector.extract_strided_slice %37 {offsets = [0, 0], sizes = [8, 8], strides = [1, 1]} : vector<8x32xf32> to vector<8x8xf32>
    %53 = vector.extract_strided_slice %44 {offsets = [0, 0], sizes = [8, 8], strides = [1, 1]} : vector<8x32xf32> to vector<8x8xf32>
    %54 = vector.extract_strided_slice %51 {offsets = [0, 0], sizes = [8, 8], strides = [1, 1]} : vector<8x32xf32> to vector<8x8xf32>
    %cst_36 = arith.constant dense<0.000000e+00> : vector<8x8xf32>
    %55 = tpu.matmul %52, %53, %cst_36 {dimension_numbers = #tpu.dot_dimension_numbers<[1], [1], [0], [0], [0, 0, 1, 0], [], []>} : vector<8x8xf32>, vector<8x8xf32>, vector<8x8xf32> -> vector<8x8xf32>
    %cst_37 = arith.constant 0.353553385 : f32
    %56 = vector.broadcast %cst_37 : f32 to vector<8x8xf32>
    %57 = arith.mulf %55, %56 : vector<8x8xf32>
    %cst_38 = arith.constant 0.000000e+00 : f32
    %58 = vector.broadcast %cst_38 : f32 to vector<8x8xf32>
    %59 = arith.cmpf ogt, %30, %58 : vector<8x8xf32>
    %cst_39 = arith.constant -1.000000e+09 : f32
    %60 = vector.broadcast %cst_39 : f32 to vector<8x8xf32>
    %61 = arith.select %59, %57, %60 : vector<8x8xi1>, vector<8x8xf32>
    %cst_40 = arith.constant dense<0xFF800000> : vector<8xf32>
    %62 = vector.multi_reduction <maximumf>, %61, %cst_40 [1] : vector<8x8xf32> to vector<8xf32>
    %63 = vector.shape_cast %62 : vector<8xf32> to vector<8x1xf32>
    %64 = vector.broadcast %63 : vector<8x1xf32> to vector<8x8xf32>
    %65 = arith.subf %61, %64 : vector<8x8xf32>
    %66 = math.exp %65 : vector<8x8xf32>
    %cst_41 = arith.constant dense<0.000000e+00> : vector<8xf32>
    %67 = vector.multi_reduction <add>, %66, %cst_41 [1] : vector<8x8xf32> to vector<8xf32>
    %68 = vector.shape_cast %67 : vector<8xf32> to vector<8x1xf32>
    %69 = tpu.reciprocal %68 {approx = true} : vector<8x1xf32> -> vector<8x1xf32>
    %70 = vector.broadcast %69 : vector<8x1xf32> to vector<8x8xf32>
    %71 = arith.mulf %66, %70 : vector<8x8xf32>
    %cst_42 = arith.constant dense<0.000000e+00> : vector<8x8xf32>
    %72 = tpu.matmul %71, %54, %cst_42 {dimension_numbers = #tpu.dot_dimension_numbers<[1], [0], [0], [1], [0, 0, 1, 1], [], []>} : vector<8x8xf32>, vector<8x8xf32>, vector<8x8xf32> -> vector<8x8xf32>
    %c0_43 = arith.constant 0 : index
    %c0_44 = arith.constant 0 : index
    %73 = vector.load %arg36[%c0_43, %c0_44] : memref<8x32xf32, #tpu.memory_space<vmem>>, vector<8x8xf32>
    tpu.vector_store %arg36[%c0_43, %c0_44], %72 {strides = array<i32>} : memref<8x32xf32, #tpu.memory_space<vmem>>, vector<8x8xf32>,
    %74 = vector.extract_strided_slice %37 {offsets = [0, 8], sizes = [8, 8], strides = [1, 1]} : vector<8x32xf32> to vector<8x8xf32>
    %75 = vector.extract_strided_slice %44 {offsets = [0, 8], sizes = [8, 8], strides = [1, 1]} : vector<8x32xf32> to vector<8x8xf32>
    %76 = vector.extract_strided_slice %51 {offsets = [0, 8], sizes = [8, 8], strides = [1, 1]} : vector<8x32xf32> to vector<8x8xf32>
    %cst_45 = arith.constant dense<0.000000e+00> : vector<8x8xf32>
    %77 = tpu.matmul %74, %75, %cst_45 {dimension_numbers = #tpu.dot_dimension_numbers<[1], [1], [0], [0], [0, 0, 1, 0], [], []>} : vector<8x8xf32>, vector<8x8xf32>, vector<8x8xf32> -> vector<8x8xf32>
    %cst_46 = arith.constant 0.353553385 : f32
    %78 = vector.broadcast %cst_46 : f32 to vector<8x8xf32>
    %79 = arith.mulf %77, %78 : vector<8x8xf32>
    %cst_47 = arith.constant 0.000000e+00 : f32
    %80 = vector.broadcast %cst_47 : f32 to vector<8x8xf32>
    %81 = arith.cmpf ogt, %30, %80 : vector<8x8xf32>
    %cst_48 = arith.constant -1.000000e+09 : f32
    %82 = vector.broadcast %cst_48 : f32 to vector<8x8xf32>
    %83 = arith.select %81, %79, %82 : vector<8x8xi1>, vector<8x8xf32>
    %cst_49 = arith.constant dense<0xFF800000> : vector<8xf32>
    %84 = vector.multi_reduction <maximumf>, %83, %cst_49 [1] : vector<8x8xf32> to vector<8xf32>
    %85 = vector.shape_cast %84 : vector<8xf32> to vector<8x1xf32>
    %86 = vector.broadcast %85 : vector<8x1xf32> to vector<8x8xf32>
    %87 = arith.subf %83, %86 : vector<8x8xf32>
    %88 = math.exp %87 : vector<8x8xf32>
    %cst_50 = arith.constant dense<0.000000e+00> : vector<8xf32>
    %89 = vector.multi_reduction <add>, %88, %cst_50 [1] : vector<8x8xf32> to vector<8xf32>
    %90 = vector.shape_cast %89 : vector<8xf32> to vector<8x1xf32>
    %91 = tpu.reciprocal %90 {approx = true} : vector<8x1xf32> -> vector<8x1xf32>
    %92 = vector.broadcast %91 : vector<8x1xf32> to vector<8x8xf32>
    %93 = arith.mulf %88, %92 : vector<8x8xf32>
    %cst_51 = arith.constant dense<0.000000e+00> : vector<8x8xf32>
    %94 = tpu.matmul %93, %76, %cst_51 {dimension_numbers = #tpu.dot_dimension_numbers<[1], [0], [0], [1], [0, 0, 1, 1], [], []>} : vector<8x8xf32>, vector<8x8xf32>, vector<8x8xf32> -> vector<8x8xf32>
    %c0_52 = arith.constant 0 : index
    %c8 = arith.constant 8 : index
    %95 = vector.load %arg36[%c0_52, %c8] : memref<8x32xf32, #tpu.memory_space<vmem>>, vector<8x8xf32>
    tpu.vector_store %arg36[%c0_52, %c8], %94 {strides = array<i32>} : memref<8x32xf32, #tpu.memory_space<vmem>>, vector<8x8xf32>,
    %96 = vector.extract_strided_slice %37 {offsets = [0, 16], sizes = [8, 8], strides = [1, 1]} : vector<8x32xf32> to vector<8x8xf32>
    %97 = vector.extract_strided_slice %44 {offsets = [0, 16], sizes = [8, 8], strides = [1, 1]} : vector<8x32xf32> to vector<8x8xf32>
    %98 = vector.extract_strided_slice %51 {offsets = [0, 16], sizes = [8, 8], strides = [1, 1]} : vector<8x32xf32> to vector<8x8xf32>
    %cst_53 = arith.constant dense<0.000000e+00> : vector<8x8xf32>
    %99 = tpu.matmul %96, %97, %cst_53 {dimension_numbers = #tpu.dot_dimension_numbers<[1], [1], [0], [0], [0, 0, 1, 0], [], []>} : vector<8x8xf32>, vector<8x8xf32>, vector<8x8xf32> -> vector<8x8xf32>
    %cst_54 = arith.constant 0.353553385 : f32
    %100 = vector.broadcast %cst_54 : f32 to vector<8x8xf32>
    %101 = arith.mulf %99, %100 : vector<8x8xf32>
    %cst_55 = arith.constant 0.000000e+00 : f32
    %102 = vector.broadcast %cst_55 : f32 to vector<8x8xf32>
    %103 = arith.cmpf ogt, %30, %102 : vector<8x8xf32>
    %cst_56 = arith.constant -1.000000e+09 : f32
    %104 = vector.broadcast %cst_56 : f32 to vector<8x8xf32>
    %105 = arith.select %103, %101, %104 : vector<8x8xi1>, vector<8x8xf32>
    %cst_57 = arith.constant dense<0xFF800000> : vector<8xf32>
    %106 = vector.multi_reduction <maximumf>, %105, %cst_57 [1] : vector<8x8xf32> to vector<8xf32>
    %107 = vector.shape_cast %106 : vector<8xf32> to vector<8x1xf32>
    %108 = vector.broadcast %107 : vector<8x1xf32> to vector<8x8xf32>
    %109 = arith.subf %105, %108 : vector<8x8xf32>
    %110 = math.exp %109 : vector<8x8xf32>
    %cst_58 = arith.constant dense<0.000000e+00> : vector<8xf32>
    %111 = vector.multi_reduction <add>, %110, %cst_58 [1] : vector<8x8xf32> to vector<8xf32>
    %112 = vector.shape_cast %111 : vector<8xf32> to vector<8x1xf32>
    %113 = tpu.reciprocal %112 {approx = true} : vector<8x1xf32> -> vector<8x1xf32>
    %114 = vector.broadcast %113 : vector<8x1xf32> to vector<8x8xf32>
    %115 = arith.mulf %110, %114 : vector<8x8xf32>
    %cst_59 = arith.constant dense<0.000000e+00> : vector<8x8xf32>
    %116 = tpu.matmul %115, %98, %cst_59 {dimension_numbers = #tpu.dot_dimension_numbers<[1], [0], [0], [1], [0, 0, 1, 1], [], []>} : vector<8x8xf32>, vector<8x8xf32>, vector<8x8xf32> -> vector<8x8xf32>
    %c0_60 = arith.constant 0 : index
    %c16 = arith.constant 16 : index
    %117 = vector.load %arg36[%c0_60, %c16] : memref<8x32xf32, #tpu.memory_space<vmem>>, vector<8x8xf32>
    tpu.vector_store %arg36[%c0_60, %c16], %116 {strides = array<i32>} : memref<8x32xf32, #tpu.memory_space<vmem>>, vector<8x8xf32>,
    %118 = vector.extract_strided_slice %37 {offsets = [0, 24], sizes = [8, 8], strides = [1, 1]} : vector<8x32xf32> to vector<8x8xf32>
    %119 = vector.extract_strided_slice %44 {offsets = [0, 24], sizes = [8, 8], strides = [1, 1]} : vector<8x32xf32> to vector<8x8xf32>
    %120 = vector.extract_strided_slice %51 {offsets = [0, 24], sizes = [8, 8], strides = [1, 1]} : vector<8x32xf32> to vector<8x8xf32>
    %cst_61 = arith.constant dense<0.000000e+00> : vector<8x8xf32>
    %121 = tpu.matmul %118, %119, %cst_61 {dimension_numbers = #tpu.dot_dimension_numbers<[1], [1], [0], [0], [0, 0, 1, 0], [], []>} : vector<8x8xf32>, vector<8x8xf32>, vector<8x8xf32> -> vector<8x8xf32>
    %cst_62 = arith.constant 0.353553385 : f32
    %122 = vector.broadcast %cst_62 : f32 to vector<8x8xf32>
    %123 = arith.mulf %121, %122 : vector<8x8xf32>
    %cst_63 = arith.constant 0.000000e+00 : f32
    %124 = vector.broadcast %cst_63 : f32 to vector<8x8xf32>
    %125 = arith.cmpf ogt, %30, %124 : vector<8x8xf32>
    %cst_64 = arith.constant -1.000000e+09 : f32
    %126 = vector.broadcast %cst_64 : f32 to vector<8x8xf32>
    %127 = arith.select %125, %123, %126 : vector<8x8xi1>, vector<8x8xf32>
    %cst_65 = arith.constant dense<0xFF800000> : vector<8xf32>
    %128 = vector.multi_reduction <maximumf>, %127, %cst_65 [1] : vector<8x8xf32> to vector<8xf32>
    %129 = vector.shape_cast %128 : vector<8xf32> to vector<8x1xf32>
    %130 = vector.broadcast %129 : vector<8x1xf32> to vector<8x8xf32>
    %131 = arith.subf %127, %130 : vector<8x8xf32>
    %132 = math.exp %131 : vector<8x8xf32>
    %cst_66 = arith.constant dense<0.000000e+00> : vector<8xf32>
    %133 = vector.multi_reduction <add>, %132, %cst_66 [1] : vector<8x8xf32> to vector<8xf32>
    %134 = vector.shape_cast %133 : vector<8xf32> to vector<8x1xf32>
    %135 = tpu.reciprocal %134 {approx = true} : vector<8x1xf32> -> vector<8x1xf32>
    %136 = vector.broadcast %135 : vector<8x1xf32> to vector<8x8xf32>
    %137 = arith.mulf %132, %136 : vector<8x8xf32>
    %cst_67 = arith.constant dense<0.000000e+00> : vector<8x8xf32>
    %138 = tpu.matmul %137, %120, %cst_67 {dimension_numbers = #tpu.dot_dimension_numbers<[1], [0], [0], [1], [0, 0, 1, 1], [], []>} : vector<8x8xf32>, vector<8x8xf32>, vector<8x8xf32> -> vector<8x8xf32>
    %c0_68 = arith.constant 0 : index
    %c24 = arith.constant 24 : index
    %139 = vector.load %arg36[%c0_68, %c24] : memref<8x32xf32, #tpu.memory_space<vmem>>, vector<8x8xf32>
    tpu.vector_store %arg36[%c0_68, %c24], %138 {strides = array<i32>} : memref<8x32xf32, #tpu.memory_space<vmem>>, vector<8x8xf32>,
    %c0_69 = arith.constant 0 : index
    %c0_70 = arith.constant 0 : index
    %140 = vector.load %arg36[%c0_69, %c0_70] : memref<8x32xf32, #tpu.memory_space<vmem>>, vector<8x32xf32>
    %c0_71 = arith.constant 0 : index
    %c0_72 = arith.constant 0 : index
    %c0_73 = arith.constant 0 : index
    %141 = vector.load %arg14[%c0_71, %c0_72, %c0_73] : memref<1x32x32xf32, #tpu.memory_space<vmem>>, vector<1x32x32xf32>
    %142 = vector.shape_cast %141 : vector<1x32x32xf32> to vector<32x32xf32>
    %cst_74 = arith.constant dense<0.000000e+00> : vector<8x32xf32>
    %143 = tpu.matmul %140, %142, %cst_74 {dimension_numbers = #tpu.dot_dimension_numbers<[1], [0], [0], [1], [0, 0, 1, 1], [], []>} : vector<8x32xf32>, vector<32x32xf32>, vector<8x32xf32> -> vector<8x32xf32>
    %c0_75 = arith.constant 0 : index
    %c0_76 = arith.constant 0 : index
    %c0_77 = arith.constant 0 : index
    %144 = vector.load %arg15[%c0_75, %c0_76, %c0_77] : memref<1x1x32xf32, #tpu.memory_space<vmem>>, vector<1x1x32xf32>
    %145 = vector.shape_cast %144 : vector<1x1x32xf32> to vector<1x32xf32>
    %146 = vector.broadcast %145 : vector<1x32xf32> to vector<8x32xf32>
    %147 = arith.addf %143, %146 : vector<8x32xf32>
    %148 = arith.addf %3, %147 : vector<8x32xf32>
    %cst_78 = arith.constant dense<0.000000e+00> : vector<8xf32>
    %149 = vector.multi_reduction <add>, %148, %cst_78 [1] : vector<8x32xf32> to vector<8xf32>
    %150 = vector.shape_cast %149 : vector<8xf32> to vector<8x1xf32>
    %cst_79 = arith.constant 3.200000e+01 : f32
    %151 = vector.broadcast %cst_79 : f32 to vector<8x1xf32>
    %152 = arith.divf %150, %151 : vector<8x1xf32>
    %153 = vector.broadcast %152 : vector<8x1xf32> to vector<8x32xf32>
    %154 = arith.subf %148, %153 : vector<8x32xf32>
    %155 = arith.mulf %154, %154 : vector<8x32xf32>
    %cst_80 = arith.constant dense<0.000000e+00> : vector<8xf32>
    %156 = vector.multi_reduction <add>, %155, %cst_80 [1] : vector<8x32xf32> to vector<8xf32>
    %157 = vector.shape_cast %156 : vector<8xf32> to vector<8x1xf32>
    %cst_81 = arith.constant 0.0322580636 : f32
    %158 = vector.broadcast %cst_81 : f32 to vector<8x1xf32>
    %159 = arith.mulf %157, %158 : vector<8x1xf32>
    %160 = math.sqrt %159 : vector<8x1xf32>
    %cst_82 = arith.constant 9.99999997E-7 : f32
    %161 = vector.broadcast %cst_82 : f32 to vector<8x1xf32>
    %162 = arith.addf %160, %161 : vector<8x1xf32>
    %163 = tpu.reciprocal %162 {approx = true} : vector<8x1xf32> -> vector<8x1xf32>
    %c0_83 = arith.constant 0 : index
    %c0_84 = arith.constant 0 : index
    %c0_85 = arith.constant 0 : index
    %164 = vector.load %arg16[%c0_83, %c0_84, %c0_85] : memref<1x1x32xf32, #tpu.memory_space<vmem>>, vector<1x1x32xf32>
    %165 = vector.shape_cast %164 : vector<1x1x32xf32> to vector<1x32xf32>
    %166 = vector.broadcast %165 : vector<1x32xf32> to vector<8x32xf32>
    %167 = arith.mulf %166, %154 : vector<8x32xf32>
    %168 = vector.broadcast %163 : vector<8x1xf32> to vector<8x32xf32>
    %169 = arith.mulf %167, %168 : vector<8x32xf32>
    %c0_86 = arith.constant 0 : index
    %c0_87 = arith.constant 0 : index
    %c0_88 = arith.constant 0 : index
    %170 = vector.load %arg17[%c0_86, %c0_87, %c0_88] : memref<1x1x32xf32, #tpu.memory_space<vmem>>, vector<1x1x32xf32>
    %171 = vector.shape_cast %170 : vector<1x1x32xf32> to vector<1x32xf32>
    %172 = vector.broadcast %171 : vector<1x32xf32> to vector<8x32xf32>
    %173 = arith.addf %169, %172 : vector<8x32xf32>
    %c0_89 = arith.constant 0 : index
    %c0_90 = arith.constant 0 : index
    %c0_91 = arith.constant 0 : index
    %174 = vector.load %arg3[%c0_89, %c0_90, %c0_91] : memref<1x16x32xf32, #tpu.memory_space<vmem>>, vector<1x16x32xf32>
    %175 = vector.shape_cast %174 : vector<1x16x32xf32> to vector<16x32xf32>
    %c0_92 = arith.constant 0 : index
    %c0_93 = arith.constant 0 : index
    %c0_94 = arith.constant 0 : index
    %176 = vector.load %arg4[%c0_92, %c0_93, %c0_94] : memref<1x8x16xf32, #tpu.memory_space<vmem>>, vector<1x8x16xf32>
    %177 = vector.shape_cast %176 : vector<1x8x16xf32> to vector<8x16xf32>
    %c0_95 = arith.constant 0 : index
    %c0_96 = arith.constant 0 : index
    %c0_97 = arith.constant 0 : index
    %178 = vector.load %arg18[%c0_95, %c0_96, %c0_97] : memref<1x32x32xf32, #tpu.memory_space<vmem>>, vector<1x32x32xf32>
    %179 = vector.shape_cast %178 : vector<1x32x32xf32> to vector<32x32xf32>
    %cst_98 = arith.constant dense<0.000000e+00> : vector<8x32xf32>
    %180 = tpu.matmul %173, %179, %cst_98 {dimension_numbers = #tpu.dot_dimension_numbers<[1], [0], [0], [1], [0, 0, 1, 1], [], []>} : vector<8x32xf32>, vector<32x32xf32>, vector<8x32xf32> -> vector<8x32xf32>
    %c0_99 = arith.constant 0 : index
    %c0_100 = arith.constant 0 : index
    %c0_101 = arith.constant 0 : index
    %181 = vector.load %arg19[%c0_99, %c0_100, %c0_101] : memref<1x1x32xf32, #tpu.memory_space<vmem>>, vector<1x1x32xf32>
    %182 = vector.shape_cast %181 : vector<1x1x32xf32> to vector<1x32xf32>
    %183 = vector.broadcast %182 : vector<1x32xf32> to vector<8x32xf32>
    %184 = arith.addf %180, %183 : vector<8x32xf32>
    %c0_102 = arith.constant 0 : index
    %c0_103 = arith.constant 0 : index
    %c0_104 = arith.constant 0 : index
    %185 = vector.load %arg20[%c0_102, %c0_103, %c0_104] : memref<1x32x32xf32, #tpu.memory_space<vmem>>, vector<1x32x32xf32>
    %186 = vector.shape_cast %185 : vector<1x32x32xf32> to vector<32x32xf32>
    %cst_105 = arith.constant dense<0.000000e+00> : vector<16x32xf32>
    %187 = tpu.matmul %175, %186, %cst_105 {dimension_numbers = #tpu.dot_dimension_numbers<[1], [0], [0], [1], [0, 0, 1, 1], [], []>} : vector<16x32xf32>, vector<32x32xf32>, vector<16x32xf32> -> vector<16x32xf32>
    %c0_106 = arith.constant 0 : index
    %c0_107 = arith.constant 0 : index
    %c0_108 = arith.constant 0 : index
    %188 = vector.load %arg21[%c0_106, %c0_107, %c0_108] : memref<1x1x32xf32, #tpu.memory_space<vmem>>, vector<1x1x32xf32>
    %189 = vector.shape_cast %188 : vector<1x1x32xf32> to vector<1x32xf32>
    %190 = vector.broadcast %189 : vector<1x32xf32> to vector<16x32xf32>
    %191 = arith.addf %187, %190 : vector<16x32xf32>
    %c0_109 = arith.constant 0 : index
    %c0_110 = arith.constant 0 : index
    %c0_111 = arith.constant 0 : index
    %192 = vector.load %arg22[%c0_109, %c0_110, %c0_111] : memref<1x32x32xf32, #tpu.memory_space<vmem>>, vector<1x32x32xf32>
    %193 = vector.shape_cast %192 : vector<1x32x32xf32> to vector<32x32xf32>
    %cst_112 = arith.constant dense<0.000000e+00> : vector<16x32xf32>
    %194 = tpu.matmul %175, %193, %cst_112 {dimension_numbers = #tpu.dot_dimension_numbers<[1], [0], [0], [1], [0, 0, 1, 1], [], []>} : vector<16x32xf32>, vector<32x32xf32>, vector<16x32xf32> -> vector<16x32xf32>
    %c0_113 = arith.constant 0 : index
    %c0_114 = arith.constant 0 : index
    %c0_115 = arith.constant 0 : index
    %195 = vector.load %arg23[%c0_113, %c0_114, %c0_115] : memref<1x1x32xf32, #tpu.memory_space<vmem>>, vector<1x1x32xf32>
    %196 = vector.shape_cast %195 : vector<1x1x32xf32> to vector<1x32xf32>
    %197 = vector.broadcast %196 : vector<1x32xf32> to vector<16x32xf32>
    %198 = arith.addf %194, %197 : vector<16x32xf32>
    %199 = vector.extract_strided_slice %184 {offsets = [0, 0], sizes = [8, 8], strides = [1, 1]} : vector<8x32xf32> to vector<8x8xf32>
    %200 = vector.extract_strided_slice %191 {offsets = [0, 0], sizes = [16, 8], strides = [1, 1]} : vector<16x32xf32> to vector<16x8xf32>
    %201 = vector.extract_strided_slice %198 {offsets = [0, 0], sizes = [16, 8], strides = [1, 1]} : vector<16x32xf32> to vector<16x8xf32>
    %cst_116 = arith.constant dense<0.000000e+00> : vector<8x16xf32>
    %202 = tpu.matmul %199, %200, %cst_116 {dimension_numbers = #tpu.dot_dimension_numbers<[1], [1], [0], [0], [0, 0, 1, 0], [], []>} : vector<8x8xf32>, vector<16x8xf32>, vector<8x16xf32> -> vector<8x16xf32>
    %cst_117 = arith.constant 0.353553385 : f32
    %203 = vector.broadcast %cst_117 : f32 to vector<8x16xf32>
    %204 = arith.mulf %202, %203 : vector<8x16xf32>
    %cst_118 = arith.constant 0.000000e+00 : f32
    %205 = vector.broadcast %cst_118 : f32 to vector<8x16xf32>
    %206 = arith.cmpf ogt, %177, %205 : vector<8x16xf32>
    %cst_119 = arith.constant -1.000000e+09 : f32
    %207 = vector.broadcast %cst_119 : f32 to vector<8x16xf32>
    %208 = arith.select %206, %204, %207 : vector<8x16xi1>, vector<8x16xf32>
    %cst_120 = arith.constant dense<0xFF800000> : vector<8xf32>
    %209 = vector.multi_reduction <maximumf>, %208, %cst_120 [1] : vector<8x16xf32> to vector<8xf32>
    %210 = vector.shape_cast %209 : vector<8xf32> to vector<8x1xf32>
    %211 = vector.broadcast %210 : vector<8x1xf32> to vector<8x16xf32>
    %212 = arith.subf %208, %211 : vector<8x16xf32>
    %213 = math.exp %212 : vector<8x16xf32>
    %cst_121 = arith.constant dense<0.000000e+00> : vector<8xf32>
    %214 = vector.multi_reduction <add>, %213, %cst_121 [1] : vector<8x16xf32> to vector<8xf32>
    %215 = vector.shape_cast %214 : vector<8xf32> to vector<8x1xf32>
    %216 = tpu.reciprocal %215 {approx = true} : vector<8x1xf32> -> vector<8x1xf32>
    %217 = vector.broadcast %216 : vector<8x1xf32> to vector<8x16xf32>
    %218 = arith.mulf %213, %217 : vector<8x16xf32>
    %cst_122 = arith.constant dense<0.000000e+00> : vector<8x8xf32>
    %219 = tpu.matmul %218, %201, %cst_122 {dimension_numbers = #tpu.dot_dimension_numbers<[1], [0], [0], [1], [0, 0, 1, 1], [], []>} : vector<8x16xf32>, vector<16x8xf32>, vector<8x8xf32> -> vector<8x8xf32>
    %c0_123 = arith.constant 0 : index
    %c0_124 = arith.constant 0 : index
    %220 = vector.load %arg36[%c0_123, %c0_124] : memref<8x32xf32, #tpu.memory_space<vmem>>, vector<8x8xf32>
    tpu.vector_store %arg36[%c0_123, %c0_124], %219 {strides = array<i32>} : memref<8x32xf32, #tpu.memory_space<vmem>>, vector<8x8xf32>,
    %221 = vector.extract_strided_slice %184 {offsets = [0, 8], sizes = [8, 8], strides = [1, 1]} : vector<8x32xf32> to vector<8x8xf32>
    %222 = vector.extract_strided_slice %191 {offsets = [0, 8], sizes = [16, 8], strides = [1, 1]} : vector<16x32xf32> to vector<16x8xf32>
    %223 = vector.extract_strided_slice %198 {offsets = [0, 8], sizes = [16, 8], strides = [1, 1]} : vector<16x32xf32> to vector<16x8xf32>
    %cst_125 = arith.constant dense<0.000000e+00> : vector<8x16xf32>
    %224 = tpu.matmul %221, %222, %cst_125 {dimension_numbers = #tpu.dot_dimension_numbers<[1], [1], [0], [0], [0, 0, 1, 0], [], []>} : vector<8x8xf32>, vector<16x8xf32>, vector<8x16xf32> -> vector<8x16xf32>
    %cst_126 = arith.constant 0.353553385 : f32
    %225 = vector.broadcast %cst_126 : f32 to vector<8x16xf32>
    %226 = arith.mulf %224, %225 : vector<8x16xf32>
    %cst_127 = arith.constant 0.000000e+00 : f32
    %227 = vector.broadcast %cst_127 : f32 to vector<8x16xf32>
    %228 = arith.cmpf ogt, %177, %227 : vector<8x16xf32>
    %cst_128 = arith.constant -1.000000e+09 : f32
    %229 = vector.broadcast %cst_128 : f32 to vector<8x16xf32>
    %230 = arith.select %228, %226, %229 : vector<8x16xi1>, vector<8x16xf32>
    %cst_129 = arith.constant dense<0xFF800000> : vector<8xf32>
    %231 = vector.multi_reduction <maximumf>, %230, %cst_129 [1] : vector<8x16xf32> to vector<8xf32>
    %232 = vector.shape_cast %231 : vector<8xf32> to vector<8x1xf32>
    %233 = vector.broadcast %232 : vector<8x1xf32> to vector<8x16xf32>
    %234 = arith.subf %230, %233 : vector<8x16xf32>
    %235 = math.exp %234 : vector<8x16xf32>
    %cst_130 = arith.constant dense<0.000000e+00> : vector<8xf32>
    %236 = vector.multi_reduction <add>, %235, %cst_130 [1] : vector<8x16xf32> to vector<8xf32>
    %237 = vector.shape_cast %236 : vector<8xf32> to vector<8x1xf32>
    %238 = tpu.reciprocal %237 {approx = true} : vector<8x1xf32> -> vector<8x1xf32>
    %239 = vector.broadcast %238 : vector<8x1xf32> to vector<8x16xf32>
    %240 = arith.mulf %235, %239 : vector<8x16xf32>
    %cst_131 = arith.constant dense<0.000000e+00> : vector<8x8xf32>
    %241 = tpu.matmul %240, %223, %cst_131 {dimension_numbers = #tpu.dot_dimension_numbers<[1], [0], [0], [1], [0, 0, 1, 1], [], []>} : vector<8x16xf32>, vector<16x8xf32>, vector<8x8xf32> -> vector<8x8xf32>
    %c0_132 = arith.constant 0 : index
    %c8_133 = arith.constant 8 : index
    %242 = vector.load %arg36[%c0_132, %c8_133] : memref<8x32xf32, #tpu.memory_space<vmem>>, vector<8x8xf32>
    tpu.vector_store %arg36[%c0_132, %c8_133], %241 {strides = array<i32>} : memref<8x32xf32, #tpu.memory_space<vmem>>, vector<8x8xf32>,
    %243 = vector.extract_strided_slice %184 {offsets = [0, 16], sizes = [8, 8], strides = [1, 1]} : vector<8x32xf32> to vector<8x8xf32>
    %244 = vector.extract_strided_slice %191 {offsets = [0, 16], sizes = [16, 8], strides = [1, 1]} : vector<16x32xf32> to vector<16x8xf32>
    %245 = vector.extract_strided_slice %198 {offsets = [0, 16], sizes = [16, 8], strides = [1, 1]} : vector<16x32xf32> to vector<16x8xf32>
    %cst_134 = arith.constant dense<0.000000e+00> : vector<8x16xf32>
    %246 = tpu.matmul %243, %244, %cst_134 {dimension_numbers = #tpu.dot_dimension_numbers<[1], [1], [0], [0], [0, 0, 1, 0], [], []>} : vector<8x8xf32>, vector<16x8xf32>, vector<8x16xf32> -> vector<8x16xf32>
    %cst_135 = arith.constant 0.353553385 : f32
    %247 = vector.broadcast %cst_135 : f32 to vector<8x16xf32>
    %248 = arith.mulf %246, %247 : vector<8x16xf32>
    %cst_136 = arith.constant 0.000000e+00 : f32
    %249 = vector.broadcast %cst_136 : f32 to vector<8x16xf32>
    %250 = arith.cmpf ogt, %177, %249 : vector<8x16xf32>
    %cst_137 = arith.constant -1.000000e+09 : f32
    %251 = vector.broadcast %cst_137 : f32 to vector<8x16xf32>
    %252 = arith.select %250, %248, %251 : vector<8x16xi1>, vector<8x16xf32>
    %cst_138 = arith.constant dense<0xFF800000> : vector<8xf32>
    %253 = vector.multi_reduction <maximumf>, %252, %cst_138 [1] : vector<8x16xf32> to vector<8xf32>
    %254 = vector.shape_cast %253 : vector<8xf32> to vector<8x1xf32>
    %255 = vector.broadcast %254 : vector<8x1xf32> to vector<8x16xf32>
    %256 = arith.subf %252, %255 : vector<8x16xf32>
    %257 = math.exp %256 : vector<8x16xf32>
    %cst_139 = arith.constant dense<0.000000e+00> : vector<8xf32>
    %258 = vector.multi_reduction <add>, %257, %cst_139 [1] : vector<8x16xf32> to vector<8xf32>
    %259 = vector.shape_cast %258 : vector<8xf32> to vector<8x1xf32>
    %260 = tpu.reciprocal %259 {approx = true} : vector<8x1xf32> -> vector<8x1xf32>
    %261 = vector.broadcast %260 : vector<8x1xf32> to vector<8x16xf32>
    %262 = arith.mulf %257, %261 : vector<8x16xf32>
    %cst_140 = arith.constant dense<0.000000e+00> : vector<8x8xf32>
    %263 = tpu.matmul %262, %245, %cst_140 {dimension_numbers = #tpu.dot_dimension_numbers<[1], [0], [0], [1], [0, 0, 1, 1], [], []>} : vector<8x16xf32>, vector<16x8xf32>, vector<8x8xf32> -> vector<8x8xf32>
    %c0_141 = arith.constant 0 : index
    %c16_142 = arith.constant 16 : index
    %264 = vector.load %arg36[%c0_141, %c16_142] : memref<8x32xf32, #tpu.memory_space<vmem>>, vector<8x8xf32>
    tpu.vector_store %arg36[%c0_141, %c16_142], %263 {strides = array<i32>} : memref<8x32xf32, #tpu.memory_space<vmem>>, vector<8x8xf32>,
    %265 = vector.extract_strided_slice %184 {offsets = [0, 24], sizes = [8, 8], strides = [1, 1]} : vector<8x32xf32> to vector<8x8xf32>
    %266 = vector.extract_strided_slice %191 {offsets = [0, 24], sizes = [16, 8], strides = [1, 1]} : vector<16x32xf32> to vector<16x8xf32>
    %267 = vector.extract_strided_slice %198 {offsets = [0, 24], sizes = [16, 8], strides = [1, 1]} : vector<16x32xf32> to vector<16x8xf32>
    %cst_143 = arith.constant dense<0.000000e+00> : vector<8x16xf32>
    %268 = tpu.matmul %265, %266, %cst_143 {dimension_numbers = #tpu.dot_dimension_numbers<[1], [1], [0], [0], [0, 0, 1, 0], [], []>} : vector<8x8xf32>, vector<16x8xf32>, vector<8x16xf32> -> vector<8x16xf32>
    %cst_144 = arith.constant 0.353553385 : f32
    %269 = vector.broadcast %cst_144 : f32 to vector<8x16xf32>
    %270 = arith.mulf %268, %269 : vector<8x16xf32>
    %cst_145 = arith.constant 0.000000e+00 : f32
    %271 = vector.broadcast %cst_145 : f32 to vector<8x16xf32>
    %272 = arith.cmpf ogt, %177, %271 : vector<8x16xf32>
    %cst_146 = arith.constant -1.000000e+09 : f32
    %273 = vector.broadcast %cst_146 : f32 to vector<8x16xf32>
    %274 = arith.select %272, %270, %273 : vector<8x16xi1>, vector<8x16xf32>
    %cst_147 = arith.constant dense<0xFF800000> : vector<8xf32>
    %275 = vector.multi_reduction <maximumf>, %274, %cst_147 [1] : vector<8x16xf32> to vector<8xf32>
    %276 = vector.shape_cast %275 : vector<8xf32> to vector<8x1xf32>
    %277 = vector.broadcast %276 : vector<8x1xf32> to vector<8x16xf32>
    %278 = arith.subf %274, %277 : vector<8x16xf32>
    %279 = math.exp %278 : vector<8x16xf32>
    %cst_148 = arith.constant dense<0.000000e+00> : vector<8xf32>
    %280 = vector.multi_reduction <add>, %279, %cst_148 [1] : vector<8x16xf32> to vector<8xf32>
    %281 = vector.shape_cast %280 : vector<8xf32> to vector<8x1xf32>
    %282 = tpu.reciprocal %281 {approx = true} : vector<8x1xf32> -> vector<8x1xf32>
    %283 = vector.broadcast %282 : vector<8x1xf32> to vector<8x16xf32>
    %284 = arith.mulf %279, %283 : vector<8x16xf32>
    %cst_149 = arith.constant dense<0.000000e+00> : vector<8x8xf32>
    %285 = tpu.matmul %284, %267, %cst_149 {dimension_numbers = #tpu.dot_dimension_numbers<[1], [0], [0], [1], [0, 0, 1, 1], [], []>} : vector<8x16xf32>, vector<16x8xf32>, vector<8x8xf32> -> vector<8x8xf32>
    %c0_150 = arith.constant 0 : index
    %c24_151 = arith.constant 24 : index
    %286 = vector.load %arg36[%c0_150, %c24_151] : memref<8x32xf32, #tpu.memory_space<vmem>>, vector<8x8xf32>
    tpu.vector_store %arg36[%c0_150, %c24_151], %285 {strides = array<i32>} : memref<8x32xf32, #tpu.memory_space<vmem>>, vector<8x8xf32>,
    %c0_152 = arith.constant 0 : index
    %c0_153 = arith.constant 0 : index
    %287 = vector.load %arg36[%c0_152, %c0_153] : memref<8x32xf32, #tpu.memory_space<vmem>>, vector<8x32xf32>
    %c0_154 = arith.constant 0 : index
    %c0_155 = arith.constant 0 : index
    %c0_156 = arith.constant 0 : index
    %288 = vector.load %arg24[%c0_154, %c0_155, %c0_156] : memref<1x32x32xf32, #tpu.memory_space<vmem>>, vector<1x32x32xf32>
    %289 = vector.shape_cast %288 : vector<1x32x32xf32> to vector<32x32xf32>
    %cst_157 = arith.constant dense<0.000000e+00> : vector<8x32xf32>
    %290 = tpu.matmul %287, %289, %cst_157 {dimension_numbers = #tpu.dot_dimension_numbers<[1], [0], [0], [1], [0, 0, 1, 1], [], []>} : vector<8x32xf32>, vector<32x32xf32>, vector<8x32xf32> -> vector<8x32xf32>
    %c0_158 = arith.constant 0 : index
    %c0_159 = arith.constant 0 : index
    %c0_160 = arith.constant 0 : index
    %291 = vector.load %arg25[%c0_158, %c0_159, %c0_160] : memref<1x1x32xf32, #tpu.memory_space<vmem>>, vector<1x1x32xf32>
    %292 = vector.shape_cast %291 : vector<1x1x32xf32> to vector<1x32xf32>
    %293 = vector.broadcast %292 : vector<1x32xf32> to vector<8x32xf32>
    %294 = arith.addf %290, %293 : vector<8x32xf32>
    %295 = arith.addf %148, %294 : vector<8x32xf32>
    %cst_161 = arith.constant dense<0.000000e+00> : vector<8xf32>
    %296 = vector.multi_reduction <add>, %295, %cst_161 [1] : vector<8x32xf32> to vector<8xf32>
    %297 = vector.shape_cast %296 : vector<8xf32> to vector<8x1xf32>
    %cst_162 = arith.constant 3.200000e+01 : f32
    %298 = vector.broadcast %cst_162 : f32 to vector<8x1xf32>
    %299 = arith.divf %297, %298 : vector<8x1xf32>
    %300 = vector.broadcast %299 : vector<8x1xf32> to vector<8x32xf32>
    %301 = arith.subf %295, %300 : vector<8x32xf32>
    %302 = arith.mulf %301, %301 : vector<8x32xf32>
    %cst_163 = arith.constant dense<0.000000e+00> : vector<8xf32>
    %303 = vector.multi_reduction <add>, %302, %cst_163 [1] : vector<8x32xf32> to vector<8xf32>
    %304 = vector.shape_cast %303 : vector<8xf32> to vector<8x1xf32>
    %cst_164 = arith.constant 0.0322580636 : f32
    %305 = vector.broadcast %cst_164 : f32 to vector<8x1xf32>
    %306 = arith.mulf %304, %305 : vector<8x1xf32>
    %307 = math.sqrt %306 : vector<8x1xf32>
    %cst_165 = arith.constant 9.99999997E-7 : f32
    %308 = vector.broadcast %cst_165 : f32 to vector<8x1xf32>
    %309 = arith.addf %307, %308 : vector<8x1xf32>
    %310 = tpu.reciprocal %309 {approx = true} : vector<8x1xf32> -> vector<8x1xf32>
    %c0_166 = arith.constant 0 : index
    %c0_167 = arith.constant 0 : index
    %c0_168 = arith.constant 0 : index
    %311 = vector.load %arg26[%c0_166, %c0_167, %c0_168] : memref<1x1x32xf32, #tpu.memory_space<vmem>>, vector<1x1x32xf32>
    %312 = vector.shape_cast %311 : vector<1x1x32xf32> to vector<1x32xf32>
    %313 = vector.broadcast %312 : vector<1x32xf32> to vector<8x32xf32>
    %314 = arith.mulf %313, %301 : vector<8x32xf32>
    %315 = vector.broadcast %310 : vector<8x1xf32> to vector<8x32xf32>
    %316 = arith.mulf %314, %315 : vector<8x32xf32>
    %c0_169 = arith.constant 0 : index
    %c0_170 = arith.constant 0 : index
    %c0_171 = arith.constant 0 : index
    %317 = vector.load %arg27[%c0_169, %c0_170, %c0_171] : memref<1x1x32xf32, #tpu.memory_space<vmem>>, vector<1x1x32xf32>
    %318 = vector.shape_cast %317 : vector<1x1x32xf32> to vector<1x32xf32>
    %319 = vector.broadcast %318 : vector<1x32xf32> to vector<8x32xf32>
    %320 = arith.addf %316, %319 : vector<8x32xf32>
    %c0_172 = arith.constant 0 : index
    %c0_173 = arith.constant 0 : index
    %c0_174 = arith.constant 0 : index
    %321 = vector.load %arg28[%c0_172, %c0_173, %c0_174] : memref<1x32x64xf32, #tpu.memory_space<vmem>>, vector<1x32x64xf32>
    %322 = vector.shape_cast %321 : vector<1x32x64xf32> to vector<32x64xf32>
    %cst_175 = arith.constant dense<0.000000e+00> : vector<8x64xf32>
    %323 = tpu.matmul %320, %322, %cst_175 {dimension_numbers = #tpu.dot_dimension_numbers<[1], [0], [0], [1], [0, 0, 1, 1], [], []>} : vector<8x32xf32>, vector<32x64xf32>, vector<8x64xf32> -> vector<8x64xf32>
    %c0_176 = arith.constant 0 : index
    %c0_177 = arith.constant 0 : index
    %c0_178 = arith.constant 0 : index
    %324 = vector.load %arg29[%c0_176, %c0_177, %c0_178] : memref<1x1x64xf32, #tpu.memory_space<vmem>>, vector<1x1x64xf32>
    %325 = vector.shape_cast %324 : vector<1x1x64xf32> to vector<1x64xf32>
    %326 = vector.broadcast %325 : vector<1x64xf32> to vector<8x64xf32>
    %327 = arith.addf %323, %326 : vector<8x64xf32>
    %cst_179 = arith.constant 0.000000e+00 : f32
    %328 = vector.broadcast %cst_179 : f32 to vector<8x64xf32>
    %329 = arith.maximumf %327, %328 : vector<8x64xf32>
    %c0_180 = arith.constant 0 : index
    %c0_181 = arith.constant 0 : index
    %c0_182 = arith.constant 0 : index
    %330 = vector.load %arg30[%c0_180, %c0_181, %c0_182] : memref<1x64x32xf32, #tpu.memory_space<vmem>>, vector<1x64x32xf32>
    %331 = vector.shape_cast %330 : vector<1x64x32xf32> to vector<64x32xf32>
    %cst_183 = arith.constant dense<0.000000e+00> : vector<8x32xf32>
    %332 = tpu.matmul %329, %331, %cst_183 {dimension_numbers = #tpu.dot_dimension_numbers<[1], [0], [0], [1], [0, 0, 1, 1], [], []>} : vector<8x64xf32>, vector<64x32xf32>, vector<8x32xf32> -> vector<8x32xf32>
    %333 = arith.addf %295, %332 : vector<8x32xf32>
    %c0_184 = arith.constant 0 : index
    %c0_185 = arith.constant 0 : index
    %c0_186 = arith.constant 0 : index
    %334 = vector.load %arg31[%c0_184, %c0_185, %c0_186] : memref<1x1x32xf32, #tpu.memory_space<vmem>>, vector<1x1x32xf32>
    %335 = vector.shape_cast %334 : vector<1x1x32xf32> to vector<1x32xf32>
    %336 = vector.broadcast %335 : vector<1x32xf32> to vector<8x32xf32>
    %337 = arith.addf %333, %336 : vector<8x32xf32>
    %c0_187 = arith.constant 0 : index
    %c0_188 = arith.constant 0 : index
    %338 = vector.load %arg35[%c0_187, %c0_188] : memref<8x32xf32, #tpu.memory_space<vmem>>, vector<8x32xf32>
    tpu.vector_store %arg35[%c0_187, %c0_188], %337 {strides = array<i32>} : memref<8x32xf32, #tpu.memory_space<vmem>>, vector<8x32xf32>,
    %c1_i32 = arith.constant 1 : i32
    %339 = arith.cmpi eq, %arg1, %c1_i32 : i32
    %340 = arith.extui %339 : i1 to i32
    %c0_i32_189 = arith.constant 0 : i32
    %341 = arith.cmpi ne, %340, %c0_i32_189 : i32
    scf.if %341 {
      %cst_190 = arith.constant dense<0.000000e+00> : vector<8xf32>
      %342 = vector.multi_reduction <add>, %337, %cst_190 [1] : vector<8x32xf32> to vector<8xf32>
      %343 = vector.shape_cast %342 : vector<8xf32> to vector<8x1xf32>
      %cst_191 = arith.constant 3.200000e+01 : f32
      %344 = vector.broadcast %cst_191 : f32 to vector<8x1xf32>
      %345 = arith.divf %343, %344 : vector<8x1xf32>
      %346 = vector.broadcast %345 : vector<8x1xf32> to vector<8x32xf32>
      %347 = arith.subf %337, %346 : vector<8x32xf32>
      %348 = arith.mulf %347, %347 : vector<8x32xf32>
      %cst_192 = arith.constant dense<0.000000e+00> : vector<8xf32>
      %349 = vector.multi_reduction <add>, %348, %cst_192 [1] : vector<8x32xf32> to vector<8xf32>
      %350 = vector.shape_cast %349 : vector<8xf32> to vector<8x1xf32>
      %cst_193 = arith.constant 0.0322580636 : f32
      %351 = vector.broadcast %cst_193 : f32 to vector<8x1xf32>
      %352 = arith.mulf %350, %351 : vector<8x1xf32>
      %353 = math.sqrt %352 : vector<8x1xf32>
      %cst_194 = arith.constant 9.99999997E-7 : f32
      %354 = vector.broadcast %cst_194 : f32 to vector<8x1xf32>
      %355 = arith.addf %353, %354 : vector<8x1xf32>
      %356 = tpu.reciprocal %355 {approx = true} : vector<8x1xf32> -> vector<8x1xf32>
      %c0_195 = arith.constant 0 : index
      %c0_196 = arith.constant 0 : index
      %c0_197 = arith.constant 0 : index
      %357 = vector.load %arg32[%c0_195, %c0_196, %c0_197] : memref<1x1x32xf32, #tpu.memory_space<vmem>>, vector<1x1x32xf32>
      %358 = vector.shape_cast %357 : vector<1x1x32xf32> to vector<1x32xf32>
      %359 = vector.broadcast %358 : vector<1x32xf32> to vector<8x32xf32>
      %360 = arith.mulf %359, %347 : vector<8x32xf32>
      %361 = vector.broadcast %356 : vector<8x1xf32> to vector<8x32xf32>
      %362 = arith.mulf %360, %361 : vector<8x32xf32>
      %c0_198 = arith.constant 0 : index
      %c0_199 = arith.constant 0 : index
      %c0_200 = arith.constant 0 : index
      %363 = vector.load %arg33[%c0_198, %c0_199, %c0_200] : memref<1x1x32xf32, #tpu.memory_space<vmem>>, vector<1x1x32xf32>
      %364 = vector.shape_cast %363 : vector<1x1x32xf32> to vector<1x32xf32>
      %365 = vector.broadcast %364 : vector<1x32xf32> to vector<8x32xf32>
      %366 = arith.addf %362, %365 : vector<8x32xf32>
      %c0_201 = arith.constant 0 : index
      %c0_202 = arith.constant 0 : index
      %c0_203 = arith.constant 0 : index
      %367 = vector.load %arg34[%c0_201, %c0_202, %c0_203] : memref<1x8x32xf32, #tpu.memory_space<vmem>>, vector<1x8x32xf32>
      %368 = vector.shape_cast %367 : vector<1x8x32xf32> to vector<8x32xf32>
      %369 = vector.shape_cast %366 : vector<8x32xf32> to vector<1x8x32xf32>
      tpu.vector_store %arg34[%c0_201, %c0_202, %c0_203], %369 {strides = array<i32>} : memref<1x8x32xf32, #tpu.memory_space<vmem>>, vector<1x8x32xf32>,
    } else {
    }
    return
  }
  func.func @transform_0(%arg0: i32, %arg1: i32) -> (i32, i32, i32) {
    %c0_i32 = arith.constant 0 : i32
    %c0_i32_0 = arith.constant 0 : i32
    %c0_i32_1 = arith.constant 0 : i32
    return %arg0, %c0_i32, %c0_i32_0 : i32, i32, i32
  }
  func.func @transform_1(%arg0: i32, %arg1: i32) -> (i32, i32, i32) {
    %c0_i32 = arith.constant 0 : i32
    %c0_i32_0 = arith.constant 0 : i32
    %c0_i32_1 = arith.constant 0 : i32
    return %arg0, %c0_i32, %c0_i32_0 : i32, i32, i32
  }
  func.func @transform_2(%arg0: i32, %arg1: i32) -> (i32, i32, i32) {
    %c0_i32 = arith.constant 0 : i32
    %c0_i32_0 = arith.constant 0 : i32
    %c0_i32_1 = arith.constant 0 : i32
    return %arg0, %c0_i32, %c0_i32_0 : i32, i32, i32
  }
  func.func @transform_3(%arg0: i32, %arg1: i32) -> (i32, i32, i32) {
    %c0_i32 = arith.constant 0 : i32
    %c0_i32_0 = arith.constant 0 : i32
    %c0_i32_1 = arith.constant 0 : i32
    %c0_i32_2 = arith.constant 0 : i32
    return %c0_i32, %c0_i32_0, %c0_i32_1 : i32, i32, i32
  }
  func.func @transform_4(%arg0: i32, %arg1: i32) -> (i32, i32, i32) {
    %c0_i32 = arith.constant 0 : i32
    %c0_i32_0 = arith.constant 0 : i32
    %c0_i32_1 = arith.constant 0 : i32
    return %arg1, %c0_i32, %c0_i32_0 : i32, i32, i32
  }
  func.func @transform_5(%arg0: i32, %arg1: i32) -> (i32, i32, i32) {
    %c0_i32 = arith.constant 0 : i32
    %c0_i32_0 = arith.constant 0 : i32
    %c0_i32_1 = arith.constant 0 : i32
    return %arg1, %c0_i32, %c0_i32_0 : i32, i32, i32
  }
  func.func @transform_6(%arg0: i32, %arg1: i32) -> (i32, i32, i32) {
    %c0_i32 = arith.constant 0 : i32
    %c0_i32_0 = arith.constant 0 : i32
    %c0_i32_1 = arith.constant 0 : i32
    return %arg1, %c0_i32, %c0_i32_0 : i32, i32, i32
  }
  func.func @transform_7(%arg0: i32, %arg1: i32) -> (i32, i32, i32) {
    %c0_i32 = arith.constant 0 : i32
    %c0_i32_0 = arith.constant 0 : i32
    %c0_i32_1 = arith.constant 0 : i32
    return %arg1, %c0_i32, %c0_i32_0 : i32, i32, i32
  }
  func.func @transform_8(%arg0: i32, %arg1: i32) -> (i32, i32, i32) {
    %c0_i32 = arith.constant 0 : i32
    %c0_i32_0 = arith.constant 0 : i32
    %c0_i32_1 = arith.constant 0 : i32
    return %arg1, %c0_i32, %c0_i32_0 : i32, i32, i32
  }
  func.func @transform_9(%arg0: i32, %arg1: i32) -> (i32, i32, i32) {
    %c0_i32 = arith.constant 0 : i32
    %c0_i32_0 = arith.constant 0 : i32
    %c0_i32_1 = arith.constant 0 : i32
    return %arg1, %c0_i32, %c0_i32_0 : i32, i32, i32
  }
  func.func @transform_10(%arg0: i32, %arg1: i32) -> (i32, i32, i32) {
    %c0_i32 = arith.constant 0 : i32
    %c0_i32_0 = arith.constant 0 : i32
    %c0_i32_1 = arith.constant 0 : i32
    return %arg1, %c0_i32, %c0_i32_0 : i32, i32, i32
  }
  func.func @transform_11(%arg0: i32, %arg1: i32) -> (i32, i32, i32) {
    %c0_i32 = arith.constant 0 : i32
    %c0_i32_0 = arith.constant 0 : i32
    %c0_i32_1 = arith.constant 0 : i32
    return %arg1, %c0_i32, %c0_i32_0 : i32, i32, i32
  }
  func.func @transform_12(%arg0: i32, %arg1: i32) -> (i32, i32, i32) {
    %c0_i32 = arith.constant 0 : i32
    %c0_i32_0 = arith.constant 0 : i32
    %c0_i32_1 = arith.constant 0 : i32
    return %arg1, %c0_i32, %c0_i32_0 : i32, i32, i32
  }
  func.func @transform_13(%arg0: i32, %arg1: i32) -> (i32, i32, i32) {
    %c0_i32 = arith.constant 0 : i32
    %c0_i32_0 = arith.constant 0 : i32
    %c0_i32_1 = arith.constant 0 : i32
    return %arg1, %c0_i32, %c0_i32_0 : i32, i32, i32
  }
  func.func @transform_14(%arg0: i32, %arg1: i32) -> (i32, i32, i32) {
    %c0_i32 = arith.constant 0 : i32
    %c0_i32_0 = arith.constant 0 : i32
    %c0_i32_1 = arith.constant 0 : i32
    return %arg1, %c0_i32, %c0_i32_0 : i32, i32, i32
  }
  func.func @transform_15(%arg0: i32, %arg1: i32) -> (i32, i32, i32) {
    %c0_i32 = arith.constant 0 : i32
    %c0_i32_0 = arith.constant 0 : i32
    %c0_i32_1 = arith.constant 0 : i32
    return %arg1, %c0_i32, %c0_i32_0 : i32, i32, i32
  }
  func.func @transform_16(%arg0: i32, %arg1: i32) -> (i32, i32, i32) {
    %c0_i32 = arith.constant 0 : i32
    %c0_i32_0 = arith.constant 0 : i32
    %c0_i32_1 = arith.constant 0 : i32
    return %arg1, %c0_i32, %c0_i32_0 : i32, i32, i32
  }
  func.func @transform_17(%arg0: i32, %arg1: i32) -> (i32, i32, i32) {
    %c0_i32 = arith.constant 0 : i32
    %c0_i32_0 = arith.constant 0 : i32
    %c0_i32_1 = arith.constant 0 : i32
    return %arg1, %c0_i32, %c0_i32_0 : i32, i32, i32
  }
  func.func @transform_18(%arg0: i32, %arg1: i32) -> (i32, i32, i32) {
    %c0_i32 = arith.constant 0 : i32
    %c0_i32_0 = arith.constant 0 : i32
    %c0_i32_1 = arith.constant 0 : i32
    return %arg1, %c0_i32, %c0_i32_0 : i32, i32, i32
  }
  func.func @transform_19(%arg0: i32, %arg1: i32) -> (i32, i32, i32) {
    %c0_i32 = arith.constant 0 : i32
    %c0_i32_0 = arith.constant 0 : i32
    %c0_i32_1 = arith.constant 0 : i32
    return %arg1, %c0_i32, %c0_i32_0 : i32, i32, i32
  }
  func.func @transform_20(%arg0: i32, %arg1: i32) -> (i32, i32, i32) {
    %c0_i32 = arith.constant 0 : i32
    %c0_i32_0 = arith.constant 0 : i32
    %c0_i32_1 = arith.constant 0 : i32
    return %arg1, %c0_i32, %c0_i32_0 : i32, i32, i32
  }
  func.func @transform_21(%arg0: i32, %arg1: i32) -> (i32, i32, i32) {
    %c0_i32 = arith.constant 0 : i32
    %c0_i32_0 = arith.constant 0 : i32
    %c0_i32_1 = arith.constant 0 : i32
    return %arg1, %c0_i32, %c0_i32_0 : i32, i32, i32
  }
  func.func @transform_22(%arg0: i32, %arg1: i32) -> (i32, i32, i32) {
    %c0_i32 = arith.constant 0 : i32
    %c0_i32_0 = arith.constant 0 : i32
    %c0_i32_1 = arith.constant 0 : i32
    return %arg1, %c0_i32, %c0_i32_0 : i32, i32, i32
  }
  func.func @transform_23(%arg0: i32, %arg1: i32) -> (i32, i32, i32) {
    %c0_i32 = arith.constant 0 : i32
    %c0_i32_0 = arith.constant 0 : i32
    %c0_i32_1 = arith.constant 0 : i32
    return %arg1, %c0_i32, %c0_i32_0 : i32, i32, i32
  }
  func.func @transform_24(%arg0: i32, %arg1: i32) -> (i32, i32, i32) {
    %c0_i32 = arith.constant 0 : i32
    %c0_i32_0 = arith.constant 0 : i32
    %c0_i32_1 = arith.constant 0 : i32
    return %arg1, %c0_i32, %c0_i32_0 : i32, i32, i32
  }
  func.func @transform_25(%arg0: i32, %arg1: i32) -> (i32, i32, i32) {
    %c0_i32 = arith.constant 0 : i32
    %c0_i32_0 = arith.constant 0 : i32
    %c0_i32_1 = arith.constant 0 : i32
    return %arg1, %c0_i32, %c0_i32_0 : i32, i32, i32
  }
  func.func @transform_26(%arg0: i32, %arg1: i32) -> (i32, i32, i32) {
    %c0_i32 = arith.constant 0 : i32
    %c0_i32_0 = arith.constant 0 : i32
    %c0_i32_1 = arith.constant 0 : i32
    return %arg1, %c0_i32, %c0_i32_0 : i32, i32, i32
  }
  func.func @transform_27(%arg0: i32, %arg1: i32) -> (i32, i32, i32) {
    %c0_i32 = arith.constant 0 : i32
    %c0_i32_0 = arith.constant 0 : i32
    %c0_i32_1 = arith.constant 0 : i32
    return %arg1, %c0_i32, %c0_i32_0 : i32, i32, i32
  }
  func.func @transform_28(%arg0: i32, %arg1: i32) -> (i32, i32, i32) {
    %c0_i32 = arith.constant 0 : i32
    %c0_i32_0 = arith.constant 0 : i32
    %c0_i32_1 = arith.constant 0 : i32
    return %arg1, %c0_i32, %c0_i32_0 : i32, i32, i32
  }
  func.func @transform_29(%arg0: i32, %arg1: i32) -> (i32, i32, i32) {
    %c0_i32 = arith.constant 0 : i32
    %c0_i32_0 = arith.constant 0 : i32
    %c0_i32_1 = arith.constant 0 : i32
    return %arg1, %c0_i32, %c0_i32_0 : i32, i32, i32
  }
  func.func @transform_30(%arg0: i32, %arg1: i32) -> (i32, i32, i32) {
    %c0_i32 = arith.constant 0 : i32
    %c0_i32_0 = arith.constant 0 : i32
    %c0_i32_1 = arith.constant 0 : i32
    %c0_i32_2 = arith.constant 0 : i32
    return %c0_i32, %c0_i32_0, %c0_i32_1 : i32, i32, i32
  }
  func.func @transform_31(%arg0: i32, %arg1: i32) -> (i32, i32, i32) {
    %c0_i32 = arith.constant 0 : i32
    %c0_i32_0 = arith.constant 0 : i32
    %c0_i32_1 = arith.constant 0 : i32
    %c0_i32_2 = arith.constant 0 : i32
    return %c0_i32, %c0_i32_0, %c0_i32_1 : i32, i32, i32
  }
  func.func @transform_32(%arg0: i32, %arg1: i32) -> (i32, i32, i32) {
    %c0_i32 = arith.constant 0 : i32
    %c0_i32_0 = arith.constant 0 : i32
    %c0_i32_1 = arith.constant 0 : i32
    return %arg0, %c0_i32, %c0_i32_0 : i32, i32, i32
  }
}

</mosaic_0001>

<bundles_post_ra>
// kernel: decoder_forward.1
= control target key start
LH: loop header
LB: loop body
LE: loop exit
PB: predicated region body
PF: predicated region fallthrough
CT: control target
= control target key end

     0   :  { %s5641_s6 = smov 1   ;;  %s5642_s10 = smov 2   ;;  %s6824_s0 = inlined_call_operand.smem [shape: u32[33], index: -1, kind: input, shape index: {}] }
   0x1   :  { %s5702_s5 = sld [smem:[%s6824_s0]]   ;;  %s5643_s14 = smov 3  }
   0x2   :  { %s5707_s9 = sld [smem:[%s6824_s0 + %s5641_s6]]   ;;  %s5644_s18 = smov 4  }
   0x3   :  { %s5712_s13 = sld [smem:[%s6824_s0 + %s5642_s10]]   ;;  %s5645_s22 = smov 5  }
   0x4   :  { %s5717_s17 = sld [smem:[%s6824_s0 + %s5643_s14]]   ;;  %s5646_s26 = smov 6  }
   0x5   :  { %s5722_s21 = sld [smem:[%s6824_s0 + %s5644_s18]]   ;;  %s5647_s30 = smov 7  }
   0x6   :  { %s5727_s25 = sld [smem:[%s6824_s0 + %s5645_s22]]   ;;  %s5648_s4 = smov 8  }
   0x7   :  { %6878 = sst [smem:[#allocation29_spill]] %s5702_s5  ;;  %s5649_s10 = smov 9  }
   0x8   :  { %6879 = sst [smem:[#allocation30_spill]] %s5707_s9  ;;  %s5650_s15 = smov 10  }
   0x9   :  { %6880 = sst [smem:[#allocation31_spill]] %s5712_s13  ;;  %s5651_s20 = smov 11  }
   0xa   :  { %6881 = sst [smem:[#allocation32_spill]] %s5717_s17  ;;  %s5653_s1 = smov 13  }
   0xb   :  { %6882 = sst [smem:[#allocation33_spill]] %s5722_s21  ;;  %s5654_s7 = smov 14  }
   0xc   :  { %6883 = sst [smem:[#allocation34_spill]] %s5727_s25  ;;  %s5656_s22 = smov 16  }
   0xd   :  { %s5732_s29 = sld [smem:[%s6824_s0 + %s5646_s26]]   ;;  %s5652_s26 = smov 12  }
   0xe   :  { %s5737_s3 = sld [smem:[%s6824_s0 + %s5647_s30]]   ;;  %s5657_s28 = smov 17  }
   0xf   :  { %s5742_s8 = sld [smem:[%s6824_s0 + %s5648_s4]]  }
  0x10   :  { %s5747_s14 = sld [smem:[%s6824_s0 + %s5649_s10]]  }
  0x11   :  { %s5752_s19 = sld [smem:[%s6824_s0 + %s5650_s15]]   ;;  %s5655_s15 = smov 15  }
  0x12   :  { %s5757_s24 = sld [smem:[%s6824_s0 + %s5651_s20]]  }
  0x13   :  { %6884 = sst [smem:[#allocation35_spill]] %s5732_s29 }
  0x14   :  { %6885 = sst [smem:[#allocation36_spill]] %s5737_s3 }
  0x15   :  { %6886 = sst [smem:[#allocation37_spill]] %s5742_s8 }
  0x16   :  { %6887 = sst [smem:[#allocation38_spill]] %s5747_s14 }
  0x17   :  { %6888 = sst [smem:[#allocation39_spill]] %s5752_s19 }
  0x18   :  { %6889 = sst [smem:[#allocation40_spill]] %s5757_s24 }
  0x19   :  { %s5762_s30 = sld [smem:[%s6824_s0 + %s5652_s26]]  }
  0x1a   :  { %s5767_s6 = sld [smem:[%s6824_s0 + %s5653_s1]]  }
  0x1b   :  { %s5772_s12 = sld [smem:[%s6824_s0 + %s5654_s7]]   ;;  %s5658_s7 = smov 18  }
  0x1c   :  { %s5777_s20 = sld [smem:[%s6824_s0 + %s5655_s15]]   ;;  %s5659_s15 = smov 19  }
  0x1d   :  { %s5782_s27 = sld [smem:[%s6824_s0 + %s5656_s22]]   ;;  %s5660_s22 = smov 20  }
  0x1e   :  { %s5787_s4 = sld [smem:[%s6824_s0 + %s5657_s28]]   ;;  %s5661_s28 = smov 21  }
  0x1f   :  { %6890 = sst [smem:[#allocation41_spill]] %s5762_s30 }
  0x20   :  { %6891 = sst [smem:[#allocation42_spill]] %s5767_s6 }
  0x21   :  { %6892 = sst [smem:[#allocation43_spill]] %s5772_s12 }
  0x22   :  { %6893 = sst [smem:[#allocation44_spill]] %s5777_s20 }
  0x23   :  { %6894 = sst [smem:[#allocation45_spill]] %s5782_s27 }
  0x24   :  { %6895 = sst [smem:[#allocation46_spill]] %s5787_s4 }
  0x25   :  { %s5792_s12 = sld [smem:[%s6824_s0 + %s5658_s7]]   ;;  %s5662_s7 = smov 22  }
  0x26   :  { %s5797_s20 = sld [smem:[%s6824_s0 + %s5659_s15]]   ;;  %s5663_s15 = smov 23  }
  0x27   :  { %s5802_s6 = sld [smem:[%s6824_s0 + %s5660_s22]]   ;;  %s5664_s22 = smov 24  }
  0x28   :  { %s5807_s4 = sld [smem:[%s6824_s0 + %s5661_s28]]   ;;  %s5665_s28 = smov 25  }
  0x29   :  { %s5812_s24 = sld [smem:[%s6824_s0 + %s5662_s7]]   ;;  %s5666_s7 = smov 26  }
  0x2a   :  { %s5822_s19 = sld [smem:[%s6824_s0 + %s5664_s22]]   ;;  %s5668_s22 = smov 28  }
  0x2b   :  { %6896 = sst [smem:[#allocation47_spill]] %s5792_s12 }
  0x2c   :  { %6897 = sst [smem:[#allocation48_spill]] %s5797_s20 }
  0x2d   :  { %6898 = sst [smem:[#allocation49_spill]] %s5802_s6 }
  0x2e   :  { %6899 = sst [smem:[#allocation50_spill]] %s5807_s4 }
  0x2f   :  { %6900 = sst [smem:[#allocation51_spill]] %s5812_s24 }
  0x30   :  { %s5817_s20 = sld [smem:[%s6824_s0 + %s5663_s15]]   ;;  %s5667_s15 = smov 27  }
  0x31   :  { %6902 = sst [smem:[#allocation53_spill]] %s5822_s19 }
  0x32   :  { %s5827_s4 = sld [smem:[%s6824_s0 + %s5665_s28]]   ;;  %s5669_s28 = smov 29  }
  0x33   :  { %s5832_s14 = sld [smem:[%s6824_s0 + %s5666_s7]]   ;;  %s5670_s7 = smov 30  }
  0x34   :  { %s5842_s19 = sld [smem:[%s6824_s0 + %s5668_s22]]   ;;  %s5672_s22 = smov 32  }
  0x35   :  { %s5852_s8 = sld [smem:[%s6824_s0 + %s5670_s7]]  }
  0x36   :  { %6901 = sst [smem:[#allocation52_spill]] %s5817_s20 }
  0x37   :  { %s5837_s20 = sld [smem:[%s6824_s0 + %s5667_s15]]   ;;  %s5671_s15 = smov 31  }
  0x38   :  { %6903 = sst [smem:[#allocation54_spill]] %s5827_s4 }
  0x39   :  { %6904 = sst [smem:[#allocation55_spill]] %s5832_s14 }
  0x3a   :  { %6906 = sst [smem:[#allocation57_spill]] %s5842_s19 }
  0x3b   :  { %s5847_s4 = sld [smem:[%s6824_s0 + %s5669_s28]]  }
  0x3c   :  { %6908 = sst [smem:[#allocation59_spill]] %s5852_s8 }
  0x3d   :  { %6905 = sst [smem:[#allocation56_spill]] %s5837_s20 }
  0x3e   :  { %s5857_s20 = sld [smem:[%s6824_s0 + %s5671_s15]]  }
  0x3f   :  { %s5862_s19 = sld [smem:[%s6824_s0 + %s5672_s22]]  }
  0x41   :  { %6907 = sst [smem:[#allocation58_spill]] %s5847_s4 }
  0x44   :  { %6909 = sst [smem:[#allocation60_spill]] %s5857_s20 }
  0x45   :  { %6910 = sst [smem:[#allocation61_spill]] %s5862_s19 }
  0x46   :  { %70 = vsyncpa [#allocation5], 0 }
  0x47   :  { %72 = vsyncpa [#allocation5 + $0x1], 0 }
  0x48   :  { %73 = vsyncpa [#allocation8], 0 }
  0x49   :  { %75 = vsyncpa [#allocation8 + $0x1], 0 }
  0x4a   :  { %76 = vsyncpa [#allocation11], 0 }
  0x4b   :  { %77 = vsyncpa [#allocation6], 0 }
  0x4c   :  { %79 = vsyncpa [#allocation6 + $0x1], 0  ;;  %s5864_s28 = smov 0   ;;  %s5866_s1 = smov 0  }
  0x4d   :  { %s5868_s2 = smov 0   ;;  %s5870_s7 = smov 0  }
  0x4e   :  { %s5872_s10 = smov 0   ;;  %s5874_s11 = smov 0  }
  0x4f   :  { %s5876_s0 = smov 0   ;;  %s5878_s15 = smov 0  }
  0x50   :  { %s5880_s16 = smov 0   ;;  %s5882_s18 = smov 0  }
  0x51   :  { %s5884_s22 = smov 0  }
  0x52 LB: > { %s6911_s24 = sld [smem:[#allocation51_spill]]  ;;  %s94_s23 = sadd.s32 1, %s5631_s16  ;;  %s5627_s15 = sphi %s5878_s15, %s7047_s15   ;;  %s5623_s0 = sphi %s5876_s0, %s7046_s0   ;;  %s5619_s11 = sphi %s5874_s11, %s7045_s11   ;;  %s5615_s10 = sphi %s5872_s10, %s7044_s10   ;;  %s5611_s7 = sphi %s5870_s7, %s7043_s7   ;;  %s5607_s2 = sphi %s5868_s2, %s7042_s2   ;;  %s5603_s1 = sphi %s5866_s1, %s7041_s1   ;;  %s5599_s28 = sphi %s5864_s28, %s7040_s28   ;;  %s5639_s22 = sphi %s5884_s22, %s85_s22   ;;  %s5635_s18 = sphi %s5882_s18, %s7049_s18   ;;  %s5631_s16 = sphi %s5880_s16, %s7048_s16  }
  0x53   : > { %s6912_s30 = sld [smem:[#allocation41_spill]]  ;;  %s97_s26 = sadd.s32 1, %s5635_s18 }
  0x54   : > { %s6913_s27 = sld [smem:[#allocation45_spill]]  ;;  %p95_p0 = scmp.ge.s32.totalorder %s94_s23, 2 }
  0x55   : > { %s6914_s12 = sld [smem:[#allocation47_spill]]  ;;  %s104_s19 = sadd.s32 1, %s5619_s11 }
  0x56   : > { %s6915_s6 = sld [smem:[#allocation49_spill]]  ;;  %p6829_p1 = scmp.ne.s32.totalorder %s5619_s11, %s5615_s10 }
  0x57   : > { %s6916_s13 = sld [smem:[#allocation31_spill]]  ;;  %p112_p2 = scmp.eq.s32.totalorder %s5639_s22, 0 }
  0x58   : > { %s6917_s5 = sld [smem:[#allocation29_spill]]  ;;  %s7051_s23 = smov (%p95_p0, %s94_s23), 0 }
  0x59   : > { %s6918_s9 = sld [smem:[#allocation30_spill]]  ;;  %s7053_s26 = smov (!%p95_p0, %s97_s26), %s5635_s18 }
  0x5a   : > { %6919 = sst [smem:[#allocation62_spill]] %s5603_s1  ;;  %p5931_p3 = por %p112_p2, %p6829_p1 }
  0x5b   : > { %6920 = sst [smem:[#allocation63_spill]] %s5607_s2  ;;  %s408_s20 = ssub.s32 %s5631_s16, %s7051_s23 }
  0x5c   : > { %6921 = sst [smem:[#allocation64_spill]] %s5611_s7  ;;  %p99_p4 = scmp.ge.s32.totalorder %s7053_s26, 2 }
  0x5d   : > { %6922 = sst [smem:[#allocation65_spill]] %s5615_s10  ;;  %p409_p5 = scmp.eq.s32.totalorder %s408_s20, 0 }
  0x5e   : > { %6923 = sst [smem:[#allocation66_spill]] %s5619_s11  ;;  %s411_s8 = sadd.s32 1, %s5607_s2 }
  0x5f   : > { %6924 = sst [smem:[#allocation67_spill]] %s5623_s0  ;;  %p418_p6 = scmp.ne.s32.totalorder %s5607_s2, %s5603_s1 }
  0x60   : > { %6925 = sst [smem:[#allocation68_spill]] %s5627_s15  ;;  %s7055_s26 = smov (%p99_p4, %s7053_s26), 0 }
  0x61   : > { %6926 = sst [smem:[#allocation69_spill]] %s5631_s16  ;;  %s101_s29 = ssub.s32 %s5635_s18, %s7055_s26 }
  0x62   : > { %6927 = sst [smem:[#allocation70_spill]] %s5635_s18  ;;  %p5947_p7 = por %p418_p6, %p112_p2 }
  0x63   : > { %6928 = sst [smem:[#allocation71_spill]] %s5639_s22  ;;  %p102_p8 = scmp.eq.s32.totalorder %s101_s29, 0 }
  0x64   : > { %6929 = sst [smem:[#allocation72_spill]] %s7051_s23  ;;  %p6832_p9 = scmp.lt.s32.totalorder %s5639_s22, 4 }
  0x65   : > { %6931 = sst [smem:[#allocation73_spill]] %s7055_s26  ;;  %s6830_s23 = sand.u32 1, %s5639_s22  }
  0x66   : > { %s5943_s4 = scalar_select %p409_p5, %s5607_s2, %s411_s8  }
  0x67   : > { %s6933_s3 = scalar_select %p5947_p7, 1, 0 }
  0x68   : > { %6932 = sst [smem:[#allocation74_spill]] %s5943_s4  ;;  %s6831_s20 = sand.u32 1, %s5619_s11  }
  0x69   : > { %s5954_s25 = scalar_select %p102_p8, %s5619_s11, %s104_s19  }
  0x6a   : > { %p5961_p10 = pnand %p6832_p9, %p5931_p3  ;;  %s4538_s8 = sshll.u32 %s6831_s20, 4 }
  0x6b   : > { %6934 = sst [smem:[#allocation75_spill]] %s5954_s25  ;;  %s4645_s26 = sshll.u32 %s5635_s18, 8 }
  0x6c   : > { %s997_s4 = scalar_lea.vmem [#allocation7], %s4538_s8  ;;  %s5969_s29 = scalar_lea.hbm %s6918_s9, %s4645_s26 }
  0x6d   : > { %s1004_s0 = sshll.u32 %s997_s4, 4  ;;  %s5975_s19 = scalar_lea.sflag [#allocation8], %s6830_s23  ;;  %s5971_s0 = int_to_ptr.vmem [resolvable:$true] %s1004_s0 }
  0x6e   : > { %s5209_s15 = scalar_lea.hbm %s5969_s29, 256  ;;  %p5981_p12 = pneg %p5961_p10 }
  0x6f   : > { %p5210_p11 = scmp.ne.s32.totalorder %s5969_s29, %s5209_s15  ;;  %s5214_s4 = scalar_lea.hbm %s6918_s9, 512 }
  0x70   : > { %p5215_p2 = scmp.lt.s32.totalorder %s5969_s29, %s6918_s9  ;;  %p5216_p3 = scmp.lt.s32.totalorder %s5214_s4, %s5209_s15 }
  0x71   : > { %p5212_p13 = pnand %p5981_p12, %p5210_p11 }
  0x72   : > { %p5217_p4 = por %p5216_p3, %p5215_p2 }
  0x73   : > { %p5213_p0 = pneg %p5212_p13 }
  0x75   : > { %p5218_p5 = pnand %p5217_p4, %p5213_p0 }
  0x77   : > { %5221 = shalt.err (!%p5218_p5)
}
  0x78   : > { %s5222_s26 = scalar_lea.vmem %s5971_s0, 256  ;;  %s5673_s8 = smov [#allocation7]  }
  0x79   : > { %p5223_p6 = scmp.ne.s32.totalorder %s5971_s0, %s5222_s26  ;;  %s5227_s23 = sshll.u32 %s5673_s8, 4  ;;  %s5228_s23 = int_to_ptr.vmem [resolvable:$false] %s5227_s23 }
  0x7a   : > { %s5229_s20 = scalar_lea.vmem %s5228_s23, 512  ;;  %p5230_p11 = scmp.lt.s32.totalorder %s5971_s0, %s5228_s23 }
  0x7b   : > { %p5225_p8 = pnand %p5223_p6, %p5981_p12  ;;  %p5231_p13 = scmp.lt.s32.totalorder %s5229_s20, %s5222_s26 }
  0x7d   : > { %p5226_p1 = pneg %p5225_p8  ;;  %p5232_p9 = por %p5231_p13, %p5230_p11 }
  0x7f   : > { %p5233_p7 = pnand %p5232_p9, %p5226_p1 }
  0x81   : > { %5236 = shalt.err (!%p5233_p7)
}
  0x82   : > { %s6835_s15 = smov 128   ;;  %s6837_s23 = smov 8  }
  0x83   : > { %5000 = dma.hbm_to_vmem [thread:$0]  (!%p5961_p10), %s5969_s29, 256, %s5971_s0, %s5975_s19, %s6835_s15, %s6835_s15, %s6837_s23  }
  0x84   : > { %p6937_p1 = scmp.ne.s32.totalorder %s6933_s3, 0  ;;  %p6938_p7 = scmp.lt.s32.totalorder %s5639_s22, 4 }
  0x85   : > { %s6940_s4 = sand.u32 1, %s5619_s11   ;;  %s4537_s8 = sshll.u32 %s5635_s18, 7 }
  0x86   : > { %p6007_p9 = pnand %p6938_p7, %p6937_p1  ;;  %s6013_s26 = sshll.u32 %s6940_s4, 3 }
  0x87   : > { %s6019_s9 = scalar_lea.hbm %s6917_s5, %s4537_s8  ;;  %s979_s17 = scalar_lea.vmem [#allocation4], %s6013_s26 }
  0x88   : > { %s6939_s20 = scalar_select %p6007_p9, 1, 0 }
  0x89   : > { %s986_s14 = sshll.u32 %s979_s17, 4  ;;  %s6941_s3 = sand.u32 1, %s5639_s22   ;;  %s987_s14 = int_to_ptr.vmem [resolvable:$true] %s986_s14 }
  0x8a   : > { %s6024_s0 = scalar_lea.sflag [#allocation5], %s6941_s3  ;;  %s5237_s29 = scalar_lea.hbm %s6019_s9, 128 }
  0x8b   : > { %p5238_p0 = scmp.ne.s32.totalorder %s6019_s9, %s5237_s29  ;;  %s5242_s4 = scalar_lea.hbm %s6917_s5, 256 }
  0x8c   : > { %p5243_p4 = scmp.lt.s32.totalorder %s6019_s9, %s6917_s5  ;;  %p5244_p5 = scmp.lt.s32.totalorder %s5242_s4, %s5237_s29 }
  0x8d   : > { %p5240_p2 = pnand %p5238_p0, %p5981_p12 }
  0x8e   : > { %p5245_p6 = por %p5244_p5, %p5243_p4 }
  0x8f   : > { %p5241_p3 = pneg %p5240_p2 }
  0x91   : > { %p5246_p8 = pnand %p5245_p6, %p5241_p3 }
  0x93   : > { %5249 = shalt.err (!%p5246_p8)
}
  0x94   : > { %s5250_s15 = scalar_lea.vmem %s987_s14, 128  ;;  %s5676_s17 = smov [#allocation4]  }
  0x95   : > { %p5251_p11 = scmp.ne.s32.totalorder %s987_s14, %s5250_s15  ;;  %s5255_s3 = sshll.u32 %s5676_s17, 4  ;;  %s5256_s3 = int_to_ptr.vmem [resolvable:$false] %s5255_s3 }
  0x96   : > { %s5257_s23 = scalar_lea.vmem %s5256_s3, 256  ;;  %p5258_p7 = scmp.lt.s32.totalorder %s987_s14, %s5256_s3 }
  0x97   : > { %p5253_p13 = pnand %p5251_p11, %p5981_p12  ;;  %p5259_p9 = scmp.lt.s32.totalorder %s5257_s23, %s5250_s15 }
  0x99   : > { %p5254_p1 = pneg %p5253_p13  ;;  %p5260_p0 = por %p5259_p9, %p5258_p7 }
  0x9b   : > { %p5261_p2 = pnand %p5260_p0, %p5254_p1 }
  0x9d   : > { %5264 = shalt.err (!%p5261_p2)
}
  0x9e   : > { %4997 = dma.hbm_to_vmem [thread:$0]  (!%p5961_p10), %s6019_s9, 128, %s987_s14, %s6024_s0  }
  0x9f   : > { %s6042_s29 = scalar_lea.hbm %s6916_s13, %s4537_s8  ;;  %s1018_s15 = scalar_lea.vmem [#allocation9], %s6013_s26 }
  0xa0   : > { %s1025_s23 = sshll.u32 %s1018_s15, 4  ;;  %s1088_s4 = sand.u32 1, %s5607_s2   ;;  %s1026_s23 = int_to_ptr.vmem [resolvable:$true] %s1025_s23 }
  0xa1   : > { %s5265_s17 = scalar_lea.hbm %s6042_s29, 128  ;;  %s5270_s3 = scalar_lea.hbm %s6916_s13, 256 }
  0xa2   : > { %p5266_p9 = scmp.ne.s32.totalorder %s6042_s29, %s5265_s17  ;;  %p5271_p5 = scmp.lt.s32.totalorder %s6042_s29, %s6916_s13 }
  0xa3   : > { %p5272_p6 = scmp.lt.s32.totalorder %s5270_s3, %s5265_s17 }
  0xa4   : > { %p5268_p3 = pnand %p5266_p9, %p5981_p12 }
  0xa5   : > { %p5273_p8 = por %p5272_p6, %p5271_p5 }
  0xa6   : > { %p5269_p4 = pneg %p5268_p3 }
  0xa8   : > { %p5274_p11 = pnand %p5273_p8, %p5269_p4 }
  0xaa   : > { %5277 = shalt.err (!%p5274_p11)
}
  0xab   : > { %s5278_s9 = scalar_lea.vmem %s1026_s23, 128  ;;  %s5677_s14 = smov [#allocation9]  }
  0xac   : > { %p5279_p13 = scmp.ne.s32.totalorder %s1026_s23, %s5278_s9  ;;  %s5283_s26 = sshll.u32 %s5677_s14, 4  ;;  %s5284_s26 = int_to_ptr.vmem [resolvable:$false] %s5283_s26 }
  0xad   : > { %s5285_s8 = scalar_lea.vmem %s5284_s26, 256  ;;  %p5286_p0 = scmp.lt.s32.totalorder %s1026_s23, %s5284_s26 }
  0xae   : > { %p5281_p1 = pnand %p5279_p13, %p5981_p12  ;;  %p5287_p2 = scmp.lt.s32.totalorder %s5285_s8, %s5278_s9 }
  0xb0   : > { %p5282_p7 = pneg %p5281_p1  ;;  %p5288_p9 = por %p5287_p2, %p5286_p0 }
  0xb2   : > { %p5289_p3 = pnand %p5288_p9, %p5282_p7 }
  0xb4   : > { %5292 = shalt.err (!%p5289_p3)
}
  0xb5   : > { %5003 = dma.hbm_to_vmem [thread:$0]  (!%p5961_p10), %s6042_s29, 128, %s1026_s23, %s5975_s19  }
  0xb6   : > { %s6059_s25 = sshll.u32 %s1088_s4, 5  ;;  %s6062_s15 = sshll.u32 %s5631_s16, 9 }
  0xb7   : > { %s6066_s17 = scalar_lea.hbm %s6912_s30, %s6062_s15  ;;  %s1090_s21 = scalar_lea.vmem [#allocation12], %s6059_s25 }
  0xb8   : > { %s1097_s3 = sshll.u32 %s1090_s21, 4  ;;  %s6073_s9 = scalar_lea.hbm %s6913_s27, %s6062_s15  ;;  %s6069_s3 = int_to_ptr.vmem [resolvable:$true] %s1097_s3 }
  0xb9   : > { %s5293_s14 = scalar_lea.hbm %s6066_s17, 512  ;;  %p6942_p12 = scmp.ne.s32.totalorder %s6939_s20, 0 }
  0xba   : > { %p5294_p10 = scmp.ne.s32.totalorder %s6066_s17, %s5293_s14  ;;  %s5298_s23 = scalar_lea.hbm %s6912_s30, 1024 }
  0xbb   : > { %p6079_p4 = pneg %p6942_p12  ;;  %p5299_p8 = scmp.lt.s32.totalorder %s6066_s17, %s6912_s30 }
  0xbc   : > { %p5300_p11 = scmp.lt.s32.totalorder %s5298_s23, %s5293_s14 }
  0xbd   : > { %p5296_p5 = pnand %p6079_p4, %p5294_p10 }
  0xbe   : > { %p5301_p13 = por %p5300_p11, %p5299_p8 }
  0xbf   : > { %p5297_p6 = pneg %p5296_p5 }
  0xc1   : > { %p5302_p1 = pnand %p5301_p13, %p5297_p6 }
  0xc3   : > { %5305 = shalt.err (!%p5302_p1)
}
  0xc4   : > { %s5306_s4 = scalar_lea.vmem %s6069_s3, 512  ;;  %s5678_s26 = smov [#allocation12]  }
  0xc5   : > { %p5307_p7 = scmp.ne.s32.totalorder %s6069_s3, %s5306_s4  ;;  %s5311_s8 = sshll.u32 %s5678_s26, 4  ;;  %s5312_s8 = int_to_ptr.vmem [resolvable:$false] %s5311_s8 }
  0xc6   : > { %s5313_s21 = scalar_lea.vmem %s5312_s8, 1024  ;;  %p5314_p9 = scmp.lt.s32.totalorder %s6069_s3, %s5312_s8 }
  0xc7   : > { %p5309_p0 = pnand %p5307_p7, %p6079_p4  ;;  %p5315_p3 = scmp.lt.s32.totalorder %s5313_s21, %s5306_s4 }
  0xc9   : > { %p5310_p2 = pneg %p5309_p0  ;;  %p5316_p10 = por %p5315_p3, %p5314_p9 }
  0xcb   : > { %p5317_p5 = pnand %p5316_p10, %p5310_p2 }
  0xcd   : > { %5320 = shalt.err (!%p5317_p5)
}
  0xce   : > { %s6944_s14 = smov 8   ;;  %s6945_s23 = smov 128  }
  0xcf   : > { %5006 = dma.hbm_to_vmem [thread:$0]  (!%p6942_p12), %s6066_s17, 512, %s6069_s3, %s6024_s0, %s6945_s23, %s6945_s23, %s6944_s14  }
  0xd0   : > { %s1129_s4 = scalar_lea.vmem [#allocation13], %s6059_s25  ;;  %s6106_s8 = scalar_lea.hbm %s6914_s12, %s6062_s15 }
  0xd1   : > { %s1136_s26 = sshll.u32 %s1129_s4, 4  ;;  %s5321_s21 = scalar_lea.hbm %s6073_s9, 512  ;;  %s6102_s26 = int_to_ptr.vmem [resolvable:$true] %s1136_s26 }
  0xd2   : > { %p5322_p6 = scmp.ne.s32.totalorder %s6073_s9, %s5321_s21  ;;  %s5326_s5 = scalar_lea.hbm %s6913_s27, 1024 }
  0xd3   : > { %p5327_p13 = scmp.lt.s32.totalorder %s6073_s9, %s6913_s27  ;;  %p5328_p1 = scmp.lt.s32.totalorder %s5326_s5, %s5321_s21 }
  0xd4   : > { %p5324_p8 = pnand %p5322_p6, %p6079_p4 }
  0xd5   : > { %p5329_p7 = por %p5328_p1, %p5327_p13 }
  0xd6   : > { %p5325_p11 = pneg %p5324_p8 }
  0xd8   : > { %p5330_p0 = pnand %p5329_p7, %p5325_p11 }
  0xda   : > { %5333 = shalt.err (!%p5330_p0)
}
  0xdb   : > { %s5334_s17 = scalar_lea.vmem %s6102_s26, 512  ;;  %s5679_s3 = smov [#allocation13]  }
  0xdc   : > { %p5335_p2 = scmp.ne.s32.totalorder %s6102_s26, %s5334_s17  ;;  %s5339_s4 = sshll.u32 %s5679_s3, 4  ;;  %s5340_s4 = int_to_ptr.vmem [resolvable:$false] %s5339_s4 }
  0xdd   : > { %s5341_s13 = scalar_lea.vmem %s5340_s4, 1024  ;;  %p5342_p10 = scmp.lt.s32.totalorder %s6102_s26, %s5340_s4 }
  0xde   : > { %p5337_p9 = pnand %p5335_p2, %p6079_p4  ;;  %p5343_p5 = scmp.lt.s32.totalorder %s5341_s13, %s5334_s17 }
  0xe0   : > { %p5338_p3 = pneg %p5337_p9  ;;  %p5344_p6 = por %p5343_p5, %p5342_p10 }
  0xe2   : > { %p5345_p8 = pnand %p5344_p6, %p5338_p3 }
  0xe4   : > { %5348 = shalt.err (!%p5345_p8)
}
  0xe5   : > { %5009 = dma.hbm_to_vmem [thread:$0]  (!%p6942_p12), %s6073_s9, 512, %s6102_s26, %s5975_s19, %s6945_s23, %s6945_s23, %s6944_s14  }
  0xe6   : > { %s1156_s5 = scalar_lea.vmem [#allocation14], %s6059_s25  ;;  %s6133_s21 = scalar_lea.hbm %s6915_s6, %s6062_s15 }
  0xe7   : > { %s1163_s13 = sshll.u32 %s1156_s5, 4  ;;  %s5349_s17 = scalar_lea.hbm %s6106_s8, 512  ;;  %s6129_s13 = int_to_ptr.vmem [resolvable:$true] %s1163_s13 }
  0xe8   : > { %p5350_p11 = scmp.ne.s32.totalorder %s6106_s8, %s5349_s17  ;;  %s5354_s3 = scalar_lea.hbm %s6914_s12, 1024 }
  0xe9   : > { %p5355_p7 = scmp.lt.s32.totalorder %s6106_s8, %s6914_s12  ;;  %p5356_p0 = scmp.lt.s32.totalorder %s5354_s3, %s5349_s17 }
  0xea   : > { %p5352_p13 = pnand %p5350_p11, %p6079_p4 }
  0xeb   : > { %p5357_p2 = por %p5356_p0, %p5355_p7 }
  0xec   : > { %p5353_p1 = pneg %p5352_p13 }
  0xee   : > { %p5358_p9 = pnand %p5357_p2, %p5353_p1 }
  0xf0   : > { %5361 = shalt.err (!%p5358_p9)
}
  0xf1   : > { %s5362_s9 = scalar_lea.vmem %s6129_s13, 512  ;;  %s5680_s26 = smov [#allocation14]  }
  0xf2   : > { %p5363_p3 = scmp.ne.s32.totalorder %s6129_s13, %s5362_s9  ;;  %s5367_s4 = sshll.u32 %s5680_s26, 4  ;;  %s5368_s4 = int_to_ptr.vmem [resolvable:$false] %s5367_s4 }
  0xf3   : > { %s5369_s5 = scalar_lea.vmem %s5368_s4, 1024  ;;  %p5370_p6 = scmp.lt.s32.totalorder %s6129_s13, %s5368_s4 }
  0xf4   : > { %p5365_p10 = pnand %p5363_p3, %p6079_p4  ;;  %p5371_p8 = scmp.lt.s32.totalorder %s5369_s5, %s5362_s9 }
  0xf6   : > { %p5366_p5 = pneg %p5365_p10  ;;  %p5372_p11 = por %p5371_p8, %p5370_p6 }
  0xf8   : > { %p5373_p13 = pnand %p5372_p11, %p5366_p5 }
  0xfa   : > { %5376 = shalt.err (!%p5373_p13)
}
  0xfb   : > { %5012 = dma.hbm_to_vmem [thread:$0]  (!%p6942_p12), %s6106_s8, 512, %s6129_s13, %s6024_s0, %s6945_s23, %s6945_s23, %s6944_s14  }
  0xfc   : > { %s1183_s17 = scalar_lea.vmem [#allocation15], %s6059_s25  ;;  %s5377_s9 = scalar_lea.hbm %s6133_s21, 512 }
  0xfd   : > { %s1190_s3 = sshll.u32 %s1183_s17, 4  ;;  %p5378_p1 = scmp.ne.s32.totalorder %s6133_s21, %s5377_s9  ;;  %s1191_s3 = int_to_ptr.vmem [resolvable:$true] %s1190_s3 }
  0xfe   : > { %s5382_s26 = scalar_lea.hbm %s6915_s6, 1024  ;;  %p5383_p2 = scmp.lt.s32.totalorder %s6133_s21, %s6915_s6 }
  0xff   : > { %p5380_p7 = pnand %p5378_p1, %p6079_p4  ;;  %p5384_p9 = scmp.lt.s32.totalorder %s5382_s26, %s5377_s9 }
 0x101   : > { %p5381_p0 = pneg %p5380_p7  ;;  %p5385_p3 = por %p5384_p9, %p5383_p2 }
 0x103   : > { %p5386_p10 = pnand %p5385_p3, %p5381_p0 }
 0x105   : > { %5389 = shalt.err (!%p5386_p10)
}
 0x106   : > { %s5390_s4 = scalar_lea.vmem %s1191_s3, 512  ;;  %s5681_s8 = smov [#allocation15]  }
 0x107   : > { %p5391_p5 = scmp.ne.s32.totalorder %s1191_s3, %s5390_s4  ;;  %s5395_s13 = sshll.u32 %s5681_s8, 4  ;;  %s5396_s13 = int_to_ptr.vmem [resolvable:$false] %s5395_s13 }
 0x108   : > { %s5397_s5 = scalar_lea.vmem %s5396_s13, 1024  ;;  %p5398_p11 = scmp.lt.s32.totalorder %s1191_s3, %s5396_s13 }
 0x109   : > { %p5393_p6 = pnand %p5391_p5, %p6079_p4  ;;  %p5399_p13 = scmp.lt.s32.totalorder %s5397_s5, %s5390_s4 }
 0x10b   : > { %p5394_p8 = pneg %p5393_p6  ;;  %p5400_p1 = por %p5399_p13, %p5398_p11 }
 0x10d   : > { %p5401_p7 = pnand %p5400_p1, %p5394_p8 }
 0x10f   : > { %5404 = shalt.err (!%p5401_p7)
}
 0x110   : > { %5015 = dma.hbm_to_vmem [thread:$0]  (!%p6942_p12), %s6133_s21, 512, %s1191_s3, %s5975_s19, %s6945_s23, %s6945_s23, %s6944_s14  }
 0x111   : > { %s6173_s17 = sadd.s32 4294967295, %s5639_s22   ;;  %s4532_s9 = sadd.s32 4294967294, %s5639_s22  }
 0x112   : > { %p117_p0 = scmp.ne.s32.totalorder %s5615_s10, %s5611_s7  ;;  %p6849_p2 = scmp.eq.s32.totalorder %s6173_s17, 0 }
 0x113   : > { %p424_p9 = scmp.ne.s32.totalorder %s5603_s1, %s5599_s28  ;;  %p932_p3 = scmp.eq.s32.totalorder %s6173_s17, 3 }
 0x114   : > { %p6184_p10 = por %p6849_p2, %p117_p0  ;;  %p938_p5 = scmp.eq.s32.totalorder %s4532_s9, 3 }
 0x115   : > { %s6947_s21 = sld [smem:[#allocation55_spill]]  ;;  %p6190_p6 = por %p424_p9, %p6849_p2 }
 0x116   : > { %s6946_s26 = scalar_select %p6184_p10, 1, 0 }
 0x117   : > { %s6948_s3 = scalar_select %p6190_p6, 1, 0 }
 0x118   : > { %p6949_p8 = scmp.ne.s32.totalorder %s5619_s11, %s5615_s10  ;;  %p6201_p13 = por %p938_p5, %p117_p0 }
 0x119   : > { %p4533_p1 = scmp.ge.s32.totalorder %s5639_s22, 1  ;;  %p945_p7 = scmp.lt.s32.totalorder %s5639_s22, 5 }
 0x11a   : > { %p6197_p11 = por %p932_p3, %p6949_p8  ;;  %s5682_s13 = smov [#allocation10]  }
 0x11b   : > { %s6952_s28 = scalar_select %p6201_p13, 1, 0 }
 0x11c   : > { %s6950_s4 = scalar_select %p6197_p11, 1, 0 }
 0x11d   : > { %6953 = sst [smem:[#allocation77_spill]] %s6952_s28  ;;  %p6207_p10 = pnand %p4533_p1, %p945_p7 }
 0x11e   : > { %6951 = sst [smem:[#allocation76_spill]] %s6950_s4  ;;  %s958_s5 = sshll.u32 %s5682_s13, 4  ;;  %s6211_s5 = int_to_ptr.vmem [resolvable:$true] %s958_s5 }
 0x11f   : > { %s6954_s8 = scalar_select %p6207_p10, 1, 0 }
 0x120   : > { %s6215_s9 = scalar_lea.hbm %s6911_s24, %s6062_s15  ;;  %p4990_p0 = pneg %p6207_p10 }
 0x121   : > { %s1210_s6 = scalar_lea.vmem [#allocation16], %s6059_s25  ;;  %s6230_s30 = scalar_lea.hbm %s6947_s21, %s6062_s15 }
 0x122   : > { %s1217_s12 = sshll.u32 %s1210_s6, 4  ;;  %p6224_p9 = pnand %p4990_p0, %p6849_p2  ;;  %s6220_s12 = int_to_ptr.vmem [resolvable:$true] %s1217_s12 }
 0x123   : > { %s5405_s13 = scalar_lea.hbm %s6215_s9, 512  ;;  %s5410_s18 = scalar_lea.hbm %s6911_s24, 1024 }
 0x124   : > { %s6955_s27 = scalar_select %p6224_p9, 1, 0 }
 0x125   : > { %p5406_p3 = scmp.ne.s32.totalorder %s6215_s9, %s5405_s13  ;;  %p5411_p1 = scmp.lt.s32.totalorder %s6215_s9, %s6911_s24 }
 0x126   : > { %p5412_p7 = scmp.lt.s32.totalorder %s5410_s18, %s5405_s13 }
 0x127   : > { %p5408_p5 = pnand %p5406_p3, %p6079_p4 }
 0x128   : > { %p5413_p13 = por %p5412_p7, %p5411_p1 }
 0x129   : > { %p5409_p8 = pneg %p5408_p5 }
 0x12b   : > { %p5414_p11 = pnand %p5413_p13, %p5409_p8 }
 0x12d   : > { %5417 = shalt.err (!%p5414_p11)
}
 0x12e   : > { %s5418_s6 = scalar_lea.vmem %s6220_s12, 512  ;;  %s5683_s15 = smov [#allocation16]  }
 0x12f   : > { %p5419_p0 = scmp.ne.s32.totalorder %s6220_s12, %s5418_s6  ;;  %s5423_s16 = sshll.u32 %s5683_s15, 4  ;;  %s5424_s16 = int_to_ptr.vmem [resolvable:$false] %s5423_s16 }
 0x130   : > { %s5425_s11 = scalar_lea.vmem %s5424_s16, 1024  ;;  %p5426_p3 = scmp.lt.s32.totalorder %s6220_s12, %s5424_s16 }
 0x131   : > { %p5421_p2 = pnand %p5419_p0, %p6079_p4  ;;  %p5427_p5 = scmp.lt.s32.totalorder %s5425_s11, %s5418_s6 }
 0x133   : > { %p5422_p6 = pneg %p5421_p2  ;;  %p5428_p10 = por %p5427_p5, %p5426_p3 }
 0x135   : > { %p5429_p9 = pnand %p5428_p10, %p5422_p6 }
 0x137   : > { %5432 = shalt.err (!%p5429_p9)
}
 0x138   : > { %5018 = dma.hbm_to_vmem [thread:$0]  (!%p6942_p12), %s6215_s9, 512, %s6220_s12, %s6024_s0, %s6945_s23, %s6945_s23, %s6944_s14  }
 0x139   : > { %s1249_s18 = scalar_lea.vmem [#allocation17], %s6059_s25  ;;  %p6956_p2 = scmp.ne.s32.totalorder %s6955_s27, 0 }
 0x13a   : > { %s1256_s16 = sshll.u32 %s1249_s18, 4  ;;  %s5444_s11 = scalar_lea.vmem %s6211_s5, 128  ;;  %s1257_s16 = int_to_ptr.vmem [resolvable:$true] %s1256_s16 }
 0x13b   : > { %p5435_p11 = pneg %p6956_p2  ;;  %p5445_p10 = scmp.ne.s32.totalorder %s6211_s5, %s5444_s11 }
 0x13c   : > { %p5452_p9 = scmp.lt.s32.totalorder %s6211_s5, %s6211_s5  ;;  %p5453_p8 = scmp.lt.s32.totalorder %s5444_s11, %s5444_s11 }
 0x13d   : > { %p5447_p6 = pnand %p5445_p10, %p5435_p11 }
 0x13e   : > { %p5454_p1 = por %p5453_p8, %p5452_p9 }
 0x13f   : > { %p5448_p13 = pneg %p5447_p6 }
 0x141   : > { %p5455_p7 = pnand %p5454_p1, %p5448_p13 }
 0x143   : > { %5458 = shalt.err (!%p5455_p7)
}
 0x144   : > { %s6957_s13 = sld [smem:[#allocation32_spill]]  ;;  %s5459_s12 = scalar_lea.hbm %s6230_s30, 512 }
 0x145   : > { %p5460_p0 = scmp.ne.s32.totalorder %s6230_s30, %s5459_s12  ;;  %s5464_s0 = scalar_lea.hbm %s6947_s21, 1024 }
 0x146   : > { %p5465_p11 = scmp.lt.s32.totalorder %s6230_s30, %s6947_s21  ;;  %p5466_p10 = scmp.lt.s32.totalorder %s5464_s0, %s5459_s12 }
 0x147   : > { %p5462_p3 = pnand %p5460_p0, %p6079_p4 }
 0x148   : > { %p5467_p6 = por %p5466_p10, %p5465_p11 }
 0x149   : > { %p5463_p5 = pneg %p5462_p3 }
 0x14a   : > { %4993 = dma.hbm_to_vmem [thread:$0]  (!%p6956_p2), %s6957_s13, 128, %s6211_s5, [#allocation11]  }
 0x14b   : > { %p5468_p13 = pnand %p5467_p6, %p5463_p5 }
 0x14d   : > { %5471 = shalt.err (!%p5468_p13)
}
 0x14e   : > { %s5472_s27 = scalar_lea.vmem %s1257_s16, 512  ;;  %s5684_s25 = smov [#allocation17]  }
 0x14f   : > { %p5473_p9 = scmp.ne.s32.totalorder %s1257_s16, %s5472_s27  ;;  %s5477_s5 = sshll.u32 %s5684_s25, 4  ;;  %s5478_s5 = int_to_ptr.vmem [resolvable:$false] %s5477_s5 }
 0x150   : > { %s5479_s9 = scalar_lea.vmem %s5478_s5, 1024  ;;  %p5480_p2 = scmp.lt.s32.totalorder %s1257_s16, %s5478_s5 }
 0x151   : > { %p5475_p8 = pnand %p5473_p9, %p6079_p4  ;;  %p5481_p7 = scmp.lt.s32.totalorder %s5479_s9, %s5472_s27 }
 0x153   : > { %p5476_p1 = pneg %p5475_p8  ;;  %p5482_p0 = por %p5481_p7, %p5480_p2 }
 0x155   : > { %p5483_p3 = pnand %p5482_p0, %p5476_p1 }
 0x157   : > { %5486 = shalt.err (!%p5483_p3)
}
 0x158   : > { %5021 = dma.hbm_to_vmem [thread:$0]  (!%p6942_p12), %s6230_s30, 512, %s1257_s16, %s5975_s19, %s6945_s23, %s6945_s23, %s6944_s14  }
 0x159   : > { %p6958_p4 = scmp.ne.s32.totalorder %s6954_s8, 0 }
 0x15b   : > { %1288 = sbr.rel (%p6958_p4) target bundleno = 6312 (0x18a8), region = 148 }
 0x160   : > { %s1290_s29 = sand.u32 1, %s6173_s17   ;;  %s6283_s6 = sand.u32 1, %s5615_s10  }
 0x161   : > { %6959 = sst [smem:[#allocation78_spill]] %s6283_s6  ;;  %s6286_s15 = sshll.u32 %s6283_s6, 3 }
 0x162   : > { %s1291_s20 = scalar_lea.sflag [#allocation5], %s1290_s29  ;;  %p6960_p5 = scmp.ne.s32.totalorder %s6946_s26, 0 }
 0x164   : > { %5558 = dma.done.wait (%p6960_p5), %s1291_s20, 128  }
 0x165   : > { %5560 = vsyncadd (%p6960_p5), %s1291_s20, 4294967168  ;;  %s4563_s30 = sshll.u32 %s6283_s6, 4  ;;  %s1300_s19 = scalar_lea.sflag [#allocation8], %s1290_s29 }
 0x166   : > { %s6294_s14 = scalar_lea.vmem [#allocation7], %s4563_s30 }
 0x167   : > { %6961 = sst [smem:[#allocation79_spill]] %s6294_s14 }
 0x168   : > { %5562 = dma.done.wait (%p6960_p5), %s1300_s19, 384  }
 0x169   : > { %5564 = vsyncadd (%p6960_p5), %s1300_s19, 4294966912  ;;  %p6962_p12 = scmp.eq.s32.totalorder %s6173_s17, 0 }
 0x16b   : > { %5566 = dma.done.wait (%p6962_p12), [#allocation11], 128   ;;  %p6963_p11 = pmov %p6962_p12 }
 0x16c   : > { %s1323_s8 = sand.u32 1, %s5603_s1   ;;  %p6965_p10 = scmp.ne.s32.totalorder %s6948_s3, 0 }
 0x16d   : > { %5568 = vsyncadd (%p6963_p11), [#allocation11], 4294967168  ;;  %s4566_s16 = sshll.u32 %s1323_s8, 5 }
 0x16e   : > { %s6306_s11 = scalar_lea.vmem [#allocation12], %s4566_s16 }
 0x16f   : > { %6964 = sst [smem:[#allocation80_spill]] %s6306_s11 }
 0x170   : > { %5570 = dma.done.wait (%p6965_p10), %s1291_s20, 512  }
 0x171   : > { %5572 = vsyncadd (%p6965_p10), %s1291_s20, 4294966784  ;;  %s6312_s26 = scalar_lea.vmem [#allocation13], %s4566_s16 }
 0x172   : > { %6966 = sst [smem:[#allocation81_spill]] %s6312_s26 }
 0x173   : > { %5574 = dma.done.wait (%p6965_p10), %s1300_s19, 512  }
 0x174   : > { %5576 = vsyncadd (%p6965_p10), %s1300_s19, 4294966784  ;;  %s6318_s17 = scalar_lea.vmem [#allocation14], %s4566_s16 }
 0x175   : > { %6967 = sst [smem:[#allocation82_spill]] %s6318_s17 }
 0x176   : > { %5578 = dma.done.wait (%p6965_p10), %s1291_s20, 512  }
 0x177   : > { %5580 = vsyncadd (%p6965_p10), %s1291_s20, 4294966784  ;;  %s6324_s13 = scalar_lea.vmem [#allocation15], %s4566_s16 }
 0x178   : > { %6968 = sst [smem:[#allocation83_spill]] %s6324_s13 }
 0x179   : > { %5582 = dma.done.wait (%p6965_p10), %s1300_s19, 512  }
 0x17a   : > { %5584 = vsyncadd (%p6965_p10), %s1300_s19, 4294966784  ;;  %s6330_s12 = scalar_lea.vmem [#allocation16], %s4566_s16 }
 0x17b   : > { %6969 = sst [smem:[#allocation84_spill]] %s6330_s12 }
 0x17c   : > { %5586 = dma.done.wait (%p6965_p10), %s1291_s20, 512  }
 0x17d   : > { %5588 = vsyncadd (%p6965_p10), %s1291_s20, 4294966784  ;;  %s6336_s0 = scalar_lea.vmem [#allocation17], %s4566_s16 }
 0x17e   : > { %6970 = sst [smem:[#allocation85_spill]] %s6336_s0 }
 0x17f   : > { %5590 = dma.done.wait (%p6965_p10), %s1300_s19, 512  }
 0x180   : > { %5592 = vsyncadd (%p6965_p10), %s1300_s19, 4294966784  ;;  %s6971_s27 = sld [smem:[#allocation67_spill]] }
 0x181   : > { %s6975_s29 = sld [smem:[#allocation35_spill]] }
 0x182   : > { %s6976_s30 = sld [smem:[#allocation37_spill]] }
 0x183   : > { %s6978_s23 = sld [smem:[#allocation39_spill]] }
 0x184   : > { %s6979_s18 = sld [smem:[#allocation40_spill]] }
 0x185   : > { %s6980_s21 = sld [smem:[#allocation42_spill]] }
 0x186   : > { %s6981_s20 = sld [smem:[#allocation43_spill]]  ;;  %p1559_p6 = scmp.lt.s32.totalorder %s6971_s27, 1 }
 0x187   : > { %s6982_s24 = sld [smem:[#allocation44_spill]] }
 0x188   : > { %s6983_s16 = sld [smem:[#allocation46_spill]] }
 0x189   : > { %s6984_s10 = sld [smem:[#allocation48_spill]] }
 0x18a   : > { %s6985_s2 = sld [smem:[#allocation50_spill]] }
 0x18b   : > { %s6344_s1 = scalar_select %p1559_p6, %s6971_s27, 1 }
 0x18c   : > { %s6986_s3 = sld [smem:[#allocation52_spill]] }
 0x18d   : > { %s6987_s28 = sld [smem:[#allocation53_spill]]  ;;  %s4652_s4 = sshll.u32 %s6344_s1, 5 }
 0x18e   : > { %s6988_s22 = sld [smem:[#allocation54_spill]]  ;;  %s6354_s12 = scalar_lea.vmem %s6975_s29, %s4652_s4 }
 0x18f   : > { %s6989_s6 = sld [smem:[#allocation56_spill]]  ;;  %s6357_s26 = scalar_lea.vmem %s6976_s30, %s4652_s4 }
 0x190   : > { %6990 = sst [smem:[#allocation86_spill]] %s6354_s12  ;;  %s6362_s25 = scalar_lea.vmem %s6978_s23, %s4652_s4 }
 0x191   : > { %s6991_s13 = sld [smem:[#allocation57_spill]]  ;;  %s1588_s19 = scalar_lea.vmem %s6979_s18, %s6344_s1 }
 0x192   : > { %6992 = sst [smem:[#allocation87_spill]] %s6357_s26  ;;  %s1591_s5 = scalar_lea.vmem %s6980_s21, %s6344_s1 }
 0x193   : > { %s6993_s17 = sld [smem:[#allocation58_spill]]  ;;  %s1594_s7 = scalar_lea.vmem %s6981_s20, %s6344_s1 }
 0x194   : > { %6994 = sst [smem:[#allocation88_spill]] %s6362_s25  ;;  %s1597_s11 = scalar_lea.vmem %s6982_s24, %s6344_s1 }
 0x195   : > { %s1600_s27 = scalar_lea.vmem %s6983_s16, %s6344_s1  ;;  %s1603_s0 = scalar_lea.vmem %s6984_s10, %s6344_s1 }
 0x196   : > { %s1606_s9 = scalar_lea.vmem %s6985_s2, %s6344_s1  ;;  %s1609_s29 = scalar_lea.vmem %s6986_s3, %s6344_s1 }
 0x197   : > { %s1612_s12 = scalar_lea.vmem %s6987_s28, %s6344_s1  ;;  %s1615_s30 = scalar_lea.vmem %s6988_s22, %s6344_s1 }
 0x198   : > { %s1618_s26 = scalar_lea.vmem %s6989_s6, %s6344_s1  ;;  %s4655_s8 = sshll.u32 %s6344_s1, 6 }
 0x199   : > { %s6388_s14 = scalar_lea.vmem %s6991_s13, %s4655_s8  ;;  %s1626_s4 = scalar_lea.vmem %s6993_s17, %s6344_s1 }
 0x19a   : > { %s1558_s23 = scalar_lea.vmem [#allocation18], %s6286_s15  ;;  %s6995_s25 = sld [smem:[#allocation67_spill]] }
 0x1a0   : > { %p4581_p13 = scmp.ne.s32.totalorder %s6995_s25, 0 }
 0x1a1   : > { %s6996_s18 = scalar_lea.vmem (!%p4581_p13), [#allocation4], %s6286_s15 }
 0x1a2   : > { %1630 = sbr.rel (%p4581_p13) target bundleno = 425 (0x1a9), region = 192 }
 0x1a7   : > { %v1631_v0 = vld [vmem:[%s6996_s18] sm:$0xff]  ;;  %vm1632_vm0 = vcmask 261120  }
 0x1a8   : > { %1633 = vst.msk [vmem:[#allocation2] sm:$0xff] %vm1632_vm0, %v1631_v0 }
 0x1a9 PF: > { %s6997_s24 = sld [smem:[#allocation86_spill]]  ;;  %vm1635_vm1 = vcmask 261120   ;;  %v5685_v10 = vmov 0.0   ;;  %vm5686_vm2 = vmmov 0   ;;  %s5687_s3 = smov 120   ;;  %vm1920_vm5 = vcmask 64512  }
 0x1aa   : > { %s6998_s2 = sld [smem:[#allocation88_spill]]  ;;  %4752 = vmatprep.subr.mxu1 %v5685_v10  ;;  %4774 = vmatprep.subr.mxu0 %v5685_v10  ;;  %v4588_v45 = vld [vmem:[%s1588_s19] ss:$0 sm:$0xff]  ;;  %s5688_s8 = smov 112   ;;  %v1673_v53 = vld [vmem:[#allocation10] sm:$0xff]  ;;  %vm2257_vm7 = vcmask 130112  }
 0x1ab   : > { %4760 = vmatprep.mubr.msk.f32.mxu1 %vm5686_vm2, %v5685_v10  ;;  %s6999_s10 = sld [smem:[#allocation33_spill]]  ;;  %4782 = vmatprep.mubr.msk.f32.mxu0 %vm5686_vm2, %v5685_v10  ;;  %s5689_s19 = smov 104   ;;  %vm1998_vm6 = vcmp.gt.f32.partialorder %v1673_v53, 0.0  ;;  %vm2430_vm8 = vcmask 195712   ;;  %vm2603_vm9 = vcmask 261312   ;;  %vm3074_vm13 = vcmask 130048  }
 0x1ac   : > { %s7000_s22 = sld [smem:[#allocation34_spill]]  ;;  %vm3914_vm0 = vcmask 523264  }
 0x1ad   : > { %s7001_s21 = sld [smem:[#allocation87_spill]] }
 0x1ae   : > { %s7004_s17 = sld [smem:[#allocation36_spill]] }
 0x1af   : > { %v6396_v1 = vld [vmem:[#allocation2] sm:$0xff]  ;;  %v1677_v8 = vld [vmem:[%s6997_s24 + $0x18] sm:$0xff]  ;;  %v1676_v11 = vld [vmem:[%s6997_s24 + $0x10] sm:$0xff]  ;;  %s7005_s13 = sld [smem:[#allocation38_spill]] }
 0x1b0   : > { %v1636_v2 = vsel %vm1635_vm1, %v6396_v1, 0.0  ;;  %v1842_v9 = vld [vmem:[%s6998_s2 + $0x18] sm:$0xff]  ;;  %v1841_v12 = vld [vmem:[%s6998_s2 + $0x10] sm:$0xff]  ;;  %4753 = vmatpush3.msra.mxu1 %v1677_v8  ;;  %v1675_v13 = vld [vmem:[%s6997_s24 + $0x8] sm:$0xff]  ;;  %s7009_s18 = sld [smem:[#allocation80_spill]] }
 0x1b1   : > { %1637 = vadd.xlane.f32.xlu0 %v1636_v2  ;;  %4775 = vmatpush3.msra.mxu0 %v1842_v9  ;;  %v1840_v14 = vld [vmem:[%s6998_s2 + $0x8] sm:$0xff]  ;;  %v1674_v15 = vld [vmem:[%s6997_s24] sm:$0xff]  ;;  %s7002_s28 = scalar_lea.vmem %s6999_s10, %s6344_s1  ;;  %s5690_s24 = smov 8  }
 0x1b2   : > { %4754 = vmatprep.subr.mxu1 %v5685_v10  ;;  %4776 = vmatprep.subr.mxu0 %v5685_v10  ;;  %v1839_v16 = vld [vmem:[%s6998_s2] sm:$0xff]  ;;  %s7003_s6 = scalar_lea.vmem %s7000_s22, %s6344_s1  ;;  %s5691_s2 = smov 16  }
 0x1b3   : > { %4755 = vmatpush3.msra.mxu1 %v1676_v11  ;;  %4777 = vmatpush3.msra.mxu0 %v1841_v12  ;;  %v4582_v25 = vld [vmem:[%s7002_s28] ss:$0 sm:$0xff]  ;;  %v1761_v31 = vld [vmem:[%s7001_s21 + $0x18] sm:$0xff]  ;;  %v1760_v32 = vld [vmem:[%s7001_s21 + $0x10] sm:$0xff]  ;;  %s5692_s22 = smov 24   ;;  %s7012_s28 = sld [smem:[#allocation79_spill]] }
 0x1b4   : > { %4756 = vmatprep.subr.mxu1 %v5685_v10  ;;  %4778 = vmatprep.subr.mxu0 %v5685_v10  ;;  %v4583_v28 = vld [vmem:[%s7003_s6] ss:$0 sm:$0xff]  ;;  %v1759_v33 = vld [vmem:[%s7001_s21 + $0x8] sm:$0xff]  ;;  %s7007_s16 = scalar_lea.vmem %s7004_s17, %s6344_s1  ;;  %s7013_s6 = sld [smem:[#allocation81_spill]] }
 0x1b5   : > { %4757 = vmatpush3.msra.mxu1 %v1675_v13  ;;  %4779 = vmatpush3.msra.mxu0 %v1840_v14  ;;  %v1758_v34 = vld [vmem:[%s7001_s21] sm:$0xff]  ;;  %s7008_s25 = scalar_lea.vmem %s7005_s13, %s6344_s1  ;;  %s7011_s21 = sld [smem:[#allocation82_spill]] }
 0x1b6   : > { %4758 = vmatprep.subr.mxu1 %v5685_v10  ;;  %4780 = vmatprep.subr.mxu0 %v5685_v10  ;;  %v4584_v35 = vld [vmem:[%s7007_s16] ss:$0 sm:$0xff]  ;;  %v2609_v53 = vld [vmem:[%s7009_s18 + $0x18] sm:$0xff]  ;;  %s7018_s16 = sld [smem:[#allocation83_spill]] }
 0x1b7   : > { %4759 = vmatpush3.msra.mxu1 %v1674_v15  ;;  %4781 = vmatpush3.msra.mxu0 %v1839_v16  ;;  %v4586_v41 = vld [vmem:[%s7008_s25] ss:$0 sm:$0xff] }
 0x1b8   : > { %4763 = vmatprep.subr.mxu1 %v5685_v10  ;;  %4795 = vmatprep.subr.mxu0 %v5685_v10 }
 0x23a   : > { %v1638_v3 = vpop.xlane.xlu0 %1637 }
 0x23b   : > { %v1640_v4 = vmul.f32 0.03125, %v1638_v3 }
 0x23d   : > { %v1641_v5 = vsub.f32 %v6396_v1, %v1640_v4 }
 0x23f   : > { %v1642_v6 = vmul.f32 %v1641_v5, %v1641_v5  ;;  %v1663_v26 = vmul.f32 %v4582_v25, %v1641_v5 }
 0x241   : > { %v1643_v7 = vsel %vm1635_vm1, %v1642_v6, 0.0 }
 0x242   : > { %1644 = vadd.xlane.f32.xlu0 %v1643_v7 }
 0x2cb   : > { %v1645_v17 = vpop.xlane.xlu0 %1644 }
 0x2cc   : > { %v1646_v18 = vmul.f32 0.032258064, %v1645_v17 }
 0x2ce   : > { %5161 = vrsqrt.f32 %v1646_v18  ;;  %vm1649_vm3 = vcmp.eq.f32.partialorder %v1646_v18, inf  ;;  %v1652_v21 = vand.u32 2147483648, %v1646_v18  ;;  %vm1651_vm4 = vcmp.eq.f32.partialorder %v1646_v18, 0.0 }
 0x2db   : > { %v5162_v19 = vpop.eup %5161 }
 0x2dc   : > { %v1648_v20 = vmul.f32 %v5162_v19, %v1646_v18 }
 0x2de   : > { %v1650_v22 = vsel %vm1649_vm3, %v1646_v18, %v1648_v20 }
 0x2df   : > { %v1653_v23 = vsel %vm1651_vm4, %v1652_v21, %v1650_v22 }
 0x2e0   : > { %v1654_v24 = vadd.f32 1e-06, %v1653_v23 }
 0x2e2   : > { %5163 = vrcp.f32 %v1654_v24 }
 0x2ef   : > { %v5164_v27 = vpop.eup %5163 }
 0x2f0   : > { %v1664_v29 = vmul.f32 %v5164_v27, %v1663_v26 }
 0x2f2   : > { %v1672_v30 = vadd.f32 %v4583_v28, %v1664_v29 }
 0x2f4   : > { %4761 = vmatmul.mubr.msk.f32.vlgmr.msra.gmra.mxu1 %vm1635_vm1, %v1672_v30  ;;  %4783 = vmatmul.mubr.msk.f32.vlgmr.msra.gmra.mxu0 %vm1635_vm1, %v1672_v30 }
 0x2f5   : > { %4764 = vmatpush3.msra.mxu1 %v1761_v31  ;;  %4771 = vmatprep.mubr.msk.f32.mxu1 %vm5686_vm2, %v5685_v10 }
 0x2f6   : > { %4765 = vmatprep.subr.mxu1 %v5685_v10  ;;  %4797 = vmatprep.mubr.msk.f32.mxu0 %vm5686_vm2, %v5685_v10 }
 0x2f7   : > { %4766 = vmatpush3.msra.mxu1 %v1760_v32 }
 0x2f8   : > { %4767 = vmatprep.subr.mxu1 %v5685_v10 }
 0x2f9   : > { %4768 = vmatpush3.msra.mxu1 %v1759_v33 }
 0x2fa   : > { %4769 = vmatprep.subr.mxu1 %v5685_v10 }
 0x2fb   : > { %4770 = vmatpush3.msra.mxu1 %v1758_v34 }
 0x2fc   : > { %4772 = vmatmul.mubr.msk.f32.vlgmr.msra.gmra.mxu1 %vm1635_vm1, %v1672_v30  ;;  %4785 = vmatprep.subr.mxu1 %v5685_v10 }
 0x2fd   : > { %4787 = vmatprep.mubr.msk.f32.mxu1 %vm5686_vm2, %v5685_v10 }
 0x3b4   : > { %v1754_v36 = vpop.f32.mrf.mxu1  ;;  %v1916_v37 = vpop.f32.mrf.mxu0 }
 0x3b5   : > { %v1755_v38 = vadd.f32 %v4584_v35, %v1754_v36  ;;  %v6461_v46 = vadd.f32 %v4588_v45, %v1916_v37 }
 0x3b6   : > { %v4762_v39 = vpop.f32.mrf.mxu1  ;;  %v4784_v40 = vpop.f32.mrf.mxu0 }
 0x3b7   : > { %2085 = vrot.lane.b32.xlu1 %v1755_v38, %s5687_s3 }
 0x3bc   : > { %v1835_v42 = vpop.f32.mrf.mxu1 }
 0x3bd   : > { %v1836_v43 = vadd.f32 %v4586_v41, %v1835_v42 }
 0x3be   : > { %v4773_v44 = vpop.f32.mrf.mxu1 }
 0x3bf   : > { %2261 = vrot.lane.b32.xlu0 %v1836_v43, %s5688_s8  ;;  %2087 = vrot.lane.b32.xlu1 %v1836_v43, %s5687_s3 }
 0x3c0   : > { %4786 = vmatpush3.xpose.msk.msra.mxu1 %vm1920_vm5, %v1836_v43 }
 0x3c1   : > { %4790 = vmatprep.subr.mxu1 %v5685_v10 }
 0x3c3   : > { %4788 = vmatmul.mubr.msk.f32.vlgmr.msra.gmra.mxu1 %vm1920_vm5, %v1755_v38  ;;  %2259 = vrot.lane.b32.xlu1 %v1755_v38, %s5688_s8 }
 0x3c4   : > { %4791 = vmatpush3.msra.mxu1 %v6461_v46  ;;  %4792 = vmatprep.mubr.msk.f32.mxu1 %vm5686_vm2, %v5685_v10 }
 0x3c5   : > { %4800 = vmatprep.subr.mxu1 %v5685_v10 }
 0x3c7   : > { %2434 = vrot.lane.b32.xlu1 %v1836_v43, %s5689_s19 }
 0x3cb   : > { %2432 = vrot.lane.b32.xlu1 %v1755_v38, %s5689_s19 }
 0x429   : > { %v2086_v47 = vpop.permute.xlu1 %2085 }
 0x431   : > { %v2088_v48 = vpop.permute.xlu1 %2087  ;;  %v2262_v49 = vpop.permute.xlu0 %2261 }
 0x432   : > { %4796 = vmatpush3.xpose.msk.msra.mxu0 %vm1920_vm5, %v2088_v48 }
 0x433   : > { %4805 = vmatprep.subr.mxu0 %v5685_v10 }
 0x435   : > { %4798 = vmatmul.mubr.msk.f32.vlgmr.msra.gmra.mxu0 %vm1920_vm5, %v2086_v47  ;;  %v2260_v50 = vpop.permute.xlu1 %2259 }
 0x436   : > { %4806 = vmatpush3.xpose.msk.msra.mxu0 %vm1920_vm5, %v2262_v49  ;;  %4807 = vmatprep.mubr.msk.f32.mxu0 %vm5686_vm2, %v5685_v10 }
 0x437   : > { %4815 = vmatprep.subr.mxu0 %v5685_v10 }
 0x439   : > { %4808 = vmatmul.mubr.msk.f32.vlgmr.msra.gmra.mxu0 %vm1920_vm5, %v2260_v50  ;;  %v2435_v51 = vpop.permute.xlu1 %2434 }
 0x43a   : > { %4816 = vmatpush3.xpose.msk.msra.mxu0 %vm1920_vm5, %v2435_v51  ;;  %4817 = vmatprep.mubr.msk.f32.mxu0 %vm5686_vm2, %v5685_v10 }
 0x43b   : > { %4825 = vmatprep.subr.mxu0 %v5685_v10 }
 0x43d   : > { %v2433_v52 = vpop.permute.xlu1 %2432 }
 0x43e   : > { %4818 = vmatmul.mubr.msk.f32.vlgmr.msra.gmra.mxu0 %vm1920_vm5, %v2433_v52 }
 0x43f   : > { %4833 = vmatprep.mubr.msk.f32.mxu0 %vm5686_vm2, %v5685_v10  ;;  %4826 = vmatpush3.msra.mxu0 %v2609_v53 }
 0x440   : > { %4827 = vmatprep.subr.mxu0 %v5685_v10 }
 0x483   : > { %v1993_v54 = vpop.f32.mrf.mxu1 }
 0x484   : > { %v1997_v55 = vmul.f32 0.35355338, %v1993_v54  ;;  %v2608_v54 = vld [vmem:[%s7009_s18 + $0x10] sm:$0xff] }
 0x485   : > { %v4789_v56 = vpop.f32.mrf.mxu1  ;;  %4828 = vmatpush3.msra.mxu0 %v2608_v54 }
 0x486   : > { %v1999_v57 = vsel %vm1998_vm6, %v1997_v55, -1e+09  ;;  %v2607_v55 = vld [vmem:[%s7009_s18 + $0x8] sm:$0xff]  ;;  %4829 = vmatprep.subr.mxu0 %v5685_v10  ;;  %v2606_v56 = vld [vmem:[%s7009_s18] sm:$0xff] }
 0x487   : > { %v2000_v58 = vsel %vm1920_vm5, %v1999_v57, -inf  ;;  %4830 = vmatpush3.msra.mxu0 %v2607_v55 }
 0x488   : > { %2001 = vmax.xlane.f32.xlu1 %v2000_v58  ;;  %4831 = vmatprep.subr.mxu0 %v5685_v10 }
 0x489   : > { %4832 = vmatpush3.msra.mxu0 %v2606_v56 }
 0x4f5   : > { %v2159_v59 = vpop.f32.mrf.mxu0 }
 0x4f6   : > { %v2163_v60 = vmul.f32 0.35355338, %v2159_v59 }
 0x4f7   : > { %v4799_v61 = vpop.f32.mrf.mxu0 }
 0x4f8   : > { %v2164_v62 = vsel %vm1998_vm6, %v2163_v60, -1e+09 }
 0x4f9   : > { %v2333_v63 = vpop.f32.mrf.mxu0  ;;  %v2165_v0 = vsel %vm1920_vm5, %v2164_v62, -inf }
 0x4fa   : > { %v2337_v2 = vmul.f32 0.35355338, %v2333_v63  ;;  %2166 = vmax.xlane.f32.xlu0 %v2165_v0  ;;  %v4602_v63 = vld [vmem:[%s1591_s5] ss:$0 sm:$0xff] }
 0x4fb   : > { %v4809_v3 = vpop.f32.mrf.mxu0 }
 0x4fc   : > { %v2338_v4 = vsel %vm1998_vm6, %v2337_v2, -1e+09 }
 0x4fd   : > { %v2339_v5 = vsel %vm1920_vm5, %v2338_v4, -inf }
 0x4fe   : > { %v2506_v6 = vpop.f32.mrf.mxu0  ;;  %2340 = vmax.xlane.f32.xlu1 %v2339_v5 }
 0x4ff   : > { %v2510_v7 = vmul.f32 0.35355338, %v2506_v6 }
 0x500   : > { %v4819_v8 = vpop.f32.mrf.mxu0 }
 0x501   : > { %v2511_v9 = vsel %vm1998_vm6, %v2510_v7, -1e+09 }
 0x502   : > { %v2512_v11 = vsel %vm1920_vm5, %v2511_v9, -inf }
 0x503   : > { %2513 = vmax.xlane.f32.xlu1 %v2512_v11 }
 0x511   : > { %v2002_v12 = vpop.xlane.xlu1 %2001 }
 0x512   : > { %v2003_v13 = vsub.f32 %v1999_v57, %v2002_v12  ;;  %v2817_v12 = vld [vmem:[%s7011_s21 + $0x18] sm:$0xff] }
 0x513   : > { %4847 = vmatprep.subr.mxu0 %v2817_v12 }
 0x514   : > { %v2004_v14 = vmul.f32 1.442695, %v2003_v13  ;;  %v2815_v13 = vld [vmem:[%s7011_s21 + $0x8] sm:$0xff] }
 0x516   : > { %5165 = vpow2.f32 %v2004_v14  ;;  %v2727_v14 = vld [vmem:[%s7012_s28] sm:$0xff] }
 0x523   : > { %v5166_v15 = vpop.eup %5165 }
 0x524   : > { %v2006_v16 = vsel %vm1920_vm5, %v5166_v15, 0.0 }
 0x525   : > { %2007 = vadd.xlane.f32.xlu0 %v2006_v16  ;;  %v2732_v16 = vld [vmem:[%s7013_s6 + $0x10] sm:$0xff] }
 0x583   : > { %v2167_v17 = vpop.xlane.xlu0 %2166 }
 0x584   : > { %v2168_v18 = vsub.f32 %v2164_v62, %v2167_v17  ;;  %v2814_v17 = vld [vmem:[%s7011_s21] sm:$0xff] }
 0x586   : > { %v2169_v19 = vmul.f32 1.442695, %v2168_v18  ;;  %v2731_v18 = vld [vmem:[%s7013_s6 + $0x8] sm:$0xff] }
 0x587   : > { %v2341_v20 = vpop.xlane.xlu1 %2340 }
 0x588   : > { %5167 = vpow2.f32 %v2169_v19  ;;  %v2342_v21 = vsub.f32 %v2338_v4, %v2341_v20  ;;  %v2728_v19 = vld [vmem:[%s7012_s28 + $0x8] sm:$0xff]  ;;  %v2730_v20 = vld [vmem:[%s7013_s6] sm:$0xff] }
 0x58a   : > { %v2343_v22 = vmul.f32 1.442695, %v2342_v21 }
 0x58c   : > { %5169 = vpow2.f32 %v2343_v22  ;;  %v2514_v28 = vpop.xlane.xlu1 %2513 }
 0x58d   : > { %v2515_v29 = vsub.f32 %v2511_v9, %v2514_v28 }
 0x58f   : > { %v2516_v30 = vmul.f32 1.442695, %v2515_v29  ;;  %v4604_v29 = vld [vmem:[%s1594_s7] ss:$0 sm:$0xff]  ;;  %s7019_s7 = scalar_lea.vmem [#allocation9], %s6286_s15 }
 0x595   : > { %v5168_v23 = vpop.eup %5167 }
 0x596   : > { %v2171_v24 = vsel %vm1920_vm5, %v5168_v23, 0.0 }
 0x597   : > { %2172 = vadd.xlane.f32.xlu1 %v2171_v24 }
 0x599   : > { %v5170_v25 = vpop.eup %5169 }
 0x59a   : > { %v2345_v26 = vsel %vm1920_vm5, %v5170_v25, 0.0 }
 0x59b   : > { %2346 = vadd.xlane.f32.xlu0 %v2345_v26 }
 0x5a8   : > { %2350 = vrot.lane.b32.xlu1 %v6461_v46, %s5688_s8 }
 0x5ae   : > { %v2008_v27 = vpop.xlane.xlu0 %2007 }
 0x5af   : > { %5171 = vrcp.f32 %v2008_v27 }
 0x5b0   : > { %5173 = vpow2.f32 %v2516_v30 }
 0x5b1   : > { %2177 = vrot.lane.b32.xlu0 %v6461_v46, %s5687_s3 }
 0x5bc   : > { %v5172_v31 = vpop.eup %5171 }
 0x5bd   : > { %v2010_v32 = vmul.f32 %v5172_v31, %v5166_v15  ;;  %v5174_v33 = vpop.eup %5173  ;;  %v2733_v15 = vld [vmem:[%s7013_s6 + $0x18] sm:$0xff] }
 0x5be   : > { %v2518_v34 = vsel %vm1920_vm5, %v5174_v33, 0.0 }
 0x5bf   : > { %4793 = vmatmul.mubr.msk.f32.vlgmr.msra.gmra.mxu1 %vm1920_vm5, %v2010_v32  ;;  %v4605_v32 = vld [vmem:[%s1597_s11] ss:$0 sm:$0xff] }
 0x5c0   : > { %4802 = vmatprep.mubr.msk.f32.mxu1 %vm5686_vm2, %v5685_v10 }
 0x5cc   : > { %2519 = vadd.xlane.f32.xlu1 %v2518_v34 }
 0x5dd   : > { %2523 = vrot.lane.b32.xlu1 %v6461_v46, %s5689_s19 }
 0x620   : > { %v2173_v35 = vpop.xlane.xlu1 %2172 }
 0x621   : > { %5175 = vrcp.f32 %v2173_v35  ;;  %v4608_v35 = vld [vmem:[%s1603_s0] ss:$0 sm:$0xff]  ;;  %s7021_s0 = sld [smem:[#allocation84_spill]] }
 0x624   : > { %v2347_v36 = vpop.xlane.xlu0 %2346  ;;  %v2351_v40 = vpop.permute.xlu1 %2350 }
 0x625   : > { %5177 = vrcp.f32 %v2347_v36 }
 0x628   : > { %v2178_v37 = vpop.permute.xlu0 %2177 }
 0x629   : > { %4801 = vmatpush3.msra.mxu1 %v2178_v37 }
 0x62a   : > { %4810 = vmatprep.subr.mxu1 %v5685_v10 }
 0x62e   : > { %v5176_v38 = vpop.eup %5175 }
 0x62f   : > { %v2175_v39 = vmul.f32 %v5176_v38, %v5168_v23 }
 0x631   : > { %4803 = vmatmul.mubr.msk.f32.vlgmr.msra.gmra.mxu1 %vm1920_vm5, %v2175_v39 }
 0x632   : > { %v5178_v41 = vpop.eup %5177  ;;  %4811 = vmatpush3.msra.mxu1 %v2351_v40  ;;  %4812 = vmatprep.mubr.msk.f32.mxu1 %vm5686_vm2, %v5685_v10  ;;  %v4606_v40 = vld [vmem:[%s1600_s27] ss:$0 sm:$0xff] }
 0x633   : > { %v2349_v42 = vmul.f32 %v5178_v41, %v5170_v25  ;;  %4820 = vmatprep.subr.mxu1 %v5685_v10 }
 0x635   : > { %4813 = vmatmul.mubr.msk.f32.vlgmr.msra.gmra.mxu1 %vm1920_vm5, %v2349_v42 }
 0x636   : > { %4822 = vmatprep.mubr.msk.f32.mxu1 %vm5686_vm2, %v5685_v10 }
 0x655   : > { %v2520_v43 = vpop.xlane.xlu1 %2519 }
 0x656   : > { %5179 = vrcp.f32 %v2520_v43 }
 0x659   : > { %v2524_v44 = vpop.permute.xlu1 %2523 }
 0x65a   : > { %4821 = vmatpush3.msra.mxu1 %v2524_v44  ;;  %v2909_v44 = vld [vmem:[%s7018_s16 + $0x18] sm:$0xff] }
 0x65b   : > { %4836 = vmatprep.subr.mxu1 %v5685_v10 }
 0x663   : > { %v5180_v45 = vpop.eup %5179 }
 0x664   : > { %v2522_v46 = vmul.f32 %v5180_v45, %v5174_v33  ;;  %v2908_v45 = vld [vmem:[%s7018_s16 + $0x10] sm:$0xff] }
 0x666   : > { %4823 = vmatmul.mubr.msk.f32.vlgmr.msra.gmra.mxu1 %vm1920_vm5, %v2522_v46  ;;  %v2907_v46 = vld [vmem:[%s7018_s16 + $0x8] sm:$0xff] }
 0x667   : > { %4844 = vmatprep.mubr.msk.f32.mxu1 %vm5686_vm2, %v5685_v10  ;;  %4837 = vmatpush3.msra.mxu1 %v2733_v15 }
 0x668   : > { %4838 = vmatprep.subr.mxu1 %v5685_v10 }
 0x669   : > { %4839 = vmatpush3.msra.mxu1 %v2732_v16 }
 0x66a   : > { %4840 = vmatprep.subr.mxu1 %v5685_v10 }
 0x66b   : > { %4841 = vmatpush3.msra.mxu1 %v2731_v18 }
 0x66c   : > { %4842 = vmatprep.subr.mxu1 %v5685_v10 }
 0x66d   : > { %4843 = vmatpush3.msra.mxu1 %v2730_v20 }
 0x66e   : > { %4858 = vmatprep.subr.mxu1 %v2909_v44 }
 0x67f   : > { %v2080_v47 = vpop.f32.mrf.mxu1 }
 0x680   : > { %2084 = vst.msk [vmem:[#allocation3] sm:$0xff] %vm1920_vm5, %v2080_v47  ;;  %v2906_v47 = vld [vmem:[%s7018_s16] sm:$0xff] }
 0x681   : > { %v4794_v48 = vpop.f32.mrf.mxu1 }
 0x682   : > { %v6604_v48 = vld [vmem:[%s7019_s7] sm:$0xff] }
 0x683   : > { %vm3072_vm12 = vcmp.gt.f32.partialorder %v6604_v48, 0.0 }
 0x6f1   : > { %v2249_v49 = vpop.f32.mrf.mxu1 }
 0x6f2   : > { %2254 = vrot.lane.b32.xlu0 %v2249_v49, %s5690_s24 }
 0x6f3   : > { %v4804_v50 = vpop.f32.mrf.mxu1 }
 0x6f5   : > { %v2422_v51 = vpop.f32.mrf.mxu1 }
 0x6f6   : > { %2427 = vrot.lane.b32.xlu1 %v2422_v51, %s5691_s2 }
 0x6f7   : > { %v4814_v52 = vpop.f32.mrf.mxu1 }
 0x726   : > { %v2595_v57 = vpop.f32.mrf.mxu1 }
 0x727   : > { %2600 = vrot.lane.b32.xlu0 %v2595_v57, %s5692_s22 }
 0x728   : > { %v4824_v58 = vpop.f32.mrf.mxu1 }
 0x764   : > { %v2255_v59 = vpop.permute.xlu0 %2254 }
 0x765   : > { %2258 = vst.msk [vmem:[#allocation3] sm:$0xff] %vm2257_vm7, %v2255_v59 }
 0x768   : > { %v2428_v60 = vpop.permute.xlu1 %2427 }
 0x769   : > { %2431 = vst.msk [vmem:[#allocation3] sm:$0xff] %vm2430_vm8, %v2428_v60  ;;  %v4611_v60 = vld [vmem:[%s1606_s9] ss:$0 sm:$0xff]  ;;  %s7023_s9 = sld [smem:[#allocation85_spill]] }
 0x799   : > { %v2601_v61 = vpop.permute.xlu0 %2600 }
 0x79a   : > { %2604 = vst.msk [vmem:[#allocation3] sm:$0xff] %vm2603_vm9, %v2601_v61 }
 0x7a1   : > { %v2605_v62 = vld [vmem:[#allocation3] sm:$0xff] }
 0x7a2   : > { %4834 = vmatmul.mubr.msk.f32.vlgmr.msra.gmra.mxu0 %vm1635_vm1, %v2605_v62 }
 0x7a3   : > { %4848 = vmatpush3.msra.mxu0 %v2817_v12  ;;  %4855 = vmatprep.mubr.msk.f32.mxu0 %vm1635_vm1, %v2727_v14 }
 0x862   : > { %v2686_v0 = vpop.f32.mrf.mxu0 }
 0x863   : > { %v2687_v2 = vadd.f32 %v4602_v63, %v2686_v0 }
 0x864   : > { %v4835_v3 = vpop.f32.mrf.mxu0 }
 0x865   : > { %v6538_v4 = vadd.f32 %v2687_v2, %v6396_v1  ;;  %v2816_v1 = vld [vmem:[%s7011_s21 + $0x10] sm:$0xff] }
 0x866   : > { %4849 = vmatprep.subr.mxu0 %v2816_v1 }
 0x867   : > { %v2691_v5 = vsel %vm1635_vm1, %v6538_v4, 0.0  ;;  %4850 = vmatpush3.msra.mxu0 %v2816_v1 }
 0x868   : > { %2692 = vadd.xlane.f32.xlu1 %v2691_v5  ;;  %4851 = vmatprep.subr.mxu0 %v2815_v13 }
 0x869   : > { %4852 = vmatpush3.msra.mxu0 %v2815_v13 }
 0x86a   : > { %4853 = vmatprep.subr.mxu0 %v2814_v17 }
 0x86b   : > { %4854 = vmatpush3.msra.mxu0 %v2814_v17 }
 0x86c   : > { %4856 = vmatmul.mubr.msk.f32.vlgmr.msra.gmra.mxu0 %vm1635_vm1, %v2728_v19  ;;  %4869 = vmatprep.subr.mxu0 %v5685_v10 }
 0x86d   : > { %4873 = vmatprep.mubr.msk.f32.mxu0 %vm5686_vm2, %v5685_v10 }
 0x8f1   : > { %v2693_v6 = vpop.xlane.xlu1 %2692 }
 0x8f2   : > { %v2694_v7 = vmul.f32 0.03125, %v2693_v6 }
 0x8f4   : > { %v2695_v8 = vsub.f32 %v6538_v4, %v2694_v7 }
 0x8f6   : > { %v2696_v9 = vmul.f32 %v2695_v8, %v2695_v8  ;;  %v2717_v30 = vmul.f32 %v4604_v29, %v2695_v8 }
 0x8f8   : > { %v2697_v11 = vsel %vm1635_vm1, %v2696_v9, 0.0 }
 0x8f9   : > { %2698 = vadd.xlane.f32.xlu0 %v2697_v11 }
 0x92c   : > { %v4857_v36 = vpop.f32.mrf.mxu0 }
 0x92d   : > { %v6573_v37 = vadd.f32 %v4857_v36, %v4608_v35 }
 0x92e   : > { %v2897_v38 = vpop.f32.mrf.mxu0 }
 0x92f   : > { %4870 = vmatpush3.xpose.msk.msra.mxu0 %vm1920_vm5, %v6573_v37  ;;  %v6577_v39 = vadd.f32 %v4608_v35, %v2897_v38 }
 0x930   : > { %4871 = vmatprep.subr.mxu0 %v5685_v10 }
 0x931   : > { %3162 = vrot.lane.b32.xlu1 %v6577_v39, %s5687_s3 }
 0x933   : > { %4872 = vmatpush3.xpose.msk.msra.mxu0 %vm1920_vm5, %v6577_v39 }
 0x934   : > { %4890 = vmatprep.subr.mxu0 %v5685_v10 }
 0x982   : > { %v2699_v21 = vpop.xlane.xlu0 %2698 }
 0x983   : > { %v2700_v22 = vmul.f32 0.032258064, %v2699_v21 }
 0x985   : > { %5181 = vrsqrt.f32 %v2700_v22  ;;  %vm2703_vm10 = vcmp.eq.f32.partialorder %v2700_v22, inf  ;;  %v2706_v25 = vand.u32 2147483648, %v2700_v22  ;;  %vm2705_vm11 = vcmp.eq.f32.partialorder %v2700_v22, 0.0 }
 0x992   : > { %v5182_v23 = vpop.eup %5181 }
 0x993   : > { %v2702_v24 = vmul.f32 %v5182_v23, %v2700_v22 }
 0x995   : > { %v2704_v26 = vsel %vm2703_vm10, %v2700_v22, %v2702_v24 }
 0x996   : > { %v2707_v27 = vsel %vm2705_vm11, %v2706_v25, %v2704_v26 }
 0x997   : > { %v2708_v28 = vadd.f32 1e-06, %v2707_v27 }
 0x999   : > { %5183 = vrcp.f32 %v2708_v28 }
 0x9a3   : > { %v3163_v0 = vpop.permute.xlu1 %3162 }
 0x9a6   : > { %v5184_v31 = vpop.eup %5183 }
 0x9a7   : > { %v2718_v33 = vmul.f32 %v5184_v31, %v2717_v30 }
 0x9a9   : > { %v2726_v34 = vadd.f32 %v4605_v32, %v2718_v33 }
 0x9ab   : > { %4845 = vmatmul.mubr.msk.f32.vlgmr.msra.gmra.mxu1 %vm1635_vm1, %v2726_v34 }
 0x9ac   : > { %4866 = vmatprep.mubr.msk.f32.mxu1 %vm1635_vm1, %v2727_v14  ;;  %4859 = vmatpush3.msra.mxu1 %v2909_v44 }
 0x9ad   : > { %4860 = vmatprep.subr.mxu1 %v2908_v45 }
 0x9ae   : > { %4861 = vmatpush3.msra.mxu1 %v2908_v45 }
 0x9af   : > { %4862 = vmatprep.subr.mxu1 %v2907_v46 }
 0x9b0   : > { %4863 = vmatpush3.msra.mxu1 %v2907_v46 }
 0x9b1   : > { %4864 = vmatprep.subr.mxu1 %v2906_v47 }
 0x9b2   : > { %4865 = vmatpush3.msra.mxu1 %v2906_v47 }
 0x9b3   : > { %4867 = vmatmul.mubr.msk.f32.vlgmr.msra.gmra.mxu1 %vm1635_vm1, %v2728_v19  ;;  %4876 = vmatprep.subr.mxu1 %v5685_v10 }
 0x9b4   : > { %4880 = vmatprep.mubr.msk.f32.mxu1 %vm5686_vm2, %v5685_v10 }
 0xa6b   : > { %v2810_v41 = vpop.f32.mrf.mxu1 }
 0xa6c   : > { %v6588_v42 = vadd.f32 %v4606_v40, %v2810_v41 }
 0xa6d   : > { %v4846_v43 = vpop.f32.mrf.mxu1 }
 0xa6e   : > { %4874 = vmatmul.mubr.msk.f32.vlgmr.msra.gmra.mxu0 %vm1920_vm5, %v6588_v42 }
 0xa6f   : > { %4894 = vmatprep.mubr.msk.f32.mxu0 %vm5686_vm2, %v5685_v10 }
 0xa73   : > { %v4868_v59 = vpop.f32.mrf.mxu1 }
 0xa74   : > { %v6616_v61 = vadd.f32 %v4868_v59, %v4611_v60 }
 0xa75   : > { %v2983_v62 = vpop.f32.mrf.mxu1 }
 0xa76   : > { %v6618_v63 = vadd.f32 %v4611_v60, %v2983_v62  ;;  %4877 = vmatpush3.msra.mxu1 %v6616_v61 }
 0xa77   : > { %4878 = vmatprep.subr.mxu1 %v5685_v10 }
 0xa78   : > { %4879 = vmatpush3.msra.mxu1 %v6618_v63 }
 0xa79   : > { %4883 = vmatprep.subr.mxu1 %v5685_v10 }
 0xb2e   : > { %v3067_v49 = vpop.f32.mrf.mxu0 }
 0xb2f   : > { %v3071_v50 = vmul.f32 0.35355338, %v3067_v49 }
 0xb30   : > { %v4875_v51 = vpop.f32.mrf.mxu0 }
 0xb31   : > { %v3073_v52 = vsel %vm3072_vm12, %v3071_v50, -1e+09 }
 0xb32   : > { %v3075_v53 = vsel %vm3074_vm13, %v3073_v52, -inf }
 0xb33   : > { %3076 = vmax.xlane.f32.xlu0 %v3075_v53 }
 0xb49   : > { %3164 = vrot.lane.b32.xlu0 %v6573_v37, %s5687_s3 }
 0xbbc   : > { %v3077_v54 = vpop.xlane.xlu0 %3076 }
 0xbbd   : > { %v3078_v55 = vsub.f32 %v3073_v52, %v3077_v54 }
 0xbbf   : > { %v3079_v56 = vmul.f32 1.442695, %v3078_v55 }
 0xbc0   : > { %v3165_v6 = vpop.permute.xlu0 %3164 }
 0xbc1   : > { %5185 = vpow2.f32 %v3079_v56 }
 0xbce   : > { %v5186_v57 = vpop.eup %5185 }
 0xbcf   : > { %v3081_v58 = vsel %vm3074_vm13, %v5186_v57, 0.0 }
 0xbd0   : > { %3082 = vadd.xlane.f32.xlu1 %v3081_v58 }
 0xbe1   : > { %3160 = vrot.lane.b32.xlu1 %v6588_v42, %s5687_s3 }
 0xbe5   : > { %3257 = vrot.lane.b32.xlu1 %v6618_v63, %s5687_s3 }
 0xc59   : > { %v3083_v2 = vpop.xlane.xlu1 %3082 }
 0xc5a   : > { %5187 = vrcp.f32 %v3083_v2 }
 0xc5d   : > { %v3161_v7 = vpop.permute.xlu1 %3160 }
 0xc61   : > { %v3258_v19 = vpop.permute.xlu1 %3257 }
 0xc67   : > { %v5188_v3 = vpop.eup %5187 }
 0xc68   : > { %v3085_v5 = vmul.f32 %v5188_v3, %v5186_v57 }
 0xc6a   : > { %4881 = vmatmul.mubr.msk.f32.vlgmr.msra.gmra.mxu1 %vm3074_vm13, %v3085_v5 }
 0xc6b   : > { %4884 = vmatpush3.xpose.msk.msra.mxu1 %vm1920_vm5, %v3165_v6  ;;  %4887 = vmatprep.mubr.msk.f32.mxu1 %vm5686_vm2, %v5685_v10  ;;  %v3702_v6 = vld [vmem:[%s7021_s0 + $0x10] sm:$0xff] }
 0xc6c   : > { %4885 = vmatprep.subr.mxu1 %v5685_v10 }
 0xc6f   : > { %4886 = vmatpush3.xpose.msk.msra.mxu1 %vm1920_vm5, %v3163_v0 }
 0xc70   : > { %4904 = vmatprep.subr.mxu1 %v5685_v10 }
 0xc72   : > { %4888 = vmatmul.mubr.msk.f32.vlgmr.msra.gmra.mxu1 %vm1920_vm5, %v3161_v7  ;;  %v3701_v7 = vld [vmem:[%s7021_s0 + $0x8] sm:$0xff] }
 0xc73   : > { %4908 = vmatprep.mubr.msk.f32.mxu1 %vm5686_vm2, %v5685_v10 }
 0xd2a   : > { %v3155_v8 = vpop.f32.mrf.mxu1 }
 0xd2b   : > { %3159 = vst.msk [vmem:[#allocation3] sm:$0xff] %vm1920_vm5, %v3155_v8  ;;  %v3700_v8 = vld [vmem:[%s7021_s0] sm:$0xff] }
 0xd2c   : > { %v4882_v9 = vpop.f32.mrf.mxu1 }
 0xd32   : > { %v3238_v11 = vpop.f32.mrf.mxu1 }
 0xd33   : > { %v3242_v12 = vmul.f32 0.35355338, %v3238_v11 }
 0xd34   : > { %v4889_v1 = vpop.f32.mrf.mxu1 }
 0xd35   : > { %v3243_v13 = vsel %vm3072_vm12, %v3242_v12, -1e+09 }
 0xd36   : > { %v3244_v14 = vsel %vm3074_vm13, %v3243_v13, -inf }
 0xd37   : > { %3245 = vmax.xlane.f32.xlu0 %v3244_v14 }
 0xd4d   : > { %3259 = vrot.lane.b32.xlu0 %v6616_v61, %s5687_s3 }
 0xd51   : > { %3345 = vrot.lane.b32.xlu0 %v6573_v37, %s5688_s8 }
 0xd55   : > { %3341 = vrot.lane.b32.xlu0 %v6588_v42, %s5688_s8 }
 0xdc0   : > { %v3246_v15 = vpop.xlane.xlu0 %3245 }
 0xdc1   : > { %v3247_v16 = vsub.f32 %v3243_v13, %v3246_v15  ;;  %v4630_v13 = vld [vmem:[%s1609_s29] ss:$0 sm:$0xff] }
 0xdc3   : > { %v3248_v17 = vmul.f32 1.442695, %v3247_v16 }
 0xdc4   : > { %v3260_v18 = vpop.permute.xlu0 %3259 }
 0xdc5   : > { %5189 = vpow2.f32 %v3248_v17  ;;  %4891 = vmatpush3.msra.mxu0 %v3260_v18 }
 0xdc6   : > { %4892 = vmatprep.subr.mxu0 %v5685_v10 }
 0xdc7   : > { %4893 = vmatpush3.msra.mxu0 %v3258_v19 }
 0xdc8   : > { %4897 = vmatprep.subr.mxu0 %v5685_v10  ;;  %v3346_v25 = vpop.permute.xlu0 %3345 }
 0xdcc   : > { %v3342_v27 = vpop.permute.xlu0 %3341 }
 0xdd2   : > { %v5190_v20 = vpop.eup %5189 }
 0xdd3   : > { %v3250_v21 = vsel %vm3074_vm13, %v5190_v20, 0.0 }
 0xdd4   : > { %3251 = vadd.xlane.f32.xlu1 %v3250_v21 }
 0xde5   : > { %3343 = vrot.lane.b32.xlu1 %v6577_v39, %s5688_s8 }
 0xe5d   : > { %v3252_v22 = vpop.xlane.xlu1 %3251 }
 0xe5e   : > { %5191 = vrcp.f32 %v3252_v22 }
 0xe61   : > { %v3344_v26 = vpop.permute.xlu1 %3343 }
 0xe6b   : > { %v5192_v23 = vpop.eup %5191 }
 0xe6c   : > { %v3254_v24 = vmul.f32 %v5192_v23, %v5190_v20 }
 0xe6e   : > { %4895 = vmatmul.mubr.msk.f32.vlgmr.msra.gmra.mxu0 %vm3074_vm13, %v3254_v24  ;;  %v3824_v24 = vld [vmem:[%s7023_s9 + $0x18] sm:$0xff] }
 0xe6f   : > { %4898 = vmatpush3.xpose.msk.msra.mxu0 %vm1920_vm5, %v3346_v25  ;;  %4901 = vmatprep.mubr.msk.f32.mxu0 %vm5686_vm2, %v5685_v10  ;;  %v3823_v25 = vld [vmem:[%s7023_s9 + $0x10] sm:$0xff] }
 0xe70   : > { %4899 = vmatprep.subr.mxu0 %v5685_v10 }
 0xe73   : > { %4900 = vmatpush3.xpose.msk.msra.mxu0 %vm1920_vm5, %v3344_v26  ;;  %v3821_v26 = vld [vmem:[%s7023_s9] sm:$0xff] }
 0xe74   : > { %4918 = vmatprep.subr.mxu0 %v5685_v10 }
 0xe76   : > { %4902 = vmatmul.mubr.msk.f32.vlgmr.msra.gmra.mxu0 %vm1920_vm5, %v3342_v27  ;;  %v3913_v27 = vld [vmem:[%s6388_s14 + $0x38] sm:$0xff] }
 0xe77   : > { %4922 = vmatprep.mubr.msk.f32.mxu0 %vm5686_vm2, %v5685_v10 }
 0xf2e   : > { %v3332_v28 = vpop.f32.mrf.mxu0 }
 0xf30   : > { %v4896_v29 = vpop.f32.mrf.mxu0 }
 0xf31   : > { %v3911_v29 = vld [vmem:[%s6388_s14 + $0x28] sm:$0xff] }
 0xf36   : > { %v3419_v30 = vpop.f32.mrf.mxu0 }
 0xf37   : > { %v3423_v31 = vmul.f32 0.35355338, %v3419_v30  ;;  %v3910_v30 = vld [vmem:[%s6388_s14 + $0x20] sm:$0xff] }
 0xf38   : > { %v4903_v32 = vpop.f32.mrf.mxu0 }
 0xf39   : > { %v3424_v33 = vsel %vm3072_vm12, %v3423_v31, -1e+09  ;;  %v3909_v31 = vld [vmem:[%s6388_s14 + $0x18] sm:$0xff] }
 0xf3a   : > { %v3425_v34 = vsel %vm3074_vm13, %v3424_v33, -inf }
 0xf3b   : > { %3426 = vmax.xlane.f32.xlu1 %v3425_v34 }
 0xf4c   : > { %3436 = vrot.lane.b32.xlu1 %v6618_v63, %s5688_s8 }
 0xf50   : > { %3524 = vrot.lane.b32.xlu1 %v6573_v37, %s5689_s19 }
 0xf54   : > { %3520 = vrot.lane.b32.xlu1 %v6588_v42, %s5689_s19 }
 0xfc4   : > { %v3427_v35 = vpop.xlane.xlu1 %3426 }
 0xfc5   : > { %v3428_v36 = vsub.f32 %v3424_v33, %v3427_v35 }
 0xfc7   : > { %v3429_v38 = vmul.f32 1.442695, %v3428_v36 }
 0xfc8   : > { %v3437_v44 = vpop.permute.xlu1 %3436 }
 0xfc9   : > { %5193 = vpow2.f32 %v3429_v38 }
 0xfcc   : > { %v3525_v46 = vpop.permute.xlu1 %3524 }
 0xfd0   : > { %v3521_v47 = vpop.permute.xlu1 %3520 }
 0xfd6   : > { %v5194_v40 = vpop.eup %5193 }
 0xfd7   : > { %v3431_v41 = vsel %vm3074_vm13, %v5194_v40, 0.0 }
 0xfd8   : > { %3432 = vadd.xlane.f32.xlu0 %v3431_v41 }
 0xfee   : > { %3438 = vrot.lane.b32.xlu0 %v6616_v61, %s5688_s8 }
 0xff2   : > { %3522 = vrot.lane.b32.xlu0 %v6577_v39, %s5689_s19 }
0x1061   : > { %v3433_v43 = vpop.xlane.xlu0 %3432 }
0x1062   : > { %5195 = vrcp.f32 %v3433_v43  ;;  %v4632_v43 = vld [vmem:[%s1612_s12] ss:$0 sm:$0xff]  ;;  %s7028_s12 = sld [smem:[#allocation67_spill]] }
0x1065   : > { %v3439_v37 = vpop.permute.xlu0 %3438 }
0x1066   : > { %4905 = vmatpush3.msra.mxu1 %v3439_v37 }
0x1067   : > { %4906 = vmatprep.subr.mxu1 %v5685_v10 }
0x1068   : > { %4907 = vmatpush3.msra.mxu1 %v3437_v44  ;;  %p4638_p9 = scmp.ne.s32.totalorder %s7028_s12, 1 }
0x1069   : > { %4911 = vmatprep.subr.mxu1 %v5685_v10  ;;  %v3523_v39 = vpop.permute.xlu0 %3522  ;;  %s7030_s1 = sld [smem:[#allocation60_spill]] (!%p4638_p9) }
0x106f   : > { %v5196_v42 = vpop.eup %5195 }
0x1070   : > { %v3435_v45 = vmul.f32 %v5196_v42, %v5194_v40  ;;  %v4633_v42 = vld [vmem:[%s1615_s30] ss:$0 sm:$0xff] }
0x1072   : > { %4909 = vmatmul.mubr.msk.f32.vlgmr.msra.gmra.mxu1 %vm3074_vm13, %v3435_v45 }
0x1073   : > { %4912 = vmatpush3.xpose.msk.msra.mxu1 %vm1920_vm5, %v3525_v46  ;;  %4915 = vmatprep.mubr.msk.f32.mxu1 %vm5686_vm2, %v5685_v10 }
0x1074   : > { %4913 = vmatprep.subr.mxu1 %v5685_v10 }
0x1077   : > { %4914 = vmatpush3.xpose.msk.msra.mxu1 %vm1920_vm5, %v3523_v39  ;;  %v3908_v39 = vld [vmem:[%s6388_s14 + $0x10] sm:$0xff] }
0x1078   : > { %4936 = vmatprep.subr.mxu1 %v5685_v10 }
0x107a   : > { %4916 = vmatmul.mubr.msk.f32.vlgmr.msra.gmra.mxu1 %vm1920_vm5, %v3521_v47  ;;  %v3907_v47 = vld [vmem:[%s6388_s14 + $0x8] sm:$0xff] }
0x107b   : > { %4944 = vmatprep.mubr.msk.f32.mxu1 %vm5686_vm2, %v5685_v10  ;;  %4937 = vmatpush3.msra.mxu1 %v3824_v24 }
0x107c   : > { %4938 = vmatprep.subr.mxu1 %v5685_v10 }
0x107d   : > { %4939 = vmatpush3.msra.mxu1 %v3823_v25 }
0x107e   : > { %4940 = vmatprep.subr.mxu1 %v5685_v10 }
0x1132   : > { %v3511_v49 = vpop.f32.mrf.mxu1 }
0x1134   : > { %v4910_v50 = vpop.f32.mrf.mxu1 }
0x1135   : > { %v4634_v50 = vld [vmem:[%s1618_s26] ss:$0 sm:$0xff] }
0x113a   : > { %v3598_v51 = vpop.f32.mrf.mxu1 }
0x113b   : > { %v3602_v52 = vmul.f32 0.35355338, %v3598_v51 }
0x113c   : > { %v4917_v53 = vpop.f32.mrf.mxu1 }
0x113d   : > { %v3603_v54 = vsel %vm3072_vm12, %v3602_v52, -1e+09 }
0x113e   : > { %v3604_v55 = vsel %vm3074_vm13, %v3603_v54, -inf }
0x113f   : > { %3605 = vmax.xlane.f32.xlu0 %v3604_v55 }
0x1155   : > { %3617 = vrot.lane.b32.xlu0 %v6616_v61, %s5689_s19 }
0x1159   : > { %3337 = vrot.lane.b32.xlu0 %v3332_v28, %s5690_s24  ;;  %v3912_v28 = vld [vmem:[%s6388_s14 + $0x30] sm:$0xff] }
0x11c8   : > { %v3606_v56 = vpop.xlane.xlu0 %3605 }
0x11c9   : > { %v3607_v57 = vsub.f32 %v3603_v54, %v3606_v56  ;;  %v4637_v56 = vld [vmem:[%s1626_s4] ss:$0 sm:$0xff] }
0x11cb   : > { %v3608_v58 = vmul.f32 1.442695, %v3607_v57 }
0x11cc   : > { %v3618_v59 = vpop.permute.xlu0 %3617 }
0x11cd   : > { %5197 = vpow2.f32 %v3608_v58  ;;  %4919 = vmatpush3.msra.mxu0 %v3618_v59 }
0x11ce   : > { %4920 = vmatprep.subr.mxu0 %v5685_v10 }
0x11d0   : > { %v3338_v60 = vpop.permute.xlu0 %3337 }
0x11d1   : > { %3340 = vst.msk [vmem:[#allocation3] sm:$0xff] %vm2257_vm7, %v3338_v60 }
0x11da   : > { %v5198_v48 = vpop.eup %5197 }
0x11db   : > { %v3610_v62 = vsel %vm3074_vm13, %v5198_v48, 0.0 }
0x11dc   : > { %3611 = vadd.xlane.f32.xlu1 %v3610_v62 }
0x11ed   : > { %3615 = vrot.lane.b32.xlu1 %v6618_v63, %s5689_s19  ;;  %v3703_v63 = vld [vmem:[%s7021_s0 + $0x18] sm:$0xff] }
0x11f1   : > { %3516 = vrot.lane.b32.xlu1 %v3511_v49, %s5691_s2  ;;  %v3906_v49 = vld [vmem:[%s6388_s14] sm:$0xff]  ;;  %s7029_s14 = sld [smem:[#allocation59_spill]] (!%p4638_p9) }
0x1265   : > { %v3612_v61 = vpop.xlane.xlu1 %3611 }
0x1266   : > { %5199 = vrcp.f32 %v3612_v61 }
0x1269   : > { %v3616_v0 = vpop.permute.xlu1 %3615 }
0x126a   : > { %4921 = vmatpush3.msra.mxu0 %v3616_v0 }
0x126b   : > { %4925 = vmatprep.subr.mxu0 %v5685_v10 }
0x126d   : > { %v3517_v2 = vpop.permute.xlu1 %3516 }
0x126e   : > { %3519 = vst.msk [vmem:[#allocation3] sm:$0xff] %vm2430_vm8, %v3517_v2 }
0x1273   : > { %v5200_v3 = vpop.eup %5199 }
0x1274   : > { %v3614_v5 = vmul.f32 %v5200_v3, %v5198_v48 }
0x1276   : > { %4923 = vmatmul.mubr.msk.f32.vlgmr.msra.gmra.mxu0 %vm3074_vm13, %v3614_v5 }
0x1277   : > { %4933 = vmatprep.mubr.msk.f32.mxu0 %vm5686_vm2, %v5685_v10  ;;  %4926 = vmatpush3.msra.mxu0 %v3703_v63 }
0x1278   : > { %4927 = vmatprep.subr.mxu0 %v5685_v10 }
0x1279   : > { %4928 = vmatpush3.msra.mxu0 %v3702_v6 }
0x127a   : > { %4929 = vmatprep.subr.mxu0 %v5685_v10 }
0x127b   : > { %4930 = vmatpush3.msra.mxu0 %v3701_v7 }
0x127c   : > { %4931 = vmatprep.subr.mxu0 %v5685_v10 }
0x127d   : > { %4932 = vmatpush3.msra.mxu0 %v3700_v8 }
0x127e   : > { %4947 = vmatprep.subr.mxu0 %v5685_v10 }
0x1336   : > { %v3690_v9 = vpop.f32.mrf.mxu0 }
0x1337   : > { %3695 = vrot.lane.b32.xlu0 %v3690_v9, %s5692_s22 }
0x1338   : > { %v4924_v11 = vpop.f32.mrf.mxu0 }
0x13a9   : > { %v3696_v12 = vpop.permute.xlu0 %3695 }
0x13aa   : > { %3698 = vst.msk [vmem:[#allocation3] sm:$0xff] %vm2603_vm9, %v3696_v12 }
0x13b1   : > { %v3699_v1 = vld [vmem:[#allocation3] sm:$0xff] }
0x13b2   : > { %4934 = vmatmul.mubr.msk.f32.vlgmr.msra.gmra.mxu0 %vm1635_vm1, %v3699_v1 }
0x13b3   : > { %4963 = vmatprep.mubr.msk.f32.mxu0 %vm5686_vm2, %v5685_v10  ;;  %4948 = vmatpush3.msra.mxu0 %v3913_v27 }
0x13b4   : > { %4949 = vmatprep.subr.mxu0 %v5685_v10 }
0x13b5   : > { %4950 = vmatpush3.msra.mxu0 %v3912_v28 }
0x13b6   : > { %4951 = vmatprep.subr.mxu0 %v5685_v10 }
0x13b7   : > { %4952 = vmatpush3.msra.mxu0 %v3911_v29 }
0x13b8   : > { %4953 = vmatprep.subr.mxu0 %v5685_v10 }
0x13b9   : > { %4954 = vmatpush3.msra.mxu0 %v3910_v30 }
0x13ba   : > { %4955 = vmatprep.subr.mxu0 %v5685_v10 }
0x13bb   : > { %4956 = vmatpush3.msra.mxu0 %v3909_v31 }
0x13bc   : > { %4957 = vmatprep.subr.mxu0 %v5685_v10 }
0x13bd   : > { %4958 = vmatpush3.msra.mxu0 %v3908_v39 }
0x13be   : > { %4959 = vmatprep.subr.mxu0 %v5685_v10 }
0x13bf   : > { %4960 = vmatpush3.msra.mxu0 %v3907_v47 }
0x13c0   : > { %4961 = vmatprep.subr.mxu0 %v5685_v10 }
0x13c1   : > { %4962 = vmatpush3.msra.mxu0 %v3906_v49 }
0x1472   : > { %v3780_v14 = vpop.f32.mrf.mxu0 }
0x1473   : > { %v3781_v15 = vadd.f32 %v4630_v13, %v3780_v14 }
0x1474   : > { %v4935_v16 = vpop.f32.mrf.mxu0 }
0x1475   : > { %v6723_v17 = vadd.f32 %v3781_v15, %v6538_v4  ;;  %v3822_v4 = vld [vmem:[%s7023_s9 + $0x8] sm:$0xff] }
0x1476   : > { %4941 = vmatpush3.msra.mxu1 %v3822_v4 }
0x1477   : > { %v3785_v18 = vsel %vm1635_vm1, %v6723_v17, 0.0  ;;  %4942 = vmatprep.subr.mxu1 %v5685_v10 }
0x1478   : > { %3786 = vadd.xlane.f32.xlu1 %v3785_v18  ;;  %4943 = vmatpush3.msra.mxu1 %v3821_v26 }
0x1501   : > { %v3787_v19 = vpop.xlane.xlu1 %3786 }
0x1502   : > { %v3788_v20 = vmul.f32 0.03125, %v3787_v19 }
0x1504   : > { %v3789_v21 = vsub.f32 %v6723_v17, %v3788_v20 }
0x1506   : > { %v3790_v22 = vmul.f32 %v3789_v21, %v3789_v21  ;;  %v3811_v37 = vmul.f32 %v4632_v43, %v3789_v21 }
0x1508   : > { %v3791_v23 = vsel %vm1635_vm1, %v3790_v22, 0.0 }
0x1509   : > { %3792 = vadd.xlane.f32.xlu0 %v3791_v23 }
0x1592   : > { %v3793_v32 = vpop.xlane.xlu0 %3792 }
0x1593   : > { %v3794_v33 = vmul.f32 0.032258064, %v3793_v32 }
0x1595   : > { %5201 = vrsqrt.f32 %v3794_v33  ;;  %vm3797_vm14 = vcmp.eq.f32.partialorder %v3794_v33, inf  ;;  %v3800_v36 = vand.u32 2147483648, %v3794_v33  ;;  %vm3799_vm15 = vcmp.eq.f32.partialorder %v3794_v33, 0.0 }
0x15a2   : > { %v5202_v34 = vpop.eup %5201 }
0x15a3   : > { %v3796_v35 = vmul.f32 %v5202_v34, %v3794_v33 }
0x15a5   : > { %v3798_v38 = vsel %vm3797_vm14, %v3794_v33, %v3796_v35 }
0x15a6   : > { %v3801_v40 = vsel %vm3799_vm15, %v3800_v36, %v3798_v38 }
0x15a7   : > { %v3802_v41 = vadd.f32 1e-06, %v3801_v40 }
0x15a9   : > { %5203 = vrcp.f32 %v3802_v41 }
0x15b6   : > { %v5204_v44 = vpop.eup %5203 }
0x15b7   : > { %v3812_v45 = vmul.f32 %v5204_v44, %v3811_v37 }
0x15b9   : > { %v3820_v46 = vadd.f32 %v4633_v42, %v3812_v45 }
0x15bb   : > { %4945 = vmatmul.mubr.msk.f32.vlgmr.msra.gmra.mxu1 %vm1635_vm1, %v3820_v46 }
0x167b   : > { %v3901_v51 = vpop.f32.mrf.mxu1 }
0x167c   : > { %v3902_v52 = vadd.f32 %v4634_v50, %v3901_v51 }
0x167d   : > { %v4946_v53 = vpop.f32.mrf.mxu1 }
0x167e   : > { %v3905_v54 = vmax.f32 %v3902_v52, 0.0 }
0x1680   : > { %4964 = vmatmul.mubr.msk.f32.vlgmr.msra.gmra.mxu0 %vm3914_vm0, %v3905_v54 }
0x1740   : > { %v3984_v55 = vpop.f32.mrf.mxu0 }
0x1741   : > { %v3988_v57 = vadd.f32 %v3984_v55, %v6723_v17  ;;  %4001 = sbr.rel (%p4638_p9) target bundleno = 6283 (0x188b), region = 196 }
0x1742   : > { %v4965_v58 = vpop.f32.mrf.mxu0 }
0x1743   : > { %v3996_v59 = vadd.f32 %v4637_v56, %v3988_v57 }
0x1745   : > { %3997 = vst.msk [vmem:[#allocation2] sm:$0xff] %vm1635_vm1, %v3996_v59 }
0x1746   : > { %v4002_v10 = vsel %vm1635_vm1, %v3996_v59, 0.0  ;;  %v4639_v11 = vld [vmem:[%s7029_s14] ss:$0 sm:$0xff] }
0x1747   : > { %4003 = vadd.xlane.f32.xlu0 %v4002_v10  ;;  %v4640_v13 = vld [vmem:[%s7030_s1] ss:$0 sm:$0xff] }
0x17d0   : > { %v4004_v60 = vpop.xlane.xlu0 %4003 }
0x17d1   : > { %v4005_v48 = vmul.f32 0.03125, %v4004_v60 }
0x17d3   : > { %v4006_v62 = vsub.f32 %v3996_v59, %v4005_v48 }
0x17d5   : > { %v4007_v61 = vmul.f32 %v4006_v62, %v4006_v62  ;;  %v4028_v12 = vmul.f32 %v4639_v11, %v4006_v62 }
0x17d7   : > { %v4008_v0 = vsel %vm1635_vm1, %v4007_v61, 0.0 }
0x17d8   : > { %4009 = vadd.xlane.f32.xlu0 %v4008_v0 }
0x1861   : > { %v4010_v2 = vpop.xlane.xlu0 %4009 }
0x1862   : > { %v4011_v3 = vmul.f32 0.032258064, %v4010_v2 }
0x1864   : > { %5205 = vrsqrt.f32 %v4011_v3  ;;  %vm4014_vm2 = vcmp.eq.f32.partialorder %v4011_v3, inf  ;;  %v4017_v6 = vand.u32 2147483648, %v4011_v3  ;;  %vm4016_vm3 = vcmp.eq.f32.partialorder %v4011_v3, 0.0 }
0x1871   : > { %v5206_v5 = vpop.eup %5205 }
0x1872   : > { %v4013_v63 = vmul.f32 %v5206_v5, %v4011_v3 }
0x1874   : > { %v4015_v7 = vsel %vm4014_vm2, %v4011_v3, %v4013_v63 }
0x1875   : > { %v4018_v8 = vsel %vm4016_vm3, %v4017_v6, %v4015_v7 }
0x1876   : > { %v4019_v9 = vadd.f32 1e-06, %v4018_v8 }
0x1878   : > { %5207 = vrcp.f32 %v4019_v9 }
0x1885   : > { %v5208_v1 = vpop.eup %5207 }
0x1886   : > { %v4029_v14 = vmul.f32 %v5208_v1, %v4028_v12 }
0x1888   : > { %v4037_v15 = vadd.f32 %v4640_v13, %v4029_v14 }
0x188a   : > { %4038 = vst.msk [vmem:[%s1558_s23] sm:$0xff] %vm1635_vm1, %v4037_v15 }
0x188b PF: > { %s7031_s26 = sld [smem:[#allocation68_spill]]  ;;  %s4053_s2 = sshll.u32 %s1558_s23, 4  ;;  %s4054_s2 = int_to_ptr.vmem [resolvable:$true] %s4053_s2 }
0x188c   : > { %s7032_s30 = sld [smem:[#allocation61_spill]]  ;;  %s5487_s22 = scalar_lea.vmem %s4054_s2, 128 }
0x188d   : > { %s7033_s4 = sld [smem:[#allocation78_spill]]  ;;  %p5488_p8 = scmp.ne.s32.totalorder %s4054_s2, %s5487_s22 }
0x188e   : > { %s7034_s19 = sld [smem:[#allocation76_spill]]  ;;  %s5693_s21 = smov [#allocation18]  }
0x188f   : > { %s5491_s28 = sshll.u32 %s5693_s21, 4  ;;  %s5492_s28 = int_to_ptr.vmem [resolvable:$false] %s5491_s28 }
0x1890   : > { %s5493_s6 = scalar_lea.vmem %s5492_s28, 256  ;;  %p5494_p0 = scmp.lt.s32.totalorder %s4054_s2, %s5492_s28 }
0x1891   : > { %s4642_s18 = sshll.u32 %s7031_s26, 7  ;;  %p5495_p3 = scmp.lt.s32.totalorder %s5493_s6, %s5487_s22 }
0x1892   : > { %s4051_s24 = scalar_lea.hbm %s7032_s30, %s4642_s18 }
0x1893   : > { %s4040_s10 = scalar_lea.sflag [#allocation6], %s7033_s4  ;;  %p5496_p4 = por %p5495_p3, %p5494_p0 }
0x1894   : > { %p7035_p1 = scmp.ne.s32.totalorder %s7034_s19, 0 }
0x1896   : > { %p5489_p2 = pnand %p5488_p8, %p7035_p1 }
0x1898   : > { %p5490_p7 = pneg %p5489_p2 }
0x189a   : > { %p5497_p5 = pnand %p5496_p4, %p5490_p7 }
0x189c   : > { %5500 = shalt.err (!%p5497_p5)
}
0x189d   : > { %s5501_s5 = scalar_lea.hbm %s4051_s24, 128  ;;  %s5505_s15 = scalar_lea.hbm %s7032_s30, 256 }
0x189e   : > { %p5502_p12 = scmp.ne.s32.totalorder %s4051_s24, %s5501_s5  ;;  %p5506_p6 = scmp.lt.s32.totalorder %s4051_s24, %s7032_s30 }
0x189f   : > { %p5507_p13 = scmp.lt.s32.totalorder %s5505_s15, %s5501_s5 }
0x18a0   : > { %p5503_p11 = pnand %p5502_p12, %p7035_p1 }
0x18a1   : > { %p5508_p9 = por %p5507_p13, %p5506_p6 }
0x18a2   : > { %p5504_p10 = pneg %p5503_p11 }
0x18a4   : > { %p5509_p8 = pnand %p5508_p9, %p5504_p10 }
0x18a6   : > { %5512 = shalt.err (!%p5509_p8)
}
0x18a7   : > { %4988 = dma.vmem_to_hbm [thread:$0]  (%p7035_p1), %s4054_s2, 128, %s4051_s24, %s4040_s10  }
0x18a8 PF: > { %s7036_s23 = sld [smem:[#allocation71_spill]] }
0x18a9   : > { %s7037_s17 = sld [smem:[#allocation64_spill]] }
0x18aa   : > { %s7038_s13 = sld [smem:[#allocation77_spill]] }
0x18ae   : > { %p5029_p2 = scmp.ge.s32.totalorder %s7036_s23, 2 }
0x18af   : > { %s4065_s20 = sand.u32 1, %s7037_s17  }
0x18b0   : > { %p7039_p7 = scmp.ne.s32.totalorder %s7038_s13, 0  ;;  %s4066_s16 = scalar_lea.sflag [#allocation6], %s4065_s20 }
0x18b2   : > { %p5023_p0 = pnand %p5029_p2, %p7039_p7 }
0x18b4   : > { %p5024_p3 = pneg %p5023_p0 }
0x18b6   : > { %5594 = dma.done.wait (%p5024_p3), %s4066_s16, 128  }
0x18b7   : > { %5596 = vsyncadd (%p5024_p3), %s4066_s16, 4294967168  ;;  %s85_s22 = sadd.s32 1, %s7036_s23   ;;  %s7040_s28 = sld [smem:[#allocation62_spill]] }
0x18b8   : > { %p82_p4 = scmp.ge.s32.totalorder %s85_s22, 6   ;;  %s7041_s1 = sld [smem:[#allocation63_spill]] }
0x18b9   : > { %s7042_s2 = sld [smem:[#allocation74_spill]] }
0x18ba   : > { %s7043_s7 = sld [smem:[#allocation65_spill]] }
0x18bb   : > { %s7044_s10 = sld [smem:[#allocation66_spill]] }
0x18bc   : > { %s7045_s11 = sld [smem:[#allocation75_spill]]  ;;  %84 = sbr.rel (!%p82_p4) target bundleno = 82 (0x52), region = 387 }
0x18bd   : > { %s7046_s0 = sld [smem:[#allocation69_spill]] }
0x18be   : > { %s7047_s15 = sld [smem:[#allocation70_spill]] }
0x18bf   : > { %s7048_s16 = sld [smem:[#allocation72_spill]] }
0x18c0   : > { %s7049_s18 = sld [smem:[#allocation73_spill]] }
0x18c1   :  { %4071 = vsyncpa [#allocation5], 1 }
0x18c2   :  { %4073 = vsyncpa [#allocation5 + $0x1], 1 }
0x18c3   :  { %4074 = vsyncpa [#allocation8], 1 }
0x18c4   :  { %4076 = vsyncpa [#allocation8 + $0x1], 1 }
0x18c5   :  { %4077 = vsyncpa [#allocation11], 1 }
0x18c6   :  { %4078 = vsyncpa [#allocation6], 1 }
0x18c7   :  { %4080 = vsyncpa [#allocation6 + $0x1], 1 }

</bundles_post_ra>
